<compile_context>
chip_gen: v5e
topology: v5e:2x2
jax: 0.10.0
libtpu: 0.0.40
codegen_flags: <defaults>
</compile_context>

<pallas_src>
import functools

import jax
import jax.numpy as jnp
from jax import lax
from jax.experimental import pallas as pl
from jax.experimental.pallas import tpu as pltpu


def _glance_kernel(x_ref, wqkv_ref, bqkv_ref, wout_ref, bout_ref, o_ref,
                   q_scr, k_scr, v_scr,
                   *, heads, dim_head, eps, n_valid, tk, compute_dtype,
                   exact_recip):
    qt = pl.program_id(1)
    inner = heads * dim_head
    n_pad = k_scr.shape[-1]
    tq = o_ref.shape[-1]

    # ---- Once per batch element: LayerNorm + QKV projection over the full
    #      sequence, cached into VMEM scratch (reused by all query tiles). ----
    @pl.when(qt == 0)
    def _():
        x = x_ref[0].astype(jnp.float32)                          # (C, N_pad)
        mean = jnp.mean(x, axis=0, keepdims=True)                 # (1, N_pad)
        var = jnp.mean((x - mean) ** 2, axis=0, keepdims=True)    # ddof=0
        inv = pl.reciprocal(jnp.sqrt(var) + eps)                  # (1, N_pad)
        xc = ((x - mean) * inv).astype(compute_dtype)             # gamma/beta folded out
        qkv = jnp.dot(wqkv_ref[...], xc,
                      preferred_element_type=jnp.float32) + bqkv_ref[...]   # (3*inner, N_pad)
        q_scr[...] = qkv[:inner].reshape(heads, dim_head, n_pad).astype(q_scr.dtype)
        k_scr[...] = qkv[inner:2 * inner].reshape(heads, dim_head, n_pad).astype(k_scr.dtype)
        v_scr[...] = qkv[2 * inner:].reshape(heads, dim_head, n_pad).astype(v_scr.dtype)

    # ---- Query tile (1/sqrt(d) already folded into the q weight rows). ----
    if tq == n_pad:
        q = q_scr[...]                                            # (h, d, TQ)
    else:
        q = q_scr[:, :, pl.ds(pl.multiple_of(qt * tq, tq), tq)]   # lane-aligned slice

    # ---- Flash-style loop over KV tiles (online softmax). sim/p are bounded
    #      to (h, TQ, TK) regardless of the full sequence length. ----
    def attend(col0, k, v, m, l, acc):
        # sim[h, i, j] = sum_d q[h, d, i] * k[h, d, j]
        sim = lax.dot_general(q, k, (((1,), (1,)), ((0,), (0,))),
                              preferred_element_type=jnp.float32)   # (h, TQ, TK)
        if n_valid < n_pad:   # static: only when the wrapper padded N
            col = lax.broadcasted_iota(jnp.int32, (1, 1, k.shape[-1]), 2) + col0
            sim = jnp.where(col < n_valid, sim, -jnp.inf)
        m_new = jnp.maximum(m, jnp.max(sim, axis=-1, keepdims=True))
        alpha = jnp.exp(m - m_new)                                  # (h, TQ, 1)
        p = jnp.exp(sim - m_new)                                    # f32, EUP
        l_new = alpha * l + jnp.sum(p, axis=-1, keepdims=True)
        # pv[h, d, i] = sum_j v[h, d, j] * p[h, i, j]
        pv = lax.dot_general(v, p.astype(compute_dtype),
                             (((2,), (2,)), ((0,), (0,))),
                             preferred_element_type=jnp.float32)    # (h, d, TQ)
        acc_new = acc * alpha[:, :, 0][:, None, :] + pv
        return m_new, l_new, acc_new

    m0 = jnp.full((heads, tq, 1), -jnp.inf, dtype=jnp.float32)
    l0 = jnp.zeros((heads, tq, 1), dtype=jnp.float32)
    acc0 = jnp.zeros((heads, dim_head, tq), dtype=jnp.float32)

    n_kv = n_pad // tk
    if n_kv == 1:
        _, l, acc = attend(0, k_scr[...], v_scr[...], m0, l0, acc0)
    else:
        def body(kt, carry):
            start = pl.multiple_of(kt * tk, tk)
            k = k_scr[:, :, pl.ds(start, tk)]
            v = v_scr[:, :, pl.ds(start, tk)]
            return attend(kt * tk, k, v, *carry)
        _, l, acc = lax.fori_loop(0, n_kv, body, (m0, l0, acc0))

    # Normalize AFTER the PV matmul (h*d*TQ multiplies, not h*TQ*N divides).
    inv_l = pl.reciprocal(l[:, :, 0], approx=not exact_recip)       # (h, TQ)
    o = (acc * inv_l[:, None, :]).reshape(inner, tq).astype(compute_dtype)

    # to_out: 1x1 Conv1d with bias.
    y = jnp.dot(wout_ref[...], o, preferred_element_type=jnp.float32) + bout_ref[...]
    o_ref[0] = y.astype(o_ref.dtype)


def _pick_tiles(n_pad):
    """Query / KV tile sizes along the lane (sequence) axis."""
    if n_pad % 128 != 0:
        return n_pad, n_pad                       # short unpadded sequence: one tile
    tq = 256 if n_pad % 256 == 0 else 128         # 256 fills the v6e/v7x MXU rows
    tk = max(t for t in (512, 256, 128) if n_pad % t == 0)
    return tq, tk


def glance_forward(x, wqkv, wout, bout, g, beta, *, heads, dim_head,
                   eps=1e-5, compute_dtype=jnp.bfloat16, tq=None, tk=None):
    """x: (B, C, N) float32 (torch NCW layout).  Returns (B, C, N).

    compute_dtype selects the MXU operand precision (bf16 default — native on
    v5e/v6e/v7x — or f32); accumulation is always f32.
    """
    B, C, N = x.shape
    inner = heads * dim_head
    scale = dim_head ** (-0.5)
    cdt = jnp.dtype(compute_dtype)

    # --- one-time weight prep (wrapper side) ---
    w = wqkv.astype(jnp.float32)
    w = w.at[:inner].multiply(scale)                   # fold 1/sqrt(d) into q rows
    g_row = g.reshape(1, C).astype(jnp.float32)
    beta_col = beta.reshape(C, 1).astype(jnp.float32)
    wqkv_f = (w * g_row).astype(cdt)                   # LN gamma folded into columns
    bqkv = (w @ beta_col).astype(jnp.float32)          # LN beta folded into a bias
    wout_c = wout.astype(cdt)
    bout_c = bout.reshape(C, 1).astype(jnp.float32)

    # --- pad N up to a lane multiple; padded keys are masked in-kernel ---
    n_pad = N if (N <= 128 or N % 128 == 0) else ((N + 127) // 128) * 128
    x_in = x if n_pad == N else jnp.pad(x, ((0, 0), (0, 0), (0, n_pad - N)))

    tq_d, tk_d = _pick_tiles(n_pad)
    tq = tq_d if tq is None else tq
    tk = tk_d if tk is None else tk
    assert n_pad % tq == 0 and n_pad % tk == 0
    assert tq == n_pad or tq % 128 == 0
    assert tk == n_pad or tk % 128 == 0

    kernel = functools.partial(
        _glance_kernel, heads=heads, dim_head=dim_head, eps=eps, n_valid=N,
        tk=tk, compute_dtype=cdt, exact_recip=(cdt == jnp.dtype(jnp.float32)))

    # --- VMEM budget: sized to the working set, capped per generation ---
    cb, xb = cdt.itemsize, jnp.dtype(x.dtype).itemsize
    est = (2 * C * n_pad * xb                  # resident x block (double-buffered)
           + 2 * C * tq * xb                   # output tile (double-buffered)
           + 4 * inner * C * cb + (3 * inner + C) * 4      # weights / biases
           + 3 * inner * n_pad * cb            # q/k/v scratch
           + 3 * heads * tq * tk * 4           # sim / p transients (f32)
           + 3 * heads * dim_head * tq * 4)    # q tile / acc / out transients
    try:
        vmem_cap = int(pltpu.get_tpu_info().vmem_capacity_bytes)
    except Exception:
        vmem_cap = 64 * 1024 * 1024            # conservative (v7x per-core)
    vmem_limit = int(min(max(2 * est, 32 * 1024 * 1024), int(0.85 * vmem_cap)))

    out = pl.pallas_call(
        kernel,
        out_shape=jax.ShapeDtypeStruct((B, C, n_pad), x.dtype),
        grid_spec=pltpu.PrefetchScalarGridSpec(
            num_scalar_prefetch=0,
            grid=(B, n_pad // tq),
            in_specs=[
                pl.BlockSpec((1, C, n_pad), lambda b, t: (b, 0, 0)),     # x, full seq
                pl.BlockSpec((3 * inner, C), lambda b, t: (0, 0)),       # W_qkv (folded)
                pl.BlockSpec((3 * inner, 1), lambda b, t: (0, 0)),       # beta-folded bias
                pl.BlockSpec((C, inner), lambda b, t: (0, 0)),           # W_out
                pl.BlockSpec((C, 1), lambda b, t: (0, 0)),               # conv bias
            ],
            out_specs=pl.BlockSpec((1, C, tq), lambda b, t: (b, 0, t)),
            scratch_shapes=[pltpu.VMEM((heads, dim_head, n_pad), cdt)] * 3,
        ),
        compiler_params=pltpu.CompilerParams(
            # batch axis shards across TensorCores; the query-tile axis carries
            # the q/k/v scratch so it must stay "arbitrary".
            dimension_semantics=("parallel", "arbitrary"),
            vmem_limit_bytes=vmem_limit,
        ),
    )(x_in, wqkv_f, bqkv, wout_c, bout_c)

    return out if n_pad == N else out[:, :, :N]


def glance_reference(x, wqkv, wout, bout, g, beta, *, heads, dim_head, eps=1e-5):
    """Pure-JAX reference mirroring the PyTorch forward (for verification)."""
    B, C, N = x.shape
    inner = heads * dim_head
    scale = dim_head ** (-0.5)

    mean = jnp.mean(x, axis=1, keepdims=True)
    var = jnp.var(x, axis=1, keepdims=True)              # ddof=0 == unbiased=False
    std = jnp.sqrt(var)
    xn = (x - mean) / (std + eps) * g.reshape(1, C, 1) + beta.reshape(1, C, 1)

    qkv = jnp.einsum('oc,bcn->bon', wqkv, xn)            # (B, 3*inner, N)
    q, k, v = jnp.split(qkv, 3, axis=1)

    def to_heads(t):                                     # (B, inner, N) -> (B, h, N, d)
        return jnp.transpose(t.reshape(B, heads, dim_head, N), (0, 1, 3, 2))

    q, k, v = map(to_heads, (q, k, v))
    q = q * scale
    sim = jnp.einsum('bhid,bhjd->bhij', q, k)
    attn = jax.nn.softmax(sim, axis=-1)
    out = jnp.einsum('bhij,bhjd->bhid', attn, v)
    out = jnp.transpose(out, (0, 1, 3, 2)).reshape(B, inner, N)
    out = jnp.einsum('oc,bcn->bon', wout, out) + bout.reshape(1, C, 1)
    return out


if __name__ == "__main__":
    heads, dim_head = 4, 16

    def make_case(kk, B, dim, N):
        inner = heads * dim_head
        kx, kq, ko, kb, kg, kbeta = jax.random.split(kk, 6)
        x = jax.random.normal(kx, (B, dim, N), dtype=jnp.float32)
        wqkv = 0.05 * jax.random.normal(kq, (3 * inner, dim), dtype=jnp.float32)
        wout = 0.05 * jax.random.normal(ko, (dim, inner), dtype=jnp.float32)
        bout = 0.01 * jax.random.normal(kb, (dim,), dtype=jnp.float32)
        g = 1.0 + 0.1 * jax.random.normal(kg, (1, dim, 1), dtype=jnp.float32)
        beta = 0.05 * jax.random.normal(kbeta, (1, dim, 1), dtype=jnp.float32)
        return x, wqkv, wout, bout, g, beta

    k1, k2 = jax.random.split(jax.random.PRNGKey(0))

    # Case 1: tiny single-tile shape (B=2, C=32, N=16).
    args = make_case(k1, 2, 32, 16)
    ref = glance_reference(*args, heads=heads, dim_head=dim_head)

    out_f32 = jax.block_until_ready(
        glance_forward(*args, heads=heads, dim_head=dim_head, compute_dtype=jnp.float32))
    assert out_f32.shape == ref.shape
    assert jnp.allclose(out_f32, ref, atol=5e-3, rtol=5e-3), "case1 f32 mismatch"

    out_bf16 = jax.block_until_ready(
        glance_forward(*args, heads=heads, dim_head=dim_head))   # bf16 default
    assert jnp.allclose(out_bf16, ref, atol=3e-2, rtol=3e-2), "case1 bf16 mismatch"

    # Case 2: N=300 -> padded to 384; exercises the key-padding mask and the
    # flash-style KV loop (3 tiles of 128).
    args2 = make_case(k2, 2, 32, 300)
    ref2 = glance_reference(*args2, heads=heads, dim_head=dim_head)

    out2_f32 = jax.block_until_ready(
        glance_forward(*args2, heads=heads, dim_head=dim_head, compute_dtype=jnp.float32))
    assert out2_f32.shape == ref2.shape
    assert jnp.allclose(out2_f32, ref2, atol=1e-2, rtol=1e-2), "case2 f32 mismatch"

    out2_bf16 = jax.block_until_ready(
        glance_forward(*args2, heads=heads, dim_head=dim_head))
    assert jnp.allclose(out2_bf16, ref2, atol=5e-2, rtol=5e-2), "case2 bf16 mismatch"

    print("KERNEL_OK")
</pallas_src>

<mosaic_0001>
module attributes {stable_mosaic.version = 11 : i64} {
  func.func @_glance_kernel(%arg0: i32, %arg1: i32, %arg2: memref<1x32x16xf32, #tpu.memory_space<vmem>>, %arg3: memref<192x32xf32, #tpu.memory_space<vmem>>, %arg4: memref<192x1xf32, #tpu.memory_space<vmem>>, %arg5: memref<32x64xf32, #tpu.memory_space<vmem>>, %arg6: memref<32x1xf32, #tpu.memory_space<vmem>>, %arg7: memref<1x32x16xf32, #tpu.memory_space<vmem>>, %arg8: memref<4x16x16xf32, #tpu.memory_space<vmem>>, %arg9: memref<4x16x16xf32, #tpu.memory_space<vmem>>, %arg10: memref<4x16x16xf32, #tpu.memory_space<vmem>>) attributes {dimension_semantics = [#tpu.dimension_semantics<parallel>, #tpu.dimension_semantics<arbitrary>], iteration_bounds = array<i64: 2, 1>, scalar_prefetch = 0 : i64, scratch_operands = 3 : i64, tpu.core_type = #tpu.core_type<tc>, window_params = [{transform_indices = @transform_0, window_bounds = array<i64: 1, 32, 16>}, {pipeline_mode = #tpu.pipeline_mode<synchronous>, transform_indices = @transform_1, window_bounds = array<i64: 192, 32>}, {pipeline_mode = #tpu.pipeline_mode<synchronous>, transform_indices = @transform_2, window_bounds = array<i64: 192, 1>}, {pipeline_mode = #tpu.pipeline_mode<synchronous>, transform_indices = @transform_3, window_bounds = array<i64: 32, 64>}, {pipeline_mode = #tpu.pipeline_mode<synchronous>, transform_indices = @transform_4, window_bounds = array<i64: 32, 1>}, {transform_indices = @transform_5, window_bounds = array<i64: 1, 32, 16>}]} {
    %c0_i32 = arith.constant 0 : i32
    %0 = arith.cmpi eq, %arg1, %c0_i32 : i32
    %1 = arith.extui %0 : i1 to i32
    %c0_i32_0 = arith.constant 0 : i32
    %2 = arith.cmpi ne, %1, %c0_i32_0 : i32
    scf.if %2 {
      %c0_23 = arith.constant 0 : index
      %c0_24 = arith.constant 0 : index
      %c0_25 = arith.constant 0 : index
      %42 = vector.load %arg2[%c0_23, %c0_24, %c0_25] : memref<1x32x16xf32, #tpu.memory_space<vmem>>, vector<1x32x16xf32>
      %43 = vector.shape_cast %42 : vector<1x32x16xf32> to vector<32x16xf32>
      %cst_26 = arith.constant dense<0.000000e+00> : vector<16xf32>
      %44 = vector.multi_reduction <add>, %43, %cst_26 [0] : vector<32x16xf32> to vector<16xf32>
      %45 = vector.shape_cast %44 : vector<16xf32> to vector<1x16xf32>
      %cst_27 = arith.constant 3.200000e+01 : f32
      %46 = vector.broadcast %cst_27 : f32 to vector<1x16xf32>
      %47 = arith.divf %45, %46 : vector<1x16xf32>
      %48 = vector.broadcast %47 : vector<1x16xf32> to vector<32x16xf32>
      %49 = arith.subf %43, %48 : vector<32x16xf32>
      %50 = arith.mulf %49, %49 : vector<32x16xf32>
      %cst_28 = arith.constant dense<0.000000e+00> : vector<16xf32>
      %51 = vector.multi_reduction <add>, %50, %cst_28 [0] : vector<32x16xf32> to vector<16xf32>
      %52 = vector.shape_cast %51 : vector<16xf32> to vector<1x16xf32>
      %cst_29 = arith.constant 3.200000e+01 : f32
      %53 = vector.broadcast %cst_29 : f32 to vector<1x16xf32>
      %54 = arith.divf %52, %53 : vector<1x16xf32>
      %55 = math.sqrt %54 : vector<1x16xf32>
      %cst_30 = arith.constant 9.99999974E-6 : f32
      %56 = vector.broadcast %cst_30 : f32 to vector<1x16xf32>
      %57 = arith.addf %55, %56 : vector<1x16xf32>
      %58 = tpu.reciprocal %57 : vector<1x16xf32> -> vector<1x16xf32>
      %59 = vector.broadcast %47 : vector<1x16xf32> to vector<32x16xf32>
      %60 = arith.subf %43, %59 : vector<32x16xf32>
      %61 = vector.broadcast %58 : vector<1x16xf32> to vector<32x16xf32>
      %62 = arith.mulf %60, %61 : vector<32x16xf32>
      %c0_31 = arith.constant 0 : index
      %c0_32 = arith.constant 0 : index
      %63 = vector.load %arg3[%c0_31, %c0_32] : memref<192x32xf32, #tpu.memory_space<vmem>>, vector<192x32xf32>
      %cst_33 = arith.constant dense<0.000000e+00> : vector<192x16xf32>
      %64 = tpu.matmul %63, %62, %cst_33 {dimension_numbers = #tpu.dot_dimension_numbers<[1], [0], [0], [1], [0, 0, 1, 1], [], []>} : vector<192x32xf32>, vector<32x16xf32>, vector<192x16xf32> -> vector<192x16xf32>
      %c0_34 = arith.constant 0 : index
      %c0_35 = arith.constant 0 : index
      %65 = vector.load %arg4[%c0_34, %c0_35] : memref<192x1xf32, #tpu.memory_space<vmem>>, vector<192x1xf32>
      %66 = vector.broadcast %65 : vector<192x1xf32> to vector<192x16xf32>
      %67 = arith.addf %64, %66 : vector<192x16xf32>
      %68 = vector.extract_strided_slice %67 {offsets = [0, 0], sizes = [64, 16], strides = [1, 1]} : vector<192x16xf32> to vector<64x16xf32>
      %69 = vector.shape_cast %68 : vector<64x16xf32> to vector<4x16x16xf32>
      %c0_36 = arith.constant 0 : index
      %c0_37 = arith.constant 0 : index
      %c0_38 = arith.constant 0 : index
      %70 = vector.load %arg8[%c0_36, %c0_37, %c0_38] : memref<4x16x16xf32, #tpu.memory_space<vmem>>, vector<4x16x16xf32>
      tpu.vector_store %arg8[%c0_36, %c0_37, %c0_38], %69 {strides = array<i32>} : memref<4x16x16xf32, #tpu.memory_space<vmem>>, vector<4x16x16xf32>,
      %71 = vector.extract_strided_slice %67 {offsets = [64, 0], sizes = [64, 16], strides = [1, 1]} : vector<192x16xf32> to vector<64x16xf32>
      %72 = vector.shape_cast %71 : vector<64x16xf32> to vector<4x16x16xf32>
      %c0_39 = arith.constant 0 : index
      %c0_40 = arith.constant 0 : index
      %c0_41 = arith.constant 0 : index
      %73 = vector.load %arg9[%c0_39, %c0_40, %c0_41] : memref<4x16x16xf32, #tpu.memory_space<vmem>>, vector<4x16x16xf32>
      tpu.vector_store %arg9[%c0_39, %c0_40, %c0_41], %72 {strides = array<i32>} : memref<4x16x16xf32, #tpu.memory_space<vmem>>, vector<4x16x16xf32>,
      %74 = vector.extract_strided_slice %67 {offsets = [128, 0], sizes = [64, 16], strides = [1, 1]} : vector<192x16xf32> to vector<64x16xf32>
      %75 = vector.shape_cast %74 : vector<64x16xf32> to vector<4x16x16xf32>
      %c0_42 = arith.constant 0 : index
      %c0_43 = arith.constant 0 : index
      %c0_44 = arith.constant 0 : index
      %76 = vector.load %arg10[%c0_42, %c0_43, %c0_44] : memref<4x16x16xf32, #tpu.memory_space<vmem>>, vector<4x16x16xf32>
      tpu.vector_store %arg10[%c0_42, %c0_43, %c0_44], %75 {strides = array<i32>} : memref<4x16x16xf32, #tpu.memory_space<vmem>>, vector<4x16x16xf32>,
    } else {
    }
    %c0 = arith.constant 0 : index
    %c0_1 = arith.constant 0 : index
    %c0_2 = arith.constant 0 : index
    %3 = vector.load %arg8[%c0, %c0_1, %c0_2] : memref<4x16x16xf32, #tpu.memory_space<vmem>>, vector<4x16x16xf32>
    %cst = arith.constant 0xFF800000 : f32
    %4 = vector.broadcast %cst : f32 to vector<4x16x1xf32>
    %cst_3 = arith.constant 0.000000e+00 : f32
    %5 = vector.broadcast %cst_3 : f32 to vector<4x16x1xf32>
    %cst_4 = arith.constant 0.000000e+00 : f32
    %6 = vector.broadcast %cst_4 : f32 to vector<4x16x16xf32>
    %c0_5 = arith.constant 0 : index
    %c0_6 = arith.constant 0 : index
    %c0_7 = arith.constant 0 : index
    %7 = vector.load %arg9[%c0_5, %c0_6, %c0_7] : memref<4x16x16xf32, #tpu.memory_space<vmem>>, vector<4x16x16xf32>
    %c0_8 = arith.constant 0 : index
    %c0_9 = arith.constant 0 : index
    %c0_10 = arith.constant 0 : index
    %8 = vector.load %arg10[%c0_8, %c0_9, %c0_10] : memref<4x16x16xf32, #tpu.memory_space<vmem>>, vector<4x16x16xf32>
    %cst_11 = arith.constant dense<0.000000e+00> : vector<4x16x16xf32>
    %9 = tpu.matmul %3, %7, %cst_11 {dimension_numbers = #tpu.dot_dimension_numbers<[1], [1], [2], [2], [0, 0, 0, 2, 1, 2], [0], [0]>} : vector<4x16x16xf32>, vector<4x16x16xf32>, vector<4x16x16xf32> -> vector<4x16x16xf32>
    %cst_12 = arith.constant dense<0xFF800000> : vector<4x16xf32>
    %10 = vector.multi_reduction <maximumf>, %9, %cst_12 [2] : vector<4x16x16xf32> to vector<4x16xf32>
    %11 = vector.shape_cast %10 : vector<4x16xf32> to vector<4x16x1xf32>
    %12 = arith.maximumf %4, %11 : vector<4x16x1xf32>
    %13 = arith.subf %4, %12 : vector<4x16x1xf32>
    %14 = math.exp %13 : vector<4x16x1xf32>
    %15 = vector.broadcast %12 : vector<4x16x1xf32> to vector<4x16x16xf32>
    %16 = arith.subf %9, %15 : vector<4x16x16xf32>
    %17 = math.exp %16 : vector<4x16x16xf32>
    %18 = arith.mulf %14, %5 : vector<4x16x1xf32>
    %cst_13 = arith.constant dense<0.000000e+00> : vector<4x16xf32>
    %19 = vector.multi_reduction <add>, %17, %cst_13 [2] : vector<4x16x16xf32> to vector<4x16xf32>
    %20 = vector.shape_cast %19 : vector<4x16xf32> to vector<4x16x1xf32>
    %21 = arith.addf %18, %20 : vector<4x16x1xf32>
    %cst_14 = arith.constant dense<0.000000e+00> : vector<4x16x16xf32>
    %22 = tpu.matmul %8, %17, %cst_14 {dimension_numbers = #tpu.dot_dimension_numbers<[2], [2], [1], [1], [0, 0, 0, 1, 1, 1], [0], [0]>} : vector<4x16x16xf32>, vector<4x16x16xf32>, vector<4x16x16xf32> -> vector<4x16x16xf32>
    %23 = vector.shape_cast %14 : vector<4x16x1xf32> to vector<4x16xf32>
    %24 = vector.shape_cast %23 : vector<4x16xf32> to vector<4x1x16xf32>
    %25 = vector.broadcast %24 : vector<4x1x16xf32> to vector<4x16x16xf32>
    %26 = arith.mulf %6, %25 : vector<4x16x16xf32>
    %27 = arith.addf %26, %22 : vector<4x16x16xf32>
    %28 = vector.shape_cast %21 : vector<4x16x1xf32> to vector<4x16xf32>
    %29 = tpu.reciprocal %28 : vector<4x16xf32> -> vector<4x16xf32>
    %30 = vector.shape_cast %29 : vector<4x16xf32> to vector<4x1x16xf32>
    %31 = vector.broadcast %30 : vector<4x1x16xf32> to vector<4x16x16xf32>
    %32 = arith.mulf %27, %31 : vector<4x16x16xf32>
    %33 = vector.shape_cast %32 : vector<4x16x16xf32> to vector<64x16xf32>
    %c0_15 = arith.constant 0 : index
    %c0_16 = arith.constant 0 : index
    %34 = vector.load %arg5[%c0_15, %c0_16] : memref<32x64xf32, #tpu.memory_space<vmem>>, vector<32x64xf32>
    %cst_17 = arith.constant dense<0.000000e+00> : vector<32x16xf32>
    %35 = tpu.matmul %34, %33, %cst_17 {dimension_numbers = #tpu.dot_dimension_numbers<[1], [0], [0], [1], [0, 0, 1, 1], [], []>} : vector<32x64xf32>, vector<64x16xf32>, vector<32x16xf32> -> vector<32x16xf32>
    %c0_18 = arith.constant 0 : index
    %c0_19 = arith.constant 0 : index
    %36 = vector.load %arg6[%c0_18, %c0_19] : memref<32x1xf32, #tpu.memory_space<vmem>>, vector<32x1xf32>
    %37 = vector.broadcast %36 : vector<32x1xf32> to vector<32x16xf32>
    %38 = arith.addf %35, %37 : vector<32x16xf32>
    %c0_20 = arith.constant 0 : index
    %c0_21 = arith.constant 0 : index
    %c0_22 = arith.constant 0 : index
    %39 = vector.load %arg7[%c0_20, %c0_21, %c0_22] : memref<1x32x16xf32, #tpu.memory_space<vmem>>, vector<1x32x16xf32>
    %40 = vector.shape_cast %39 : vector<1x32x16xf32> to vector<32x16xf32>
    %41 = vector.shape_cast %38 : vector<32x16xf32> to vector<1x32x16xf32>
    tpu.vector_store %arg7[%c0_20, %c0_21, %c0_22], %41 {strides = array<i32>} : memref<1x32x16xf32, #tpu.memory_space<vmem>>, vector<1x32x16xf32>,
    return
  }
  func.func @transform_0(%arg0: i32, %arg1: i32) -> (i32, i32, i32) {
    %c0_i32 = arith.constant 0 : i32
    %c0_i32_0 = arith.constant 0 : i32
    %c0_i32_1 = arith.constant 0 : i32
    return %arg0, %c0_i32, %c0_i32_0 : i32, i32, i32
  }
  func.func @transform_1(%arg0: i32, %arg1: i32) -> (i32, i32) {
    %c0_i32 = arith.constant 0 : i32
    %c0_i32_0 = arith.constant 0 : i32
    %c0_i32_1 = arith.constant 0 : i32
    return %c0_i32, %c0_i32_0 : i32, i32
  }
  func.func @transform_2(%arg0: i32, %arg1: i32) -> (i32, i32) {
    %c0_i32 = arith.constant 0 : i32
    %c0_i32_0 = arith.constant 0 : i32
    %c0_i32_1 = arith.constant 0 : i32
    return %c0_i32, %c0_i32_0 : i32, i32
  }
  func.func @transform_3(%arg0: i32, %arg1: i32) -> (i32, i32) {
    %c0_i32 = arith.constant 0 : i32
    %c0_i32_0 = arith.constant 0 : i32
    %c0_i32_1 = arith.constant 0 : i32
    return %c0_i32, %c0_i32_0 : i32, i32
  }
  func.func @transform_4(%arg0: i32, %arg1: i32) -> (i32, i32) {
    %c0_i32 = arith.constant 0 : i32
    %c0_i32_0 = arith.constant 0 : i32
    %c0_i32_1 = arith.constant 0 : i32
    return %c0_i32, %c0_i32_0 : i32, i32
  }
  func.func @transform_5(%arg0: i32, %arg1: i32) -> (i32, i32, i32) {
    %c0_i32 = arith.constant 0 : i32
    %c0_i32_0 = arith.constant 0 : i32
    return %arg0, %c0_i32, %arg1 : i32, i32, i32
  }
}

</mosaic_0001>

<bundles_post_ra>
// kernel: tpu_custom_call.1
= control target key start
LH: loop header
LB: loop body
LE: loop exit
PB: predicated region body
PF: predicated region fallthrough
CT: control target
= control target key end

     0   :  { %s4087_s18 = smov 0   ;;  %s4089_s19 = smov 0   ;;  %s5981_s0 = inlined_call_operand.vmem [shape: f32[2,32,16], index: 0, kind: input, shape index: {}]   ;;  %s5982_s1 = inlined_call_operand.vmem [shape: f32[192,32], index: 1, kind: input, shape index: {}]   ;;  %s5983_s2 = inlined_call_operand.vmem [shape: f32[192,1], index: 2, kind: input, shape index: {}]   ;;  %s5984_s3 = inlined_call_operand.vmem [shape: f32[32,64], index: 3, kind: input, shape index: {}]   ;;  %s5985_s4 = inlined_call_operand.vmem [shape: f32[32,1], index: 4, kind: input, shape index: {}]   ;;  %s5986_s5 = inlined_call_operand.vmem [shape: f32[2,32,16], index: 5, kind: output, shape index: {}]  }
   0x1   :  { %s4091_s20 = smov 0  }
   0x2 LB: > { %s27_s21 = sadd.s32 1, %s4049_s19  ;;  %p3473_p0 = scmp.ge.s32.totalorder %s4053_s20, 1  ;;  %s4053_s20 = sphi %s4091_s20, %s15_s20   ;;  %s4049_s19 = sphi %s4089_s19, %s6198_s19   ;;  %s4045_s18 = sphi %s4087_s18, %s6197_s18  }
   0x3   : > { %p29_p1 = scmp.ge.s32.totalorder %s27_s21, 2  ;;  %p201_p2 = scmp.lt.s32.totalorder %s4053_s20, 3 }
   0x5   : > { %s6200_s21 = smov (%p29_p1, %s27_s21), 0  ;;  %p202_p3 = pnand %p3473_p0, %p201_p2 }
   0x7   : > { %205 = sbr.rel (%p202_p3) target bundleno = 1894 (0x766), region = 40 }
   0xc   : > { %v352_v0 = vld [vmem:[%s5983_s2] sm:$0xff]  ;;  %p232_p4 = scmp.lt.s32.totalorder %s4045_s18, 1  ;;  %v5992_v1 = vmov 0   ;;  %v4056_v2 = vmov 32.0   ;;  %vm253_vm0 = vcmask 130048   ;;  %v353_v6 = vld [vmem:[%s5983_s2 + $0x8] sm:$0xff] }
   0xd   : > { %3573 = vset.pattern.permute.xlu0 %v5992_v1  ;;  %3574 = vset.pattern.permute.xlu1 %v5992_v1  ;;  %3977 = vrcp.f32 %v4056_v2  ;;  %v358_v19 = vld [vmem:[%s5983_s2 + $0x30] sm:$0xff]  ;;  %v361_v26 = vld [vmem:[%s5983_s2 + $0x48] sm:$0xff]  ;;  %v364_v38 = vld [vmem:[%s5983_s2 + $0x60] sm:$0xff]  ;;  %vm496_vm8 = vcmask 261120  }
   0xe   : > { %378 = vperm.xlu0 %3573, %v352_v0   ;;  %s6202_s18 = smov (!%p232_p4, %s4045_s18), 1  ;;  %3575 = vset.pattern.permute.xlu2 %v5992_v1  ;;  %v354_v57 = vld [vmem:[%s5983_s2 + $0x10] sm:$0xff]  ;;  %v367_v58 = vld [vmem:[%s5983_s2 + $0x78] sm:$0xff] }
   0xf   : > { %s3532_s24 = sshll.u32 %s6202_s18, 5  ;;  %388 = vperm.xlu1 %3574, %v354_v57   ;;  %v355_v0 = vld [vmem:[%s5983_s2 + $0x18] sm:$0xff]  ;;  %v370_v2 = vld [vmem:[%s5983_s2 + $0x90] sm:$0xff]  ;;  %v337_v57 = vld [vmem:[%s5982_s1 + $0x48] sm:$0xff] }
  0x10   : > { %s236_s27 = scalar_lea.vmem %s5981_s0, %s3532_s24  ;;  %s244_s15 = scalar_lea.vmem %s5986_s5, %s3532_s24 }
  0x11   : > { %v249_v3 = vld [vmem:[%s236_s27] sm:$0xff]  ;;  %v250_v4 = vld [vmem:[%s236_s27 + $0x8] sm:$0xff]  ;;  %v251_v5 = vld [vmem:[%s236_s27 + $0x10] sm:$0xff] }
  0x12   : > { %v252_v7 = vld [vmem:[%s236_s27 + $0x18] sm:$0xff]  ;;  %v254_v8 = vsel %vm253_vm0, %v249_v3, 0.0  ;;  %v255_v9 = vsel %vm253_vm0, %v250_v4, 0.0  ;;  %v257_v10 = vsel %vm253_vm0, %v251_v5, 0.0 }
  0x13   : > { %v3978_v11 = vpop.eup %3977  ;;  %v256_v12 = vadd.f32 %v255_v9, %v254_v8  ;;  %v259_v13 = vsel %vm253_vm0, %v252_v7, 0.0 }
  0x14   : > { %v268_v14 = vmul.f32 32.0, %v3978_v11  ;;  %vm272_vm1 = vweird.f32 %v3978_v11 }
  0x15   : > { %v258_v15 = vadd.f32 %v257_v10, %v256_v12 }
  0x16   : > { %383 = vperm.xlu0 %3573, %v353_v6   ;;  %v269_v16 = vsub.f32 1.0, %v268_v14  ;;  %v373_v6 = vld [vmem:[%s5983_s2 + $0xa8] sm:$0xff]  ;;  %v362_v14 = vld [vmem:[%s5983_s2 + $0x50] sm:$0xff] }
  0x17   : > { %v260_v17 = vadd.f32 %v259_v13, %v258_v15  ;;  %393 = vperm.xlu1 %3574, %v355_v0  }
  0x18   : > { %v270_v20 = vmul.f32 %v3978_v11, %v269_v16 }
  0x19   : > { %v261_v18 = vrot.slane %v260_v17, 4 }
  0x1a   : > { %v271_v23 = vadd.f32 %v3978_v11, %v270_v20 }
  0x1b   : > { %v262_v21 = vadd.f32 %v261_v18, %v260_v17 }
  0x1c   : > { %v273_v27 = vsel %vm272_vm1, %v3978_v11, %v271_v23  ;;  %v339_v23 = vld [vmem:[%s5982_s1 + $0x58] sm:$0xff] }
  0x1d   : > { %v263_v22 = vrot.slane %v262_v21, 2 }
  0x1e   : > { %408 = vperm.xlu0 %3573, %v358_v19  }
  0x1f   : > { %v264_v24 = vadd.f32 %v263_v22, %v262_v21  ;;  %v328_v22 = vld [vmem:[%s5982_s1] sm:$0xff] }
  0x21   : > { %v265_v25 = vrot.slane %v264_v24, 1 }
  0x23   : > { %v266_v28 = vadd.f32 %v265_v25, %v264_v24  ;;  %v344_v24 = vld [vmem:[%s5982_s1 + $0x80] sm:$0xff]  ;;  %v349_v25 = vld [vmem:[%s5982_s1 + $0xa8] sm:$0xff] }
  0x25   : > { %v274_v29 = vmul.f32 %v273_v27, %v266_v28  ;;  %v340_v28 = vld [vmem:[%s5982_s1 + $0x60] sm:$0xff] }
  0x26   : > { %423 = vperm.xlu0 %3573, %v361_v26   ;;  %v365_v26 = vld [vmem:[%s5983_s2 + $0x68] sm:$0xff] }
  0x27   : > { %v4132_v30 = vsub.f32 %v249_v3, %v274_v29  ;;  %v4134_v31 = vsub.f32 %v250_v4, %v274_v29  ;;  %v4136_v32 = vsub.f32 %v251_v5, %v274_v29  ;;  %v4138_v33 = vsub.f32 %v252_v7, %v274_v29  ;;  %v359_v5 = vld [vmem:[%s5983_s2 + $0x38] sm:$0xff]  ;;  %v345_v29 = vld [vmem:[%s5982_s1 + $0x88] sm:$0xff] }
  0x28   : > { %413 = vperm.xlu1 %3574, %v359_v5  }
  0x29   : > { %v279_v34 = vmul.f32 %v4132_v30, %v4132_v30  ;;  %v280_v35 = vmul.f32 %v4134_v31, %v4134_v31  ;;  %v281_v36 = vmul.f32 %v4136_v32, %v4136_v32  ;;  %v282_v37 = vmul.f32 %v4138_v33, %v4138_v33 }
  0x2b   : > { %v283_v39 = vsel %vm253_vm0, %v279_v34, 0.0  ;;  %v284_v40 = vsel %vm253_vm0, %v280_v35, 0.0  ;;  %v286_v41 = vsel %vm253_vm0, %v281_v36, 0.0  ;;  %v288_v43 = vsel %vm253_vm0, %v282_v37, 0.0  ;;  %v342_v34 = vld [vmem:[%s5982_s1 + $0x70] sm:$0xff]  ;;  %v356_v35 = vld [vmem:[%s5983_s2 + $0x20] sm:$0xff] }
  0x2c   : > { %v285_v42 = vadd.f32 %v284_v40, %v283_v39  ;;  %398 = vperm.xlu2 %3575, %v356_v35   ;;  %v332_v36 = vld [vmem:[%s5982_s1 + $0x20] sm:$0xff]  ;;  %v343_v37 = vld [vmem:[%s5982_s1 + $0x78] sm:$0xff]  ;;  %v333_v40 = vld [vmem:[%s5982_s1 + $0x28] sm:$0xff] }
  0x2d   : > { %v368_v39 = vld [vmem:[%s5983_s2 + $0x80] sm:$0xff] }
  0x2e   : > { %438 = vperm.xlu0 %3573, %v364_v38   ;;  %v287_v44 = vadd.f32 %v286_v41, %v285_v42  ;;  %v357_v38 = vld [vmem:[%s5983_s2 + $0x28] sm:$0xff]  ;;  %v360_v41 = vld [vmem:[%s5983_s2 + $0x40] sm:$0xff]  ;;  %v371_v42 = vld [vmem:[%s5983_s2 + $0x98] sm:$0xff] }
  0x30   : > { %v289_v45 = vadd.f32 %v288_v43, %v287_v44  ;;  %428 = vperm.xlu1 %3574, %v362_v14   ;;  %v347_v43 = vld [vmem:[%s5982_s1 + $0x98] sm:$0xff]  ;;  %v350_v44 = vld [vmem:[%s5982_s1 + $0xb0] sm:$0xff] }
  0x32   : > { %v290_v46 = vrot.slane %v289_v45, 4 }
  0x34   : > { %v291_v47 = vadd.f32 %v290_v46, %v289_v45  ;;  %403 = vperm.xlu2 %3575, %v357_v38   ;;  %v334_v45 = vld [vmem:[%s5982_s1 + $0x30] sm:$0xff]  ;;  %v363_v46 = vld [vmem:[%s5983_s2 + $0x58] sm:$0xff] }
  0x36   : > { %v292_v48 = vrot.slane %v291_v47, 2  ;;  %453 = vperm.xlu0 %3573, %v367_v58   ;;  %v372_v58 = vld [vmem:[%s5983_s2 + $0xa0] sm:$0xff] }
  0x38   : > { %v293_v49 = vadd.f32 %v292_v48, %v291_v47  ;;  %443 = vperm.xlu1 %3574, %v365_v26   ;;  %v374_v47 = vld [vmem:[%s5983_s2 + $0xb0] sm:$0xff]  ;;  %v348_v48 = vld [vmem:[%s5982_s1 + $0xa0] sm:$0xff] }
  0x3a   : > { %v294_v50 = vrot.slane %v293_v49, 1 }
  0x3c   : > { %v295_v51 = vadd.f32 %v294_v50, %v293_v49  ;;  %418 = vperm.xlu2 %3575, %v360_v41   ;;  %v351_v49 = vld [vmem:[%s5982_s1 + $0xb8] sm:$0xff] }
  0x3d   : > { %v335_v50 = vld [vmem:[%s5982_s1 + $0x38] sm:$0xff] }
  0x3e   : > { %v296_v52 = vmul.f32 %v295_v51, %v273_v27  ;;  %468 = vperm.xlu0 %3573, %v370_v2   ;;  %v329_v27 = vld [vmem:[%s5982_s1 + $0x8] sm:$0xff]  ;;  %v366_v51 = vld [vmem:[%s5983_s2 + $0x70] sm:$0xff]  ;;  %v2546_v2 = vld [vmem:[%s5985_s4 + $0x18] sm:$0xff] }
  0x40   : > { %3979 = vrsqrt.f32 %v296_v52  ;;  %vm304_vm2 = vcmp.eq.f32.partialorder %v296_v52, inf  ;;  %v307_v61 = vand.u32 2147483648, %v296_v52  ;;  %vm306_vm3 = vcmp.eq.f32.partialorder %v296_v52, 0.0  ;;  %458 = vperm.xlu1 %3574, %v368_v39  }
  0x44   : > { %433 = vperm.xlu2 %3575, %v363_v46  }
  0x46   : > { %v3980_v53 = vpop.eup %3979  ;;  %483 = vperm.xlu0 %3573, %v373_v6  }
  0x47   : > { %v298_v54 = vmul.f32 %v3980_v53, %v296_v52 }
  0x48   : > { %473 = vperm.xlu1 %3574, %v371_v42  }
  0x49   : > { %v299_v55 = vmul.f32 %v3980_v53, %v298_v54 }
  0x4b   : > { %v300_v56 = vmul.f32 0.5, %v299_v55  ;;  %v369_v55 = vld [vmem:[%s5983_s2 + $0x88] sm:$0xff] }
  0x4c   : > { %448 = vperm.xlu2 %3575, %v366_v51  }
  0x4d   : > { %v301_v59 = vsub.f32 1.5, %v300_v56  ;;  %v2545_v56 = vld [vmem:[%s5985_s4 + $0x10] sm:$0xff] }
  0x4f   : > { %v302_v60 = vmul.f32 %v3980_v53, %v301_v59  ;;  %v336_v53 = vld [vmem:[%s5982_s1 + $0x40] sm:$0xff] }
  0x50   : > { %488 = vperm.xlu1 %3574, %v374_v47  }
  0x51   : > { %v303_v62 = vmul.f32 %v302_v60, %v296_v52  ;;  %v338_v60 = vld [vmem:[%s5982_s1 + $0x50] sm:$0xff] }
  0x53   : > { %v305_v63 = vsel %vm304_vm2, %v296_v52, %v303_v62  ;;  %v2543_v52 = vld [vmem:[%s5985_s4] sm:$0xff] }
  0x54   : > { %v308_v3 = vsel %vm306_vm3, %v307_v61, %v305_v63  ;;  %463 = vperm.xlu2 %3575, %v369_v55   ;;  %v375_v61 = vld [vmem:[%s5983_s2 + $0xb8] sm:$0xff]  ;;  %v2544_v63 = vld [vmem:[%s5985_s4 + $0x8] sm:$0xff] }
  0x55   : > { %v309_v4 = vadd.f32 1e-05, %v308_v3 }
  0x57   : > { %3981 = vrcp.f32 %v309_v4  ;;  %v321_v9 = vand.u32 2147483648, %v309_v4  ;;  %vm315_vm4 = vweird.f32 %v309_v4  ;;  %v319_v11 = vand.u32 2147483647, %v309_v4 }
  0x58   : > { %2549 = vperm.xlu1 %3574, %v2543_v52  }
  0x59   : > { %v322_v13 = vor.u32 1.1754944e-38, %v321_v9  ;;  %vm320_vm7 = vcmp.eq.f32.partialorder %v319_v11, 8.507059e+37 }
  0x5c   : > { %478 = vperm.xlu2 %3575, %v372_v58  }
  0x5d   : > { %v3982_v7 = vpop.eup %3981 }
  0x5e   : > { %v311_v8 = vmul.f32 %v3982_v7, %v309_v4  ;;  %vm316_vm5 = vweird.f32 %v3982_v7 }
  0x5f   : > { %vm317_vm6 = vmor %vm315_vm4, %vm316_vm5 }
  0x60   : > { %v312_v10 = vsub.f32 1.0, %v311_v8  ;;  %2559 = vperm.xlu1 %3574, %v2545_v56  }
  0x62   : > { %v313_v12 = vmul.f32 %v3982_v7, %v312_v10 }
  0x64   : > { %v314_v15 = vadd.f32 %v3982_v7, %v313_v12  ;;  %493 = vperm.xlu2 %3575, %v375_v61  }
  0x66   : > { %v318_v16 = vsel %vm317_vm6, %v3982_v7, %v314_v15 }
  0x67   : > { %v323_v17 = vsel %vm320_vm7, %v322_v13, %v318_v16 }
  0x68   : > { %v327_v18 = vmul.f32 %v323_v17, %v4138_v33  ;;  %v326_v19 = vmul.f32 %v323_v17, %v4136_v32  ;;  %v325_v20 = vmul.f32 %v323_v17, %v4134_v31  ;;  %v324_v21 = vmul.f32 %v323_v17, %v4132_v30  ;;  %v330_v30 = vld [vmem:[%s5982_s1 + $0x10] sm:$0xff]  ;;  %v341_v31 = vld [vmem:[%s5982_s1 + $0x68] sm:$0xff]  ;;  %v331_v33 = vld [vmem:[%s5982_s1 + $0x18] sm:$0xff] }
  0x69   : > { %v346_v32 = vld [vmem:[%s5982_s1 + $0x90] sm:$0xff] }
  0x6a   : > { %581 = vmatpush.msra.mxu0 %v327_v18  ;;  %3534 = vmatpush.msra.mxu1 %v327_v18 }
  0x6b   : > { %3535 = vmatpush.msra.mxu2 %v327_v18  ;;  %3536 = vmatpush.msra.mxu3 %v327_v18 }
  0x6c   : > { %582 = vmatpush.msra.mxu0 %v326_v19  ;;  %3537 = vmatpush.msra.mxu1 %v326_v19 }
  0x6d   : > { %3538 = vmatpush.msra.mxu2 %v326_v19  ;;  %3539 = vmatpush.msra.mxu3 %v326_v19 }
  0x6e   : > { %583 = vmatpush.msra.mxu0 %v325_v20  ;;  %3540 = vmatpush.msra.mxu1 %v325_v20 }
  0x6f   : > { %3541 = vmatpush.msra.mxu2 %v325_v20  ;;  %3542 = vmatpush.msra.mxu3 %v325_v20 }
  0x70   : > { %584 = vmatpush.msra.mxu0 %v324_v21  ;;  %3543 = vmatpush.msra.mxu1 %v324_v21 }
  0x71   : > { %3544 = vmatpush.msra.mxu2 %v324_v21  ;;  %3545 = vmatpush.msra.mxu3 %v324_v21 }
  0x72   : > { %3478 = vmatmul.msk.f32.vlgmr.msra.gmra.mxu0 %vm496_vm8, %v328_v22  ;;  %3489 = vmatmul.msk.f32.vlgmr.msra.gmra.mxu1 %vm496_vm8, %v339_v23 }
  0x73   : > { %3494 = vmatmul.msk.f32.vlgmr.msra.gmra.mxu2 %vm496_vm8, %v344_v24  ;;  %3499 = vmatmul.msk.f32.vlgmr.msra.gmra.mxu3 %vm496_vm8, %v349_v25 }
  0x74   : > { %2554 = vperm.xlu2 %3575, %v2544_v63  }
  0x7a   : > { %3479 = vmatmul.msk.f32.gmra.mxu0 %vm496_vm8, %v329_v27  ;;  %3490 = vmatmul.msk.f32.gmra.mxu1 %vm496_vm8, %v340_v28 }
  0x7b   : > { %3495 = vmatmul.msk.f32.gmra.mxu2 %vm496_vm8, %v345_v29  ;;  %3500 = vmatmul.msk.f32.gmra.mxu3 %vm496_vm8, %v350_v44 }
  0x7c   : > { %2564 = vperm.xlu2 %3575, %v2546_v2  }
  0x80   : > { %v379_v54 = vpop.permute.xlu0 %378 }
  0x81   : > { %v389_v3 = vpop.permute.xlu1 %388 }
  0x82   : > { %3480 = vmatmul.msk.f32.gmra.mxu0 %vm496_vm8, %v330_v30  ;;  %3491 = vmatmul.msk.f32.gmra.mxu1 %vm496_vm8, %v341_v31 }
  0x83   : > { %3496 = vmatmul.msk.f32.gmra.mxu2 %vm496_vm8, %v346_v32  ;;  %3501 = vmatmul.msk.f32.gmra.mxu3 %vm496_vm8, %v351_v49 }
  0x86   : > { %v399_v14 = vpop.permute.xlu2 %398 }
  0x88   : > { %v384_v59 = vpop.permute.xlu0 %383 }
  0x89   : > { %v394_v5 = vpop.permute.xlu1 %393 }
  0x8a   : > { %3481 = vmatmul.msk.f32.gmra.mxu0 %vm496_vm8, %v331_v33  ;;  %3492 = vmatmul.msk.f32.gmra.mxu1 %vm496_vm8, %v342_v34 }
  0x8b   : > { %3497 = vmatmul.msk.f32.gmra.mxu2 %vm496_vm8, %v347_v43 }
  0x8e   : > { %v404_v29 = vpop.permute.xlu2 %403 }
  0x90   : > { %v4318_v62 = vpop.permute.xlu0 %408 }
  0x92   : > { %3482 = vmatmul.msk.f32.gmra.mxu0 %vm496_vm8, %v332_v36  ;;  %3493 = vmatmul.msk.f32.gmra.mxu1 %vm496_vm8, %v343_v37 }
  0x93   : > { %3498 = vmatmul.msk.f32.gmra.mxu2 %vm496_vm8, %v348_v48 }
  0x96   : > { %v419_v36 = vpop.permute.xlu2 %418 }
  0x98   : > { %v4323_v0 = vpop.permute.xlu0 %423 }
  0x9a   : > { %3483 = vmatmul.msk.f32.gmra.mxu0 %vm496_vm8, %v333_v40  ;;  %v4328_v7 = vpop.permute.xlu1 %413 }
  0x9e   : > { %v434_v44 = vpop.permute.xlu2 %433 }
  0xa0   : > { %v439_v4 = vpop.permute.xlu0 %438 }
  0xa2   : > { %3484 = vmatmul.msk.f32.gmra.mxu0 %vm496_vm8, %v334_v45  ;;  %v4331_v12 = vpop.permute.xlu1 %428 }
  0xa8   : > { %v454_v6 = vpop.permute.xlu0 %453 }
  0xaa   : > { %3485 = vmatmul.msk.f32.gmra.mxu0 %vm496_vm8, %v335_v50  ;;  %v444_v23 = vpop.permute.xlu1 %443  ;;  %v449_v50 = vpop.permute.xlu2 %448 }
  0xb0   : > { %v469_v8 = vpop.permute.xlu0 %468 }
  0xb2   : > { %3486 = vmatmul.msk.f32.gmra.mxu0 %vm496_vm8, %v336_v53  ;;  %v459_v47 = vpop.permute.xlu1 %458 }
  0xb8   : > { %v484_v13 = vpop.permute.xlu0 %483 }
  0xba   : > { %3487 = vmatmul.msk.f32.gmra.mxu0 %vm496_vm8, %v337_v57  ;;  %v464_v57 = vpop.permute.xlu2 %463 }
  0xc2   : > { %3488 = vmatmul.msk.f32.gmra.mxu0 %vm496_vm8, %v338_v60 }
  0xef   : > { %v586_v9 = vpop.f32.mrf.mxu0  ;;  %v619_v10 = vpop.f32.mrf.mxu1 }
  0xf0   : > { %v587_v11 = vadd.f32 %v586_v9, %v379_v54  ;;  %v620_v46 = vadd.f32 %v619_v10, %v434_v44  ;;  %v474_v54 = vpop.permute.xlu1 %473 }
  0xf2   : > { %658 = vst.msk [vmem:[#allocation2] sm:$0xff] %vm253_vm0, %v587_v11 }
  0xf3   : > { %669 = vst.msk [vmem:[#allocation3 + $0x18] sm:$0xff] %vm253_vm0, %v620_v46 }
  0xf6   : > { %v634_v15 = vpop.f32.mrf.mxu2  ;;  %v649_v16 = vpop.f32.mrf.mxu3 }
  0xf7   : > { %v650_v17 = vadd.f32 %v649_v16, %v484_v13  ;;  %v589_v18 = vpop.f32.mrf.mxu0  ;;  %v622_v19 = vpop.f32.mrf.mxu1  ;;  %v635_v52 = vadd.f32 %v634_v15, %v459_v47 }
  0xf8   : > { %v590_v20 = vadd.f32 %v589_v18, %v384_v59  ;;  %v623_v21 = vadd.f32 %v622_v19, %v439_v4  ;;  %v489_v63 = vpop.permute.xlu1 %488 }
  0xf9   : > { %679 = vst.msk [vmem:[#allocation4 + $0x28] sm:$0xff] %vm253_vm0, %v650_v17  ;;  %v682_v22 = vld [vmem:[#allocation2] sm:$0xff] }
  0xfa   : > { %659 = vst.msk [vmem:[#allocation2 + $0x8] sm:$0xff] %vm253_vm0, %v590_v20  ;;  %706 = vxpose.xlu0.b32.start [1/2] (short) (narrow) %v682_v22, 16  ;;  %v693_v61 = vld [vmem:[#allocation3 + $0x18] sm:$0xff] }
  0xfb   : > { %670 = vst.msk [vmem:[#allocation3 + $0x20] sm:$0xff] %vm253_vm0, %v623_v21  ;;  %820 = vmatpush.msrb.mxu2 %v693_v61 }
  0xfc   : > { %674 = vst.msk [vmem:[#allocation4] sm:$0xff] %vm253_vm0, %v635_v52 }
  0xfe   : > { %v637_v24 = vpop.f32.mrf.mxu2 }
  0xff   : > { %v592_v25 = vpop.f32.mrf.mxu0  ;;  %v625_v26 = vpop.f32.mrf.mxu1  ;;  %v638_v59 = vadd.f32 %v637_v24, %v464_v57 }
 0x100   : > { %v593_v27 = vadd.f32 %v592_v25, %v389_v3  ;;  %v626_v28 = vadd.f32 %v625_v26, %v444_v23  ;;  %v652_v3 = vpop.f32.mrf.mxu3  ;;  %v4360_v26 = vpop.permute.xlu1 %2549 }
 0x101   : > { %v683_v30 = vld [vmem:[#allocation2 + $0x8] sm:$0xff]  ;;  %675 = vst.msk [vmem:[#allocation4 + $0x8] sm:$0xff] %vm253_vm0, %v638_v59 }
 0x102   : > { %660 = vst.msk [vmem:[#allocation2 + $0x10] sm:$0xff] %vm253_vm0, %v593_v27  ;;  %707 = vxpose.xlu0.b32.end [2/2] (short) (narrow) %v683_v30, 16  ;;  %v694_v39 = vld [vmem:[#allocation3 + $0x20] sm:$0xff] }
 0x103   : > { %671 = vst.msk [vmem:[#allocation3 + $0x28] sm:$0xff] %vm253_vm0, %v626_v28 }
 0x104   : > { %6008 = vst [vmem:[#allocation5_spill] sm:$0xff] %v4360_v26 }
 0x106   : > { %v640_v31 = vpop.f32.mrf.mxu2 }
 0x107   : > { %v641_v32 = vadd.f32 %v640_v31, %v469_v8  ;;  %v595_v33 = vpop.f32.mrf.mxu0  ;;  %v628_v34 = vpop.f32.mrf.mxu1 }
 0x108   : > { %v596_v35 = vadd.f32 %v595_v33, %v394_v5  ;;  %v629_v53 = vadd.f32 %v628_v34, %v449_v50  ;;  %v653_v5 = vadd.f32 %v652_v3, %v489_v63  ;;  %v479_v8 = vpop.permute.xlu2 %478  ;;  %v655_v11 = vpop.f32.mrf.mxu3 }
 0x109   : > { %676 = vst.msk [vmem:[#allocation4 + $0x10] sm:$0xff] %vm253_vm0, %v641_v32  ;;  %v684_v37 = vld [vmem:[#allocation2 + $0x10] sm:$0xff] }
 0x10a   : > { %661 = vst.msk [vmem:[#allocation2 + $0x18] sm:$0xff] %vm253_vm0, %v596_v35  ;;  %v695_v38 = vld [vmem:[#allocation3 + $0x28] sm:$0xff]  ;;  %768 = vxpose.xlu1.b32.start [1/2] (short) (narrow) %v684_v37, 16 }
 0x10b   : > { %881 = vmatpush.msrb.mxu3 %v695_v38  ;;  %672 = vst.msk [vmem:[#allocation3 + $0x30] sm:$0xff] %vm253_vm0, %v629_v53 }
 0x10c   : > { %680 = vst.msk [vmem:[#allocation4 + $0x30] sm:$0xff] %vm253_vm0, %v653_v5  ;;  %v698_v5 = vld [vmem:[#allocation4] sm:$0xff] }
 0x10d   : > { %882 = vmatpush.msrb.mxu3 %v694_v39 }
 0x10e   : > { %v643_v60 = vpop.f32.mrf.mxu2 }
 0x10f   : > { %v598_v40 = vpop.f32.mrf.mxu0  ;;  %v631_v41 = vpop.f32.mrf.mxu1  ;;  %v644_v2 = vadd.f32 %v643_v60, %v474_v54 }
 0x110   : > { %v599_v42 = vadd.f32 %v598_v40, %v399_v14  ;;  %v632_v43 = vadd.f32 %v631_v41, %v454_v6  ;;  %v494_v15 = vpop.permute.xlu2 %493 }
 0x111   : > { %v685_v45 = vld [vmem:[#allocation2 + $0x18] sm:$0xff]  ;;  %677 = vst.msk [vmem:[#allocation4 + $0x18] sm:$0xff] %vm253_vm0, %v644_v2  ;;  %v656_v17 = vadd.f32 %v655_v11, %v494_v15 }
 0x112   : > { %662 = vst.msk [vmem:[#allocation2 + $0x20] sm:$0xff] %vm253_vm0, %v599_v42  ;;  %769 = vxpose.xlu1.b32.end [2/2] (short) (narrow) %v685_v45, 16  ;;  %v696_v24 = vld [vmem:[#allocation3 + $0x30] sm:$0xff] }
 0x113   : > { %673 = vst.msk [vmem:[#allocation3 + $0x38] sm:$0xff] %vm253_vm0, %v632_v43 }
 0x114   : > { %681 = vst.msk [vmem:[#allocation4 + $0x38] sm:$0xff] %vm253_vm0, %v656_v17 }
 0x116   : > { %v646_v9 = vpop.f32.mrf.mxu2 }
 0x117   : > { %v601_v48 = vpop.f32.mrf.mxu0  ;;  %v647_v10 = vadd.f32 %v646_v9, %v479_v8 }
 0x118   : > { %v602_v49 = vadd.f32 %v601_v48, %v404_v29  ;;  %v4363_v27 = vpop.permute.xlu2 %2554 }
 0x119   : > { %v686_v51 = vld [vmem:[#allocation2 + $0x20] sm:$0xff]  ;;  %678 = vst.msk [vmem:[#allocation4 + $0x20] sm:$0xff] %vm253_vm0, %v647_v10 }
 0x11a   : > { %663 = vst.msk [vmem:[#allocation2 + $0x28] sm:$0xff] %vm253_vm0, %v602_v49  ;;  %829 = vxpose.xlu2.b32.start [1/2] (short) (narrow) %v686_v51, 16  ;;  %v697_v23 = vld [vmem:[#allocation3 + $0x38] sm:$0xff] }
 0x11b   : > { %6009 = vst [vmem:[#allocation6_spill] sm:$0xff] %v4363_v27 }
 0x11f   : > { %v604_v55 = vpop.f32.mrf.mxu0 }
 0x120   : > { %v605_v56 = vadd.f32 %v604_v55, %v4318_v62  ;;  %v4368_v29 = vpop.permute.xlu2 %2564 }
 0x121   : > { %v687_v58 = vld [vmem:[#allocation2 + $0x28] sm:$0xff]  ;;  %6011 = vst [vmem:[#allocation8_spill] sm:$0xff] %v4368_v29 }
 0x122   : > { %664 = vst.msk [vmem:[#allocation2 + $0x30] sm:$0xff] %vm253_vm0, %v605_v56  ;;  %830 = vxpose.xlu2.b32.end [2/2] (short) (narrow) %v687_v58, 16 }
 0x127   : > { %v607_v4 = vpop.f32.mrf.mxu0 }
 0x128   : > { %v608_v6 = vadd.f32 %v607_v4, %v4328_v7 }
 0x129   : > { %v688_v62 = vld [vmem:[#allocation2 + $0x30] sm:$0xff] }
 0x12a   : > { %665 = vst.msk [vmem:[#allocation2 + $0x38] sm:$0xff] %vm253_vm0, %v608_v6  ;;  %890 = vxpose.xlu0.b32.start [1/2] (short) (narrow) %v688_v62, 16 }
 0x12f   : > { %v610_v13 = vpop.f32.mrf.mxu0 }
 0x130   : > { %v611_v14 = vadd.f32 %v610_v13, %v419_v36 }
 0x131   : > { %v689_v16 = vld [vmem:[#allocation2 + $0x38] sm:$0xff] }
 0x132   : > { %666 = vst.msk [vmem:[#allocation3] sm:$0xff] %vm253_vm0, %v611_v14  ;;  %891 = vxpose.xlu0.b32.end [2/2] (short) (narrow) %v689_v16, 16  ;;  %v699_v14 = vld [vmem:[#allocation4 + $0x8] sm:$0xff] }
 0x137   : > { %v613_v7 = vpop.f32.mrf.mxu0 }
 0x138   : > { %v614_v18 = vadd.f32 %v613_v7, %v4323_v0 }
 0x139   : > { %v690_v22 = vld [vmem:[#allocation3] sm:$0xff] }
 0x13a   : > { %667 = vst.msk [vmem:[#allocation3 + $0x8] sm:$0xff] %vm253_vm0, %v614_v18 }
 0x13f   : > { %v616_v19 = vpop.f32.mrf.mxu0 }
 0x140   : > { %v617_v20 = vadd.f32 %v616_v19, %v4331_v12  ;;  %v4365_v12 = vpop.permute.xlu1 %2559 }
 0x141   : > { %v691_v21 = vld [vmem:[#allocation3 + $0x8] sm:$0xff]  ;;  %6010 = vst [vmem:[#allocation7_spill] sm:$0xff] %v4365_v12 }
 0x142   : > { %759 = vmatpush.msrb.mxu1 %v691_v21  ;;  %668 = vst.msk [vmem:[#allocation3 + $0x10] sm:$0xff] %vm253_vm0, %v617_v20 }
 0x144   : > { %760 = vmatpush.msrb.mxu1 %v690_v22 }
 0x146   : > { %942 = vmatpush.msra.mxu1 %v697_v23  ;;  %v700_v23 = vld [vmem:[#allocation4 + $0x10] sm:$0xff] }
 0x148   : > { %943 = vmatpush.msra.mxu1 %v696_v24 }
 0x149   : > { %v692_v25 = vld [vmem:[#allocation3 + $0x10] sm:$0xff] }
 0x14a   : > { %821 = vmatpush.msrb.mxu2 %v692_v25 }
 0x19e   : > { %v722_v0 = vpop.trf.xlu0 }
 0x19f   : > { %3502 = vmatmul.msk.f32.vlgmr.msrb.gmra.mxu1 %vm253_vm0, %v722_v0 }
 0x1a6   : > { %v723_v28 = vpop.trf.xlu0 }
 0x1a7   : > { %3503 = vmatmul.msk.f32.gmra.mxu1 %vm253_vm0, %v723_v28 }
 0x1ae   : > { %v784_v30 = vpop.trf.xlu1 }
 0x1af   : > { %3504 = vmatmul.msk.f32.vlgmr.msrb.gmra.mxu2 %vm253_vm0, %v784_v30 }
 0x1b3   : > { %v845_v31 = vpop.trf.xlu2 }
 0x1b4   : > { %3506 = vmatmul.msk.f32.vlgmr.msrb.gmra.mxu3 %vm253_vm0, %v845_v31  ;;  %v701_v31 = vld [vmem:[#allocation4 + $0x18] sm:$0xff] }
 0x1b6   : > { %v785_v32 = vpop.trf.xlu1 }
 0x1b7   : > { %3505 = vmatmul.msk.f32.gmra.mxu2 %vm253_vm0, %v785_v32  ;;  %v702_v32 = vld [vmem:[#allocation4 + $0x20] sm:$0xff] }
 0x1bb   : > { %v846_v33 = vpop.trf.xlu2 }
 0x1bc   : > { %3507 = vmatmul.msk.f32.gmra.mxu3 %vm253_vm0, %v846_v33 }
 0x1ce   : > { %v906_v34 = vpop.trf.xlu0 }
 0x1cf   : > { %3508 = vmatmul.msk.f32.vlgmr.msra.gmra.mxu1 %vm253_vm0, %v906_v34 }
 0x1d6   : > { %v907_v35 = vpop.trf.xlu0 }
 0x1d7   : > { %3509 = vmatmul.msk.f32.gmra.mxu1 %vm253_vm0, %v907_v35 }
 0x21c   : > { %v762_v36 = vpop.f32.mrf.mxu1 }
 0x21d   : > { %v951_v37 = vsel %vm253_vm0, %v762_v36, -inf }
 0x21e   : > { %952 = vmax.xlane.f32.xlu2 %v951_v37 }
 0x224   : > { %v765_v38 = vpop.f32.mrf.mxu1 }
 0x225   : > { %v954_v39 = vsel %vm253_vm0, %v765_v38, -inf }
 0x226   : > { %955 = vmax.xlane.f32.xlu0 %v954_v39  ;;  %v704_v39 = vld [vmem:[#allocation4 + $0x30] sm:$0xff] }
 0x232   : > { %v823_v40 = vpop.f32.mrf.mxu2 }
 0x233   : > { %v957_v41 = vsel %vm253_vm0, %v823_v40, -inf }
 0x234   : > { %958 = vmax.xlane.f32.xlu1 %v957_v41  ;;  %v5987_v41 = vlaneseq }
 0x237   : > { %v884_v42 = vpop.f32.mrf.mxu3 }
 0x238   : > { %v963_v43 = vsel %vm253_vm0, %v884_v42, -inf }
 0x239   : > { %964 = vmax.xlane.f32.xlu2 %v963_v43 }
 0x23a   : > { %v826_v44 = vpop.f32.mrf.mxu2 }
 0x23b   : > { %v960_v45 = vsel %vm253_vm0, %v826_v44, -inf }
 0x23c   : > { %961 = vmax.xlane.f32.xlu1 %v960_v45 }
 0x23f   : > { %v887_v46 = vpop.f32.mrf.mxu3 }
 0x240   : > { %v966_v47 = vsel %vm253_vm0, %v887_v46, -inf }
 0x244   : > { %967 = vmax.xlane.f32.xlu1 %v966_v47 }
 0x24c   : > { %v945_v48 = vpop.f32.mrf.mxu1 }
 0x24d   : > { %v969_v49 = vsel %vm253_vm0, %v945_v48, -inf }
 0x24e   : > { %970 = vmax.xlane.f32.xlu2 %v969_v49 }
 0x254   : > { %v4383_v50 = vpop.f32.mrf.mxu1 }
 0x255   : > { %v972_v51 = vsel %vm253_vm0, %v4383_v50, -inf }
 0x256   : > { %973 = vmax.xlane.f32.xlu0 %v972_v51 }
 0x291   : > { %v4387_v52 = vpop.xlane.xlu2 %952 }
 0x292   : > { %v999_v53 = vsub.f32 %v762_v36, %v4387_v52  ;;  %v703_v36 = vld [vmem:[#allocation4 + $0x28] sm:$0xff] }
 0x294   : > { %v1007_v54 = vmul.f32 1.442695, %v999_v53 }
 0x296   : > { %3983 = vpow2.f32 %v1007_v54 }
 0x299   : > { %v4390_v55 = vpop.xlane.xlu0 %955 }
 0x29a   : > { %v1000_v56 = vsub.f32 %v765_v38, %v4390_v55 }
 0x29c   : > { %v1009_v57 = vmul.f32 1.442695, %v1000_v56  ;;  %v3984_v58 = vpop.eup %3983 }
 0x29d   : > { %v1031_v59 = vsel %vm253_vm0, %v3984_v58, 0.0 }
 0x29e   : > { %3985 = vpow2.f32 %v1009_v57  ;;  %1032 = vadd.xlane.f32.xlu1 %v1031_v59 }
 0x2a4   : > { %v3986_v60 = vpop.eup %3985 }
 0x2a5   : > { %3510 = vmatpush.xpose.msk.msra.mxu2 %vm253_vm0, %v3986_v60  ;;  %v1034_v61 = vsel %vm253_vm0, %v3986_v60, 0.0 }
 0x2a6   : > { %1035 = vadd.xlane.f32.xlu2 %v1034_v61 }
 0x2a7   : > { %v4396_v63 = vpop.xlane.xlu1 %958 }
 0x2a8   : > { %v1001_v2 = vsub.f32 %v823_v40, %v4396_v63  ;;  %v705_v40 = vld [vmem:[#allocation4 + $0x38] sm:$0xff] }
 0x2a9   : > { %3511 = vmatpush.xpose.msk.msra.mxu2 %vm253_vm0, %v3984_v58 }
 0x2aa   : > { %v1011_v3 = vmul.f32 1.442695, %v1001_v2 }
 0x2ac   : > { %v4400_v4 = vpop.xlane.xlu2 %964  ;;  %3987 = vpow2.f32 %v1011_v3  ;;  %3512 = vmatmul.msk.f32.vlgmr.msra.gmra.mxu2 %vm253_vm0, %v698_v5 }
 0x2ad   : > { %v1003_v6 = vsub.f32 %v884_v42, %v4400_v4  ;;  %v4437_v42 = vshrl.u32 %v5987_v41, 7 }
 0x2af   : > { %v1015_v8 = vmul.f32 1.442695, %v1003_v6  ;;  %v4404_v62 = vpop.xlane.xlu1 %961  ;;  %3578 = vset.pattern.permute.xlu2 %v4437_v42  ;;  %v4441_v43 = vadd.s32 8, %v4437_v42  ;;  %3576 = vset.pattern.permute.xlu0 %v4437_v42 }
 0x2b0   : > { %v1002_v9 = vsub.f32 %v826_v44, %v4404_v62 }
 0x2b1   : > { %3989 = vpow2.f32 %v1015_v8  ;;  %3577 = vset.pattern.permute.xlu1 %v4441_v43 }
 0x2b2   : > { %v1013_v10 = vmul.f32 1.442695, %v1002_v9  ;;  %v3988_v11 = vpop.eup %3987 }
 0x2b3   : > { %v1037_v13 = vsel %vm253_vm0, %v3988_v11, 0.0 }
 0x2b4   : > { %3991 = vpow2.f32 %v1013_v10  ;;  %1038 = vadd.xlane.f32.xlu0 %v1037_v13  ;;  %3513 = vmatmul.msk.f32.gmra.mxu2 %vm253_vm0, %v699_v14 }
 0x2b7   : > { %v4409_v15 = vpop.xlane.xlu1 %967  ;;  %v3990_v16 = vpop.eup %3989 }
 0x2b8   : > { %v1004_v17 = vsub.f32 %v887_v46, %v4409_v15  ;;  %v1043_v7 = vsel %vm253_vm0, %v3990_v16, 0.0 }
 0x2b9   : > { %1044 = vadd.xlane.f32.xlu2 %v1043_v7 }
 0x2ba   : > { %v1017_v18 = vmul.f32 1.442695, %v1004_v17  ;;  %v3992_v19 = vpop.eup %3991 }
 0x2bb   : > { %3514 = vmatpush.xpose.msk.msra.mxu3 %vm253_vm0, %v3992_v19  ;;  %v1040_v20 = vsel %vm253_vm0, %v3992_v19, 0.0 }
 0x2bc   : > { %3993 = vpow2.f32 %v1017_v18  ;;  %1041 = vadd.xlane.f32.xlu1 %v1040_v20 }
 0x2bf   : > { %3515 = vmatpush.xpose.msk.msra.mxu3 %vm253_vm0, %v3988_v11 }
 0x2c1   : > { %v4416_v21 = vpop.xlane.xlu2 %970 }
 0x2c2   : > { %v1005_v22 = vsub.f32 %v945_v48, %v4416_v21  ;;  %v3994_v24 = vpop.eup %3993  ;;  %3516 = vmatmul.msk.f32.vlgmr.msra.gmra.mxu3 %vm253_vm0, %v700_v23 }
 0x2c3   : > { %3518 = vmatpush.xpose.msk.msrb.mxu1 %vm253_vm0, %v3994_v24  ;;  %v1046_v0 = vsel %vm253_vm0, %v3994_v24, 0.0 }
 0x2c4   : > { %v1019_v25 = vmul.f32 1.442695, %v1005_v22  ;;  %1047 = vadd.xlane.f32.xlu0 %v1046_v0 }
 0x2c6   : > { %3995 = vpow2.f32 %v1019_v25 }
 0x2c7   : > { %3519 = vmatpush.xpose.msk.msrb.mxu1 %vm253_vm0, %v3990_v16 }
 0x2c9   : > { %v4423_v28 = vpop.xlane.xlu0 %973 }
 0x2ca   : > { %v1006_v30 = vsub.f32 %v4383_v50, %v4423_v28  ;;  %3517 = vmatmul.msk.f32.gmra.mxu3 %vm253_vm0, %v701_v31  ;;  %3520 = vmatmul.msk.f32.vlgmr.msrb.gmra.mxu1 %vm253_vm0, %v702_v32 }
 0x2cc   : > { %v1021_v33 = vmul.f32 1.442695, %v1006_v30  ;;  %v3996_v34 = vpop.eup %3995 }
 0x2cd   : > { %v1049_v35 = vsel %vm253_vm0, %v3996_v34, 0.0 }
 0x2ce   : > { %3997 = vpow2.f32 %v1021_v33  ;;  %1050 = vadd.xlane.f32.xlu1 %v1049_v35 }
 0x2d2   : > { %3521 = vmatmul.msk.f32.gmra.mxu1 %vm253_vm0, %v703_v36 }
 0x2d4   : > { %v3998_v37 = vpop.eup %3997 }
 0x2d5   : > { %3522 = vmatpush.xpose.msk.msrb.mxu2 %vm253_vm0, %v3998_v37  ;;  %v1052_v38 = vsel %vm253_vm0, %v3998_v37, 0.0 }
 0x2d6   : > { %1053 = vadd.xlane.f32.xlu2 %v1052_v38 }
 0x2d9   : > { %3523 = vmatpush.xpose.msk.msrb.mxu2 %vm253_vm0, %v3996_v34 }
 0x2dc   : > { %3524 = vmatmul.msk.f32.vlgmr.msrb.gmra.mxu2 %vm253_vm0, %v704_v39 }
 0x2e4   : > { %3525 = vmatmul.msk.f32.gmra.mxu2 %vm253_vm0, %v705_v40 }
 0x311   : > { %v4486_v7 = vpop.xlane.xlu1 %1032 }
 0x319   : > { %v4480_v16 = vpop.xlane.xlu2 %1035 }
 0x32c   : > { %v4484_v17 = vpop.xlane.xlu2 %1044 }
 0x32f   : > { %v1092_v44 = vpop.f32.mrf.mxu2  ;;  %v4495_v22 = vpop.xlane.xlu1 %1041 }
 0x330   : > { %v1211_v45 = vperm.slane %v1092_v44, 0  ;;  %v1224_v46 = vperm.slane %v1092_v44, 1  ;;  %v1237_v47 = vperm.slane %v1092_v44, 2  ;;  %v1250_v48 = vperm.slane %v1092_v44, 3 }
 0x331   : > { %v1263_v49 = vperm.slane %v1092_v44, 4  ;;  %v1289_v50 = vperm.slane %v1092_v44, 6  ;;  %v1276_v51 = vperm.slane %v1092_v44, 5  ;;  %v1302_v56 = vperm.slane %v1092_v44, 7 }
 0x332   : > { %1222 = vperm.xlu1 %3577, %v1211_v45   ;;  %1216 = vperm.xlu0 %3576, %v1211_v45  }
 0x333   : > { %1229 = vperm.xlu2 %3578, %v1224_v46  }
 0x337   : > { %v1095_v53 = vpop.f32.mrf.mxu2 }
 0x338   : > { %v1315_v54 = vperm.slane %v1095_v53, 0  ;;  %v1354_v57 = vperm.slane %v1095_v53, 3  ;;  %v1328_v58 = vperm.slane %v1095_v53, 1  ;;  %v1380_v59 = vperm.slane %v1095_v53, 5 }
 0x339   : > { %v1341_v61 = vperm.slane %v1095_v53, 2  ;;  %v1367_v5 = vperm.slane %v1095_v53, 4  ;;  %v1393_v8 = vperm.slane %v1095_v53, 6  ;;  %v1406_v10 = vperm.slane %v1095_v53, 7 }
 0x33a   : > { %1235 = vperm.xlu1 %3577, %v1224_v46   ;;  %3579 = vset.pattern.permute.xlu0 %v4441_v43 }
 0x33b   : > { %1242 = vperm.xlu2 %3578, %v1237_v47  }
 0x341   : > { %v4501_v25 = vpop.xlane.xlu1 %1050 }
 0x342   : > { %1248 = vperm.xlu1 %3577, %v1237_v47   ;;  %1261 = vperm.xlu0 %3579, %v1250_v48  }
 0x343   : > { %1255 = vperm.xlu2 %3578, %v1250_v48  }
 0x345   : > { %v4468_v9 = vpop.f32.mrf.mxu3 }
 0x346   : > { %v1419_v11 = vperm.slane %v4468_v9, 0  ;;  %v1445_v14 = vperm.slane %v4468_v9, 2  ;;  %v1484_v19 = vperm.slane %v4468_v9, 5  ;;  %v1510_v0 = vperm.slane %v4468_v9, 7 }
 0x347   : > { %v4456_v60 = vpop.f32.mrf.mxu1  ;;  %v1432_v53 = vperm.slane %v4468_v9, 1 }
 0x348   : > { %v1640_v2 = vperm.slane %v4456_v60, 1  ;;  %v1679_v3 = vperm.slane %v4456_v60, 4  ;;  %v1705_v6 = vperm.slane %v4456_v60, 6  ;;  %v1627_v13 = vperm.slane %v4456_v60, 0 }
 0x349   : > { %v1653_v18 = vperm.slane %v4456_v60, 2  ;;  %v4492_v20 = vpop.xlane.xlu2 %1053  ;;  %v1666_v23 = vperm.slane %v4456_v60, 3  ;;  %v1692_v35 = vperm.slane %v4456_v60, 5  ;;  %v1718_v39 = vperm.slane %v4456_v60, 7 }
 0x34a   : > { %3580 = vset.pattern.permute.xlu1 %v4437_v42  ;;  %3582 = vset.pattern.permute.xlu0 %v4437_v42  ;;  %v1458_v60 = vperm.slane %v4468_v9, 3 }
 0x34b   : > { %3581 = vset.pattern.permute.xlu2 %v4441_v43 }
 0x34f   : > { %v4513_v32 = vpop.f32.mrf.mxu1 }
 0x350   : > { %v1744_v36 = vperm.slane %v4513_v32, 1  ;;  %v5996_v40 = vperm.slane %v4513_v32, 3  ;;  %v5994_v48 = vperm.slane %v4513_v32, 6 }
 0x352   : > { %1268 = vperm.xlu1 %3580, %v1263_v49   ;;  %1294 = vperm.xlu0 %3582, %v1289_v50  }
 0x353   : > { %1274 = vperm.xlu2 %3581, %v1263_v49  }
 0x35a   : > { %1281 = vperm.xlu1 %3580, %v1276_v51   ;;  %3585 = vset.pattern.permute.xlu0 %v4441_v43 }
 0x35b   : > { %1287 = vperm.xlu2 %3581, %v1276_v51   ;;  %v4554_v51 = vpop.f32.mrf.mxu3 }
 0x362   : > { %3583 = vset.pattern.permute.xlu1 %v4441_v43  ;;  %1326 = vperm.xlu0 %3585, %v1315_v54  }
 0x363   : > { %3584 = vset.pattern.permute.xlu2 %v4437_v42 }
 0x36a   : > { %1300 = vperm.xlu1 %3583, %v1289_v50   ;;  %3588 = vset.pattern.permute.xlu0 %v4437_v42 }
 0x36b   : > { %1307 = vperm.xlu2 %3584, %v1302_v56  }
 0x372   : > { %1313 = vperm.xlu1 %3583, %v1302_v56   ;;  %1359 = vperm.xlu0 %3588, %v1354_v57  }
 0x373   : > { %1320 = vperm.xlu2 %3584, %v1315_v54   ;;  %v5991_v54 = vperm.slane %v4554_v51, 2 }
 0x37a   : > { %3586 = vset.pattern.permute.xlu1 %v4437_v42  ;;  %3591 = vset.pattern.permute.xlu0 %v4441_v43 }
 0x37b   : > { %3587 = vset.pattern.permute.xlu2 %v4441_v43 }
 0x382   : > { %1333 = vperm.xlu1 %3586, %v1328_v58   ;;  %1391 = vperm.xlu0 %3591, %v1380_v59  }
 0x383   : > { %1339 = vperm.xlu2 %3587, %v1328_v58  }
 0x38a   : > { %1346 = vperm.xlu1 %3586, %v1341_v61   ;;  %1651 = vperm.xlu0 %3591, %v1640_v2  }
 0x38b   : > { %1352 = vperm.xlu2 %3587, %v1341_v61   ;;  %v5989_v61 = vperm.slane %v4554_v51, 4 }
 0x38d   : > { %v4499_v24 = vpop.permute.xlu2 %1229 }
 0x392   : > { %3589 = vset.pattern.permute.xlu1 %v4441_v43  ;;  %3598 = vset.pattern.permute.xlu0 %v4437_v42 }
 0x393   : > { %3590 = vset.pattern.permute.xlu2 %v4437_v42 }
 0x395   : > { %v4507_v30 = vpop.permute.xlu2 %1242 }
 0x396   : > { %6012 = vst [vmem:[#allocation9_spill] sm:$0xff] %v4507_v30 }
 0x39a   : > { %1365 = vperm.xlu1 %3589, %v1354_v57   ;;  %1684 = vperm.xlu0 %3598, %v1679_v3  }
 0x39b   : > { %1372 = vperm.xlu2 %3590, %v1367_v5  }
 0x39d   : > { %v4515_v33 = vpop.permute.xlu2 %1255 }
 0x39e   : > { %6013 = vst [vmem:[#allocation10_spill] sm:$0xff] %v4515_v33 }
 0x3a2   : > { %1378 = vperm.xlu1 %3589, %v1367_v5   ;;  %3601 = vset.pattern.permute.xlu0 %v4441_v43  ;;  %v1471_v5 = vperm.slane %v4468_v9, 4 }
 0x3a3   : > { %1385 = vperm.xlu2 %3590, %v1380_v59  }
 0x3a4   : > { %v4509_v31 = vpop.permute.xlu1 %1222 }
 0x3aa   : > { %3592 = vset.pattern.permute.xlu1 %v4437_v42  ;;  %1716 = vperm.xlu0 %3601, %v1705_v6  }
 0x3ab   : > { %3593 = vset.pattern.permute.xlu2 %v4441_v43 }
 0x3ac   : > { %v4517_v34 = vpop.permute.xlu1 %1235 }
 0x3ad   : > { %v4523_v37 = vpop.permute.xlu2 %1274 }
 0x3ae   : > { %6014 = vst [vmem:[#allocation11_spill] sm:$0xff] %v4523_v37 }
 0x3b2   : > { %1398 = vperm.xlu1 %3592, %v1393_v8   ;;  %3604 = vset.pattern.permute.xlu0 %v4437_v42 }
 0x3b3   : > { %1404 = vperm.xlu2 %3593, %v1393_v8  }
 0x3b4   : > { %v4525_v38 = vpop.permute.xlu1 %1248 }
 0x3b5   : > { %v4531_v44 = vpop.permute.xlu2 %1287 }
 0x3ba   : > { %1411 = vperm.xlu1 %3592, %v1406_v10   ;;  %1424 = vperm.xlu0 %3604, %v1419_v11  }
 0x3bb   : > { %1417 = vperm.xlu2 %3593, %v1406_v10   ;;  %v5988_v10 = vperm.slane %v4554_v51, 7 }
 0x3c2   : > { %3595 = vset.pattern.permute.xlu1 %v4441_v43  ;;  %3607 = vset.pattern.permute.xlu0 %v4441_v43 }
 0x3c3   : > { %3594 = vset.pattern.permute.xlu2 %v4437_v42 }
 0x3c4   : > { %v4533_v45 = vpop.permute.xlu1 %1268 }
 0x3c5   : > { %6015 = vst [vmem:[#allocation12_spill] sm:$0xff] %v4533_v45  ;;  %v4538_v46 = vpop.permute.xlu2 %1307 }
 0x3c6   : > { %6016 = vst [vmem:[#allocation13_spill] sm:$0xff] %v4538_v46 }
 0x3ca   : > { %1638 = vperm.xlu1 %3595, %v1627_v13   ;;  %1456 = vperm.xlu0 %3607, %v1445_v14  }
 0x3cb   : > { %1632 = vperm.xlu2 %3594, %v1627_v13   ;;  %v4593_v13 = vpop.xlane.xlu0 %1038 }
 0x3cc   : > { %v4542_v47 = vpop.permute.xlu1 %1281 }
 0x3cd   : > { %v4549_v49 = vpop.permute.xlu2 %1320 }
 0x3d2   : > { %3596 = vset.pattern.permute.xlu1 %v4437_v42  ;;  %3610 = vset.pattern.permute.xlu0 %v4437_v42 }
 0x3d3   : > { %1645 = vperm.xlu2 %3594, %v1640_v2  }
 0x3da   : > { %1658 = vperm.xlu1 %3596, %v1653_v18   ;;  %1489 = vperm.xlu0 %3610, %v1484_v19  }
 0x3db   : > { %3597 = vset.pattern.permute.xlu2 %v4441_v43 }
 0x3dc   : > { %v4552_v50 = vpop.permute.xlu1 %1300 }
 0x3dd   : > { %6017 = vst [vmem:[#allocation14_spill] sm:$0xff] %v4552_v50  ;;  %v4560_v56 = vpop.permute.xlu2 %1339 }
 0x3de   : > { %6018 = vst [vmem:[#allocation15_spill] sm:$0xff] %v4560_v56 }
 0x3e2   : > { %1671 = vperm.xlu1 %3596, %v1666_v23   ;;  %3613 = vset.pattern.permute.xlu0 %v4441_v43 }
 0x3e3   : > { %1664 = vperm.xlu2 %3597, %v1653_v18   ;;  %v4601_v18 = vpop.f32.mrf.mxu2 }
 0x3e4   : > { %v4562_v57 = vpop.permute.xlu1 %1313 }
 0x3e5   : > { %6019 = vst [vmem:[#allocation16_spill] sm:$0xff] %v4562_v57  ;;  %v4568_v58 = vpop.permute.xlu2 %1352 }
 0x3e6   : > { %6020 = vst [vmem:[#allocation17_spill] sm:$0xff] %v4568_v58 }
 0x3ea   : > { %3599 = vset.pattern.permute.xlu1 %v4441_v43  ;;  %1521 = vperm.xlu0 %3613, %v1510_v0  }
 0x3eb   : > { %1677 = vperm.xlu2 %3597, %v1666_v23   ;;  %v4603_v23 = vpop.xlane.xlu0 %1047  ;;  %v4658_v27 = vpop.f32.mrf.mxu2 }
 0x3f2   : > { %1690 = vperm.xlu1 %3599, %v1679_v3   ;;  %3616 = vset.pattern.permute.xlu0 %v4437_v42 }
 0x3f3   : > { %3600 = vset.pattern.permute.xlu2 %v4437_v42 }
 0x3f4   : > { %v4570_v59 = vpop.permute.xlu1 %1333 }
 0x3f5   : > { %6021 = vst [vmem:[#allocation18_spill] sm:$0xff] %v4570_v59  ;;  %v4577_v2 = vpop.permute.xlu2 %1372 }
 0x3f6   : > { %6022 = vst [vmem:[#allocation19_spill] sm:$0xff] %v4577_v2  ;;  %v978_v2 = vsub.f32 -inf, %v4404_v62 }
 0x3fa   : > { %1703 = vperm.xlu1 %3599, %v1692_v35   ;;  %1749 = vperm.xlu0 %3616, %v1744_v36  }
 0x3fb   : > { %1697 = vperm.xlu2 %3600, %v1692_v35   ;;  %v1497_v35 = vperm.slane %v4468_v9, 6 }
 0x3fc   : > { %v4579_v3 = vpop.permute.xlu1 %1346 }
 0x3fd   : > { %6023 = vst [vmem:[#allocation20_spill] sm:$0xff] %v4579_v3 }
 0x402   : > { %3602 = vset.pattern.permute.xlu1 %v4437_v42  ;;  %3619 = vset.pattern.permute.xlu0 %v4441_v43 }
 0x403   : > { %1710 = vperm.xlu2 %3600, %v1705_v6   ;;  %v4583_v6 = vpop.permute.xlu2 %1385 }
 0x404   : > { %6024 = vst [vmem:[#allocation21_spill] sm:$0xff] %v4583_v6 }
 0x40a   : > { %1723 = vperm.xlu1 %3602, %v1718_v39   ;;  %1781 = vperm.xlu0 %3619, %v5996_v40  }
 0x40b   : > { %3603 = vset.pattern.permute.xlu2 %v4441_v43 }
 0x40c   : > { %v4585_v8 = vpop.permute.xlu1 %1365 }
 0x412   : > { %3605 = vset.pattern.permute.xlu1 %v4441_v43  ;;  %3622 = vset.pattern.permute.xlu0 %v4437_v42 }
 0x413   : > { %1729 = vperm.xlu2 %3603, %v1718_v39   ;;  %v5990_v39 = vperm.slane %v4601_v18, 0 }
 0x41a   : > { %1430 = vperm.xlu1 %3605, %v1419_v11   ;;  %1814 = vperm.xlu0 %3622, %v5994_v48   ;;  %v4591_v11 = vpop.permute.xlu2 %1404 }
 0x41b   : > { %3606 = vset.pattern.permute.xlu2 %v4437_v42 }
 0x422   : > { %1443 = vperm.xlu1 %3605, %v1432_v53   ;;  %1554 = vperm.xlu0 %3622, %v5991_v54  }
 0x423   : > { %1437 = vperm.xlu2 %3606, %v1432_v53   ;;  %v4607_v53 = vpop.permute.xlu2 %1417 }
 0x424   : > { %6026 = vst [vmem:[#allocation23_spill] sm:$0xff] %v4607_v53  ;;  %v976_v53 = vsub.f32 -inf, %v4390_v55 }
 0x42a   : > { %3608 = vset.pattern.permute.xlu1 %v4437_v42  ;;  %3629 = vset.pattern.permute.xlu0 %v4441_v43 }
 0x42b   : > { %1450 = vperm.xlu2 %3606, %v1445_v14   ;;  %v4595_v14 = vpop.permute.xlu1 %1378 }
 0x42c   : > { %6025 = vst [vmem:[#allocation22_spill] sm:$0xff] %v4595_v14 }
 0x432   : > { %1463 = vperm.xlu1 %3608, %v1458_v60   ;;  %1586 = vperm.xlu0 %3629, %v5989_v61   ;;  %v1731_v61 = vperm.slane %v4513_v32, 0 }
 0x433   : > { %3609 = vset.pattern.permute.xlu2 %v4441_v43 }
 0x43a   : > { %1476 = vperm.xlu1 %3608, %v1471_v5   ;;  %3632 = vset.pattern.permute.xlu0 %v4437_v42 }
 0x43b   : > { %1469 = vperm.xlu2 %3609, %v1458_v60   ;;  %v4609_v60 = vpop.permute.xlu1 %1398 }
 0x442   : > { %3611 = vset.pattern.permute.xlu1 %v4441_v43  ;;  %1619 = vperm.xlu0 %3632, %v5988_v10  }
 0x443   : > { %1482 = vperm.xlu2 %3609, %v1471_v5   ;;  %v4615_v5 = vpop.permute.xlu2 %1632  ;;  %v4621_v41 = vpop.permute.xlu1 %1411 }
 0x444   : > { %6027 = vst [vmem:[#allocation24_spill] sm:$0xff] %v4621_v41 }
 0x44a   : > { %1495 = vperm.xlu1 %3611, %v1484_v19   ;;  %3635 = vset.pattern.permute.xlu0 %v4441_v43  ;;  %v4613_v19 = vpop.permute.xlu0 %1216 }
 0x44b   : > { %3612 = vset.pattern.permute.xlu2 %v4437_v42  ;;  %v4632_v54 = vpop.permute.xlu1 %1638 }
 0x452   : > { %1508 = vperm.xlu1 %3611, %v1497_v35   ;;  %1846 = vperm.xlu0 %3635, %v5990_v39   ;;  %v4623_v10 = vpop.permute.xlu0 %1261  ;;  %v5995_v39 = vperm.slane %v4601_v18, 3 }
 0x453   : > { %1502 = vperm.xlu2 %3612, %v1497_v35   ;;  %6028 = vst [vmem:[#allocation25_spill] sm:$0xff] %v4623_v10  ;;  %v4629_v35 = vpop.permute.xlu2 %1645  ;;  %v4640_v1 = vpop.permute.xlu1 %1658 }
 0x454   : > { %6029 = vst [vmem:[#allocation26_spill] sm:$0xff] %v4629_v35 }
 0x455   : > { %6032 = vst [vmem:[#allocation29_spill] sm:$0xff] %v4640_v1 }
 0x45a   : > { %3614 = vset.pattern.permute.xlu1 %v4437_v42  ;;  %3638 = vset.pattern.permute.xlu0 %v4437_v42  ;;  %v4634_v9 = vpop.permute.xlu0 %1294 }
 0x45b   : > { %1515 = vperm.xlu2 %3612, %v1510_v0   ;;  %6030 = vst [vmem:[#allocation27_spill] sm:$0xff] %v4634_v9  ;;  %v4638_v0 = vpop.permute.xlu2 %1664  ;;  %v4652_v29 = vpop.permute.xlu1 %1671 }
 0x45c   : > { %6031 = vst [vmem:[#allocation28_spill] sm:$0xff] %v4638_v0  ;;  %v5998_v0 = vperm.slane %v4658_v27, 0 }
 0x462   : > { %1736 = vperm.xlu1 %3614, %v1731_v61   ;;  %1879 = vperm.xlu0 %3638, %v5995_v39   ;;  %v4642_v48 = vpop.permute.xlu0 %1326  ;;  %v5997_v39 = vperm.slane %v4601_v18, 5 }
 0x463   : > { %3615 = vset.pattern.permute.xlu2 %v4441_v43  ;;  %v4650_v40 = vpop.permute.xlu2 %1677 }
 0x464   : > { %v4662_v26 = vpop.permute.xlu1 %1690 }
 0x465   : > { %6034 = vst [vmem:[#allocation31_spill] sm:$0xff] %v4662_v26  ;;  %v1783_v26 = vperm.slane %v4513_v32, 4 }
 0x46a   : > { %3617 = vset.pattern.permute.xlu1 %v4441_v43  ;;  %3641 = vset.pattern.permute.xlu0 %v4441_v43  ;;  %v4654_v12 = vpop.permute.xlu0 %1359 }
 0x46b   : > { %1742 = vperm.xlu2 %3615, %v1731_v61   ;;  %v1757_v61 = vperm.slane %v4513_v32, 2 }
 0x472   : > { %1755 = vperm.xlu1 %3617, %v1744_v36   ;;  %1911 = vperm.xlu0 %3641, %v5997_v39   ;;  %v4660_v36 = vpop.permute.xlu2 %1697  ;;  %v975_v39 = vsub.f32 -inf, %v4387_v52  ;;  %v4665_v35 = vpop.permute.xlu0 %1391 }
 0x473   : > { %3618 = vset.pattern.permute.xlu2 %v4437_v42  ;;  %6033 = vst [vmem:[#allocation30_spill] sm:$0xff] %v4660_v36  ;;  %v985_v36 = vmul.f32 1.442695, %v976_v53  ;;  %v4676_v52 = vpop.permute.xlu1 %1703  ;;  %v5999_v53 = vperm.slane %v4658_v27, 2 }
 0x474   : > { %6035 = vst [vmem:[#allocation32_spill] sm:$0xff] %v4665_v35  ;;  %v983_v1 = vmul.f32 1.442695, %v975_v39 }
 0x475   : > { %6037 = vst [vmem:[#allocation33_spill] sm:$0xff] %v4676_v52 }
 0x476   : > { %3999 = vpow2.f32 %v983_v1  ;;  %v1796_v1 = vperm.slane %v4513_v32, 5 }
 0x477   : > { %4001 = vpow2.f32 %v985_v36  ;;  %v977_v36 = vsub.f32 -inf, %v4396_v63 }
 0x479   : > { %v987_v63 = vmul.f32 1.442695, %v977_v36 }
 0x47a   : > { %1768 = vperm.xlu1 %3617, %v1757_v61   ;;  %3644 = vset.pattern.permute.xlu0 %v4437_v42  ;;  %v4674_v41 = vpop.permute.xlu2 %1710  ;;  %v4679_v35 = vpop.permute.xlu0 %1651 }
 0x47b   : > { %1762 = vperm.xlu2 %3618, %v1757_v61   ;;  %v6036_v61 = vperm.slane %v4513_v32, 3  ;;  %6038 = vst [vmem:[#allocation34_spill] sm:$0xff] %v4679_v35 }
 0x47c   : > { %v4000_v55 = vpop.eup %3999  ;;  %v4685_v39 = vpop.permute.xlu1 %1723 }
 0x47d   : > { %6040 = vst [vmem:[#allocation36_spill] sm:$0xff] %v4685_v39  ;;  %v4689_v52 = vmul.f32 0.0, %v4000_v55 }
 0x482   : > { %3620 = vset.pattern.permute.xlu1 %v4437_v42  ;;  %1944 = vperm.xlu0 %3644, %v5998_v0   ;;  %v4002_v0 = vpop.eup %4001  ;;  %v4695_v6 = vpop.permute.xlu0 %1684 }
 0x483   : > { %1775 = vperm.xlu2 %3618, %v6036_v61   ;;  %v4683_v61 = vpop.permute.xlu2 %1729  ;;  %v4692_v35 = vmul.f32 0.0, %v4002_v0  ;;  %6041 = vst [vmem:[#allocation37_spill] sm:$0xff] %v4695_v6  ;;  %v989_v0 = vmul.f32 1.442695, %v978_v2  ;;  %v980_v2 = vsub.f32 -inf, %v4409_v15  ;;  %v6000_v6 = vperm.slane %v4658_v27, 5 }
 0x484   : > { %6039 = vst [vmem:[#allocation35_spill] sm:$0xff] %v4683_v61  ;;  %v4701_v61 = vadd.f32 %v4486_v7, %v4689_v52  ;;  %v6045_v15 = vperm.slane %v4513_v32, 6 }
 0x485   : > { %v4705_v55 = vadd.f32 %v4480_v16, %v4692_v35  ;;  %v993_v59 = vmul.f32 1.442695, %v980_v2 }
 0x486   : > { %4003 = vrcp.f32 %v4701_v61  ;;  %vm2304_vm11 = vweird.f32 %v4701_v61 }
 0x487   : > { %4005 = vrcp.f32 %v4705_v55  ;;  %vm2318_vm13 = vweird.f32 %v4705_v55 }
 0x488   : > { %4007 = vpow2.f32 %v987_v63 }
 0x489   : > { %4009 = vpow2.f32 %v989_v0 }
 0x48a   : > { %1788 = vperm.xlu1 %3620, %v1783_v26   ;;  %3647 = vset.pattern.permute.xlu0 %v4441_v43  ;;  %4011 = vpow2.f32 %v993_v59 }
 0x48b   : > { %3621 = vset.pattern.permute.xlu2 %v4441_v43  ;;  %v4708_v62 = vpop.permute.xlu2 %1437 }
 0x48c   : > { %v4711_v39 = vpop.permute.xlu1 %1430 }
 0x48d   : > { %6042 = vst [vmem:[#allocation38_spill] sm:$0xff] %v4711_v39 }
 0x492   : > { %1801 = vperm.xlu1 %3620, %v1796_v1   ;;  %1976 = vperm.xlu0 %3647, %v5999_v53   ;;  %v4713_v53 = vpop.permute.xlu0 %1716 }
 0x493   : > { %1794 = vperm.xlu2 %3621, %v1783_v26   ;;  %v4717_v26 = vpop.eup %4003  ;;  %v4727_v39 = vpop.permute.xlu2 %1450 }
 0x494   : > { %v4719_v16 = vpop.eup %4005  ;;  %v2300_v63 = vmul.f32 %v4717_v26, %v4701_v61  ;;  %6043 = vst [vmem:[#allocation39_spill] sm:$0xff] %v4727_v39  ;;  %v4734_v56 = vpop.permute.xlu1 %1443  ;;  %vm2305_vm9 = vweird.f32 %v4717_v26 }
 0x495   : > { %v4008_v7 = vpop.eup %4007  ;;  %v2314_v0 = vmul.f32 %v4719_v16, %v4705_v55  ;;  %vm2319_vm10 = vweird.f32 %v4719_v16  ;;  %vm4774_vm12 = vmor %vm2304_vm11, %vm2305_vm9 }
 0x496   : > { %v4010_v36 = vpop.eup %4009  ;;  %v4729_v14 = vmul.f32 0.0, %v4008_v7  ;;  %vm4783_vm14 = vmor %vm2318_vm13, %vm2319_vm10 }
 0x497   : > { %v4740_v3 = vmul.f32 0.0, %v4010_v36  ;;  %v2315_v39 = vsub.f32 1.0, %v2314_v0  ;;  %v1822_v36 = vperm.slane %v4513_v32, 7 }
 0x498   : > { %v4745_v7 = vadd.f32 %v4593_v13, %v4729_v14 }
 0x49a   : > { %3623 = vset.pattern.permute.xlu1 %v4441_v43  ;;  %3650 = vset.pattern.permute.xlu0 %v4437_v42  ;;  %v4732_v58 = vpop.permute.xlu0 %1424  ;;  %4013 = vrcp.f32 %v4745_v7  ;;  %vm2332_vm4 = vweird.f32 %v4745_v7 }
 0x49b   : > { %1807 = vperm.xlu2 %3621, %v1796_v1   ;;  %v979_v1 = vsub.f32 -inf, %v4400_v4  ;;  %6044 = vst [vmem:[#allocation40_spill] sm:$0xff] %v4732_v58  ;;  %v2301_v4 = vsub.f32 1.0, %v2300_v63  ;;  %v4749_v58 = vadd.f32 %v4495_v22, %v4740_v3  ;;  %v4756_v13 = vpop.permute.xlu2 %1469  ;;  %v4012_v22 = vpop.eup %4011 }
 0x49c   : > { %6046 = vst [vmem:[#allocation41_spill] sm:$0xff] %v4756_v13 }
 0x49d   : > { %v991_v46 = vmul.f32 1.442695, %v979_v1  ;;  %v2302_v2 = vmul.f32 %v4717_v26, %v2301_v4  ;;  %4015 = vrcp.f32 %v4749_v58  ;;  %v2324_v1 = vand.u32 2147483648, %v4705_v55 }
 0x49e   : > { %vm2346_vm6 = vweird.f32 %v4749_v58 }
 0x49f   : > { %4017 = vpow2.f32 %v991_v46  ;;  %v2303_v32 = vadd.f32 %v4717_v26, %v2302_v2  ;;  %v2310_v46 = vand.u32 2147483648, %v4701_v61  ;;  %v2308_v2 = vand.u32 2147483647, %v4701_v61 }
 0x4a0   : > { %v2325_v50 = vor.u32 1.1754944e-38, %v2324_v1 }
 0x4a1   : > { %v2307_v9 = vsel %vm4774_vm12, %v4717_v26, %v2303_v32  ;;  %v2311_v57 = vor.u32 1.1754944e-38, %v2310_v46  ;;  %v6054_v26 = vperm.slane %v4658_v27, 7  ;;  %vm2309_vm15 = vcmp.eq.f32.partialorder %v2308_v2, 8.507059e+37 }
 0x4a2   : > { %1820 = vperm.xlu1 %3623, %v6045_v15   ;;  %2009 = vperm.xlu0 %3650, %v6000_v6   ;;  %v2316_v15 = vmul.f32 %v4719_v16, %v2315_v39  ;;  %v4758_v63 = vpop.permute.xlu0 %1456  ;;  %v4767_v39 = vpop.eup %4013 }
 0x4a3   : > { %3624 = vset.pattern.permute.xlu2 %v4437_v42  ;;  %6047 = vst [vmem:[#allocation42_spill] sm:$0xff] %v4758_v63  ;;  %v4772_v4 = vpop.eup %4015  ;;  %v4781_v63 = vmul.f32 0.0, %v4012_v22  ;;  %v2171_v22 = vadd.f32 %v4613_v19, %v4689_v52  ;;  %v2328_v37 = vmul.f32 %v4767_v39, %v4745_v7  ;;  %v4812_v19 = vsel %vm2309_vm15, %v2311_v57, %v2307_v9 }
 0x4a4   : > { %v4760_v0 = vpop.permute.xlu1 %1463  ;;  %v2317_v59 = vadd.f32 %v4719_v16, %v2316_v15  ;;  %v2322_v15 = vand.u32 2147483647, %v4705_v55  ;;  %v2172_v55 = vadd.f32 %v4509_v31, %v4692_v35  ;;  %v4809_v31 = vpop.permute.xlu2 %1482  ;;  %v1523_v57 = vperm.slane %v4554_v51, 0 }
 0x4a5   : > { %6048 = vst [vmem:[#allocation43_spill] sm:$0xff] %v4760_v0  ;;  %v4018_v6 = vpop.eup %4017  ;;  %v2342_v0 = vmul.f32 %v4772_v4, %v4749_v58  ;;  %v2329_v1 = vsub.f32 1.0, %v2328_v37  ;;  %vm2333_vm2 = vweird.f32 %v4767_v39  ;;  %vm2347_vm3 = vweird.f32 %v4772_v4 }
 0x4a6   : > { %v2321_v61 = vsel %vm4783_vm14, %v4719_v16, %v2317_v59  ;;  %v4807_v16 = vmul.f32 0.0, %v4018_v6  ;;  %vm2323_vm1 = vcmp.eq.f32.partialorder %v2322_v15, 8.507059e+37  ;;  %v2411_v6 = vmul.f32 %v4812_v19, %v2171_v22  ;;  %vm4853_vm5 = vmor %vm2332_vm4, %vm2333_vm2 }
 0x4a7   : > { %v4814_v13 = vsel %vm2323_vm1, %v2325_v50, %v2321_v61  ;;  %v2343_v2 = vsub.f32 1.0, %v2342_v0  ;;  %v4826_v15 = vadd.f32 %v4603_v23, %v4781_v63  ;;  %v2181_v50 = vadd.f32 %v4542_v47, %v4689_v52  ;;  %vm4862_vm7 = vmor %vm2346_vm6, %vm2347_vm3 }
 0x4a8   : > { %v4820_v59 = vadd.f32 %v4484_v17, %v4807_v16  ;;  %v2412_v46 = vmul.f32 %v4814_v13, %v2172_v55  ;;  %v2330_v17 = vmul.f32 %v4767_v39, %v2329_v1  ;;  %v6055_v0 = vmov 0  }
 0x4a9   : > { %v2344_v61 = vmul.f32 %v4772_v4, %v2343_v2  ;;  %v2182_v23 = vadd.f32 %v4531_v44, %v4692_v35  ;;  %v2421_v47 = vmul.f32 %v4812_v19, %v2181_v50  ;;  %v2352_v50 = vand.u32 2147483648, %v4749_v58 }
 0x4aa   : > { %1833 = vperm.xlu1 %3623, %v1822_v36   ;;  %3653 = vset.pattern.permute.xlu0 %v4441_v43  ;;  %4019 = vrcp.f32 %v4820_v59  ;;  %v3655_v9 = vpack.i.bf16 %v2412_v46, %v2411_v6  ;;  %vm2374_vm11 = vweird.f32 %v4826_v15  ;;  %vm2360_vm13 = vweird.f32 %v4820_v59 }
 0x4ab   : > { %1827 = vperm.xlu2 %3624, %v1822_v36   ;;  %v4802_v36 = vpop.permute.xlu0 %1489  ;;  %4021 = vrcp.f32 %v4826_v15  ;;  %v2345_v46 = vadd.f32 %v4772_v4, %v2344_v61  ;;  %v2422_v44 = vmul.f32 %v4814_v13, %v2182_v23  ;;  %v2350_v23 = vand.u32 2147483647, %v4749_v58 }
 0x4ac   : > { %6053 = vst [vmem:[#allocation44_spill] sm:$0xff] %v4802_v36  ;;  %v4816_v32 = vpop.permute.xlu1 %1476  ;;  %v2188_v36 = vadd.f32 %v4642_v48, %v4692_v35  ;;  %v2187_v48 = vadd.f32 %v4549_v49, %v4689_v52  ;;  %vm3084_vm3 = vcmask 130112  }
 0x4ad   : > { %v1503_v55 = vpop.permute.xlu2 %1502  ;;  %vm2351_vm9 = vcmp.eq.f32.partialorder %v2350_v23, 8.507059e+37  ;;  %v2193_v23 = vadd.f32 %v4654_v12, %v4689_v52 }
 0x4af   : > { %v2433_v12 = vmul.f32 %v4812_v19, %v2193_v23 }
 0x4b0   : > { %v4847_v6 = vpop.eup %4019 }
 0x4b1   : > { %v4851_v1 = vpop.eup %4021  ;;  %vm2361_vm10 = vweird.f32 %v4847_v6 }
 0x4b2   : > { %3625 = vset.pattern.permute.xlu1 %v4437_v42  ;;  %2041 = vperm.xlu0 %3653, %v6054_v26   ;;  %v2331_v26 = vadd.f32 %v4767_v39, %v2330_v17  ;;  %v2336_v17 = vand.u32 2147483647, %v4745_v7  ;;  %v2370_v58 = vmul.f32 %v4851_v1, %v4826_v15  ;;  %vm2375_vm12 = vweird.f32 %v4851_v1  ;;  %vm4920_vm14 = vmor %vm2360_vm13, %vm2361_vm10 }
 0x4b3   : > { %3626 = vset.pattern.permute.xlu2 %v4441_v43  ;;  %v4835_v37 = vpop.permute.xlu0 %1521  ;;  %vm4931_vm15 = vmor %vm2374_vm11, %vm2375_vm12  ;;  %vm3275_vm12 = vcmask 1041409   ;;  %vm3277_vm13 = vcmask 1042434  }
 0x4b4   : > { %v2335_v33 = vsel %vm4853_vm5, %v4767_v39, %v2331_v26  ;;  %v2353_v26 = vor.u32 1.1754944e-38, %v2352_v50  ;;  %vm2337_vm8 = vcmp.eq.f32.partialorder %v2336_v17, 8.507059e+37  ;;  %v2371_v49 = vsub.f32 1.0, %v2370_v58 }
 0x4b6   : > { %v2372_v17 = vmul.f32 %v4851_v1, %v2371_v49 }
 0x4ba   : > { %1528 = vperm.xlu1 %3625, %v1523_v57   ;;  %3654 = vset.pattern.permute.xlu0 %v6055_v0  ;;  %v2356_v0 = vmul.f32 %v4847_v6, %v4820_v59 }
 0x4bb   : > { %1534 = vperm.xlu2 %3626, %v1523_v57   ;;  %3656 = vperm.xlu0 %3654, %v3655_v9   ;;  %v2338_v57 = vand.u32 2147483648, %v4745_v7  ;;  %v1536_v9 = vperm.slane %v4554_v51, 1  ;;  %v2349_v7 = vsel %vm4862_vm7, %v4772_v4, %v2345_v46  ;;  %v4877_v45 = vpop.permute.xlu0 %1749  ;;  %v2428_v4 = vmul.f32 %v4814_v13, %v2188_v36  ;;  %v4885_v46 = vpop.permute.xlu2 %1515 }
 0x4bc   : > { %v4840_v22 = vpop.permute.xlu1 %1495  ;;  %v2357_v10 = vsub.f32 1.0, %v2356_v0  ;;  %v4890_v30 = vsel %vm2351_vm9, %v2353_v26, %v2349_v7  ;;  %v2194_v36 = vadd.f32 %v4585_v8, %v4692_v35 }
 0x4bd   : > { %6056 = vst [vmem:[#allocation45_spill] sm:$0xff] %v4840_v22  ;;  %v3682_v22 = vpack.i.bf16 %v2422_v44, %v2421_v47  ;;  %v2215_v47 = vadd.f32 %v1503_v55, %v4729_v14  ;;  %v2339_v39 = vor.u32 1.1754944e-38, %v2338_v57  ;;  %v2427_v55 = vmul.f32 %v4812_v19, %v2187_v48 }
 0x4be   : > { %v2358_v0 = vmul.f32 %v4847_v6, %v2357_v10  ;;  %v2434_v7 = vmul.f32 %v4814_v13, %v2194_v36  ;;  %v2380_v10 = vand.u32 2147483648, %v4826_v15  ;;  %v2373_v48 = vadd.f32 %v4851_v1, %v2372_v17 }
 0x4bf   : > { %v4888_v61 = vsel %vm2337_vm8, %v2339_v39, %v2335_v33  ;;  %v3697_v33 = vpack.i.bf16 %v2428_v4, %v2427_v55  ;;  %v2366_v39 = vand.u32 2147483648, %v4820_v59  ;;  %v2199_v4 = vadd.f32 %v4609_v60, %v4689_v52 }
 0x4c0   : > { %v2359_v58 = vadd.f32 %v4847_v6, %v2358_v0  ;;  %v3712_v49 = vpack.i.bf16 %v2434_v7, %v2433_v12  ;;  %v6065_v0 = vperm.slane %v4554_v51, 2  ;;  %v2377_v60 = vsel %vm4931_vm15, %v4851_v1, %v2373_v48 }
 0x4c1   : > { %v2439_v7 = vmul.f32 %v4812_v19, %v2199_v4  ;;  %v2236_v48 = vadd.f32 %v4632_v54, %v4781_v63  ;;  %v6066_v4 = vperm.slane %v4554_v51, 4  ;;  %vm3281_vm15 = vcmask 1044484  }
 0x4c2   : > { %1541 = vperm.xlu1 %3625, %v1536_v9   ;;  %v2363_v55 = vsel %vm4920_vm14, %v4847_v6, %v2359_v58  ;;  %v2367_v6 = vor.u32 1.1754944e-38, %v2366_v39  ;;  %vm3279_vm14 = vcmask 1043459  }
 0x4c3   : > { %1547 = vperm.xlu2 %3626, %v1536_v9   ;;  %3683 = vperm.xlu0 %3654, %v3682_v22   ;;  %v4894_v22 = vmul.f32 %v4888_v61, %v2215_v47  ;;  %v1782_v9 = vpop.permute.xlu0 %1781  ;;  %v2364_v47 = vand.u32 2147483647, %v4820_v59  ;;  %v2381_v59 = vor.u32 1.1754944e-38, %v2380_v10 }
 0x4c4   : > { %v1509_v44 = vpop.permute.xlu1 %1508 }
 0x4c5   : > { %v2216_v2 = vadd.f32 %v1509_v44, %v4740_v3  ;;  %v1743_v8 = vpop.permute.xlu2 %1742  ;;  %v2378_v44 = vand.u32 2147483647, %v4826_v15  ;;  %v2200_v15 = vadd.f32 %v4591_v11, %v4692_v35  ;;  %vm2365_vm1 = vcmp.eq.f32.partialorder %v2364_v47, 8.507059e+37 }
 0x4c6   : > { %v2252_v17 = vadd.f32 %v1743_v8, %v4781_v63  ;;  %v4947_v12 = vsel %vm2365_vm1, %v2367_v6, %v2363_v55  ;;  %vm3283_vm1 = vcmask 1045509  }
 0x4c7   : > { %v4897_v57 = vmul.f32 %v4890_v30, %v2216_v2  ;;  %v1562_v2 = vperm.slane %v4554_v51, 3  ;;  %vm2379_vm2 = vcmp.eq.f32.partialorder %v2378_v44, 8.507059e+37  ;;  %v2440_v1 = vmul.f32 %v4814_v13, %v2200_v15 }
 0x4c8   : > { %v4949_v26 = vsel %vm2379_vm2, %v2381_v59, %v2377_v60  ;;  %v2235_v44 = vadd.f32 %v4615_v5, %v4807_v16  ;;  %v2241_v60 = vadd.f32 %v4652_v29, %v4807_v16  ;;  %v1588_v29 = vperm.slane %v4554_v51, 5 }
 0x4c9   : > { %v4953_v11 = vmul.f32 %v4949_v26, %v2252_v17  ;;  %v3727_v39 = vpack.i.bf16 %v2440_v1, %v2439_v7  ;;  %v2476_v36 = vmul.f32 %v4949_v26, %v2236_v48  ;;  %v2242_v17 = vadd.f32 %v4650_v40, %v4781_v63 }
 0x4ca   : > { %3627 = vset.pattern.permute.xlu1 %v4441_v43  ;;  %v2481_v7 = vmul.f32 %v4947_v12, %v2241_v60  ;;  %v2247_v1 = vadd.f32 %v4674_v41, %v4807_v16  ;;  %v2248_v40 = vadd.f32 %v4713_v53, %v4781_v63  ;;  %v1601_v53 = vperm.slane %v4554_v51, 6 }
 0x4cb   : > { %3628 = vset.pattern.permute.xlu2 %v4437_v42  ;;  %3698 = vperm.xlu0 %3654, %v3697_v33   ;;  %v4935_v33 = vpop.permute.xlu0 %1814  ;;  %vm3285_vm2 = vcmask 1046534  }
 0x4d2   : > { %1560 = vperm.xlu1 %3627, %v6065_v0   ;;  %v2475_v0 = vmul.f32 %v4947_v12, %v2235_v44 }
 0x4d3   : > { %1567 = vperm.xlu2 %3628, %v1562_v2   ;;  %3713 = vperm.xlu0 %3654, %v3712_v49   ;;  %v2258_v49 = vadd.f32 %v1782_v9, %v4781_v63  ;;  %v4967_v55 = vpop.permute.xlu0 %1554 }
 0x4d4   : > { %v1737_v23 = vpop.permute.xlu1 %1736  ;;  %v3737_v15 = vpack.i.bf16 %v2476_v36, %v2475_v0  ;;  %v2206_v0 = vadd.f32 %v4734_v56, %v4740_v3  ;;  %v2212_v56 = vadd.f32 %v4809_v31, %v4740_v3  ;;  %v2218_v31 = vadd.f32 %v4835_v37, %v4740_v3 }
 0x4d5   : > { %v2251_v58 = vadd.f32 %v1737_v23, %v4807_v16  ;;  %v1763_v10 = vpop.permute.xlu2 %1762 }
 0x4d7   : > { %v4956_v8 = vmul.f32 %v4947_v12, %v2251_v58  ;;  %v2482_v58 = vmul.f32 %v4949_v26, %v2242_v17 }
 0x4d9   : > { %v3752_v48 = vpack.i.bf16 %v2482_v58, %v2481_v7  ;;  %v2446_v7 = vmul.f32 %v4890_v30, %v2206_v0  ;;  %v2458_v0 = vmul.f32 %v4890_v30, %v2218_v31 }
 0x4da   : > { %1573 = vperm.xlu1 %3627, %v1562_v2   ;;  %v4973_v2 = vmul.f32 %v4949_v26, %v2258_v49  ;;  %v2487_v49 = vmul.f32 %v4947_v12, %v2247_v1  ;;  %v2211_v1 = vadd.f32 %v4816_v32, %v4729_v14 }
 0x4db   : > { %1580 = vperm.xlu2 %3628, %v6066_v4   ;;  %3728 = vperm.xlu0 %3654, %v3727_v39   ;;  %v4986_v6 = vpop.permute.xlu0 %1586  ;;  %v2255_v39 = vadd.f32 %v1763_v10, %v4807_v16 }
 0x4dd   : > { %v1776_v59 = vpop.permute.xlu2 %1775  ;;  %v5002_v41 = vmul.f32 %v4947_v12, %v2255_v39 }
 0x4de   : > { %v2257_v54 = vadd.f32 %v1776_v59, %v4807_v16  ;;  %v2488_v59 = vmul.f32 %v4949_v26, %v2248_v40  ;;  %v2452_v40 = vmul.f32 %v4890_v30, %v2212_v56 }
 0x4e0   : > { %v4976_v5 = vmul.f32 %v4947_v12, %v2257_v54  ;;  %v3767_v10 = vpack.i.bf16 %v2488_v59, %v2487_v49  ;;  %v6068_v59 = vperm.slane %v4601_v18, 0 }
 0x4e2   : > { %3630 = vset.pattern.permute.xlu1 %v4437_v42 }
 0x4e3   : > { %3631 = vset.pattern.permute.xlu2 %v4441_v43  ;;  %3738 = vperm.xlu0 %3654, %v3737_v15   ;;  %v4996_v44 = vpop.permute.xlu0 %1619  ;;  %v2205_v15 = vadd.f32 %v4708_v62, %v4729_v14 }
 0x4e4   : > { %v1756_v23 = vpop.permute.xlu1 %1755 }
 0x4e5   : > { %v2445_v58 = vmul.f32 %v4888_v61, %v2205_v15 }
 0x4ea   : > { %1593 = vperm.xlu1 %3630, %v1588_v29  }
 0x4eb   : > { %1599 = vperm.xlu2 %3631, %v1588_v29   ;;  %3753 = vperm.xlu0 %3654, %v3752_v48   ;;  %v5014_v17 = vpop.permute.xlu0 %1846  ;;  %v3782_v29 = vpack.i.bf16 %v2446_v7, %v2445_v58  ;;  %v2451_v48 = vmul.f32 %v4888_v61, %v2211_v1 }
 0x4ec   : > { %v1769_v4 = vpop.permute.xlu1 %1768 }
 0x4ed   : > { %v2256_v36 = vadd.f32 %v1769_v4, %v4781_v63  ;;  %v3797_v39 = vpack.i.bf16 %v2452_v40, %v2451_v48  ;;  %v2217_v4 = vadd.f32 %v4885_v46, %v4729_v14  ;;  %v1795_v49 = vpop.permute.xlu2 %1794  ;;  %v2254_v46 = vadd.f32 %v1756_v23, %v4781_v63 }
 0x4ee   : > { %v1848_v23 = vperm.slane %v4601_v18, 1  ;;  %v2260_v40 = vadd.f32 %v1795_v49, %v4781_v63 }
 0x4ef   : > { %v5005_v54 = vmul.f32 %v4949_v26, %v2256_v36  ;;  %v6067_v36 = vperm.slane %v4554_v51, 7  ;;  %v2253_v51 = vadd.f32 %v4877_v45, %v4807_v16  ;;  %v2263_v45 = vadd.f32 %v4935_v33, %v4807_v16 }
 0x4f0   : > { %v1861_v33 = vperm.slane %v4601_v18, 2 }
 0x4f1   : > { %v2493_v1 = vmul.f32 %v4947_v12, %v2253_v51 }
 0x4f2   : > { %1606 = vperm.xlu1 %3630, %v1601_v53  }
 0x4f3   : > { %1612 = vperm.xlu2 %3631, %v1601_v53   ;;  %3768 = vperm.xlu0 %3654, %v3767_v10   ;;  %v5024_v62 = vpop.permute.xlu0 %1879  ;;  %v2457_v10 = vmul.f32 %v4888_v61, %v2217_v4 }
 0x4f5   : > { %v3812_v15 = vpack.i.bf16 %v2458_v0, %v2457_v10  ;;  %v5044_v7 = vpop.permute.xlu2 %1807  ;;  %v5063_v10 = vmul.f32 %v4947_v12, %v2263_v45 }
 0x4f7   : > { %6073 = vst [vmem:[#allocation50_spill] sm:$0xff] %v5063_v10 }
 0x4fa   : > { %3633 = vset.pattern.permute.xlu1 %v4441_v43 }
 0x4fb   : > { %3634 = vset.pattern.permute.xlu2 %v4437_v42  ;;  %3783 = vperm.xlu0 %3654, %v3782_v29   ;;  %v5036_v53 = vpop.permute.xlu0 %1911  ;;  %v2494_v29 = vmul.f32 %v4949_v26, %v2254_v46 }
 0x4fc   : > { %v1789_v32 = vpop.permute.xlu1 %1788  ;;  %6069 = vst [vmem:[#allocation46_spill] sm:$0xff] %v5036_v53 }
 0x4fd   : > { %v3822_v56 = vpack.i.bf16 %v2494_v29, %v2493_v1  ;;  %v2259_v48 = vadd.f32 %v1789_v32, %v4807_v16  ;;  %v2500_v32 = vmul.f32 %v4949_v26, %v2260_v40 }
 0x4ff   : > { %v2499_v31 = vmul.f32 %v4947_v12, %v2259_v48 }
 0x501   : > { %v3837_v49 = vpack.i.bf16 %v2500_v32, %v2499_v31  ;;  %v6079_v32 = vperm.slane %v4601_v18, 3 }
 0x502   : > { %1625 = vperm.xlu1 %3633, %v6067_v36  }
 0x503   : > { %1840 = vperm.xlu2 %3634, %v6068_v59   ;;  %3798 = vperm.xlu0 %3654, %v3797_v39   ;;  %v5047_v37 = vpop.permute.xlu0 %1944 }
 0x504   : > { %6070 = vst [vmem:[#allocation47_spill] sm:$0xff] %v5047_v37  ;;  %v5049_v58 = vpop.permute.xlu1 %1801 }
 0x505   : > { %6071 = vst [vmem:[#allocation48_spill] sm:$0xff] %v5049_v58  ;;  %v1828_v39 = vpop.permute.xlu2 %1827 }
 0x506   : > { %v2265_v46 = vadd.f32 %v1828_v39, %v4807_v16 }
 0x50a   : > { %3636 = vset.pattern.permute.xlu1 %v4437_v42 }
 0x50b   : > { %3637 = vset.pattern.permute.xlu2 %v4441_v43  ;;  %3813 = vperm.xlu0 %3654, %v3812_v15   ;;  %v5058_v4 = vpop.permute.xlu0 %1976 }
 0x50c   : > { %6072 = vst [vmem:[#allocation49_spill] sm:$0xff] %v5058_v4 }
 0x512   : > { %1853 = vperm.xlu1 %3636, %v1848_v23  }
 0x513   : > { %1859 = vperm.xlu2 %3637, %v1848_v23   ;;  %3823 = vperm.xlu0 %3654, %v3822_v56   ;;  %v5077_v56 = vmul.f32 %v4947_v12, %v2265_v46 }
 0x514   : > { %v1821_v36 = vpop.permute.xlu1 %1820  ;;  %v5073_v29 = vpop.permute.xlu0 %2009 }
 0x515   : > { %v2264_v59 = vadd.f32 %v1821_v36, %v4781_v63  ;;  %v1535_v51 = vpop.permute.xlu2 %1534  ;;  %6075 = vst [vmem:[#allocation52_spill] sm:$0xff] %v5073_v29  ;;  %v6078_v36 = vlaneseq }
 0x516   : > { %6076 = vst [vmem:[#allocation53_spill] sm:$0xff] %v5077_v56 }
 0x517   : > { %v5067_v0 = vmul.f32 %v4949_v26, %v2264_v59  ;;  %v5089_v31 = vand.u32 127, %v6078_v36  ;;  %v1887_v59 = vperm.slane %v4601_v18, 4 }
 0x519   : > { %6074 = vst [vmem:[#allocation51_spill] sm:$0xff] %v5067_v0  ;;  %v5096_v46 = vadd.s32 4294967288, %v5089_v31 }
 0x51a   : > { %1866 = vperm.xlu1 %3636, %v1861_v33  }
 0x51b   : > { %1872 = vperm.xlu2 %3637, %v1861_v33   ;;  %3838 = vperm.xlu0 %3654, %v3837_v49   ;;  %v2220_v33 = vadd.f32 %v1535_v51, %v4740_v3 }
 0x51c   : > { %v1834_v1 = vpop.permute.xlu1 %1833 }
 0x51d   : > { %v2266_v23 = vadd.f32 %v1834_v1, %v4781_v63  ;;  %v1548_v39 = vpop.permute.xlu2 %1547  ;;  %v5100_v36 = vmul.f32 %v4890_v30, %v2220_v33  ;;  %v6081_v33 = vperm.slane %v4601_v18, 5 }
 0x51f   : > { %v5080_v48 = vmul.f32 %v4949_v26, %v2266_v23 }
 0x521   : > { %6077 = vst [vmem:[#allocation54_spill] sm:$0xff] %v5080_v48 }
 0x522   : > { %3639 = vset.pattern.permute.xlu1 %v4441_v43 }
 0x523   : > { %3640 = vset.pattern.permute.xlu2 %v4437_v42 }
 0x524   : > { %v5086_v40 = vpop.permute.xlu0 %2041 }
 0x52a   : > { %1885 = vperm.xlu1 %3639, %v6079_v32  }
 0x52b   : > { %1892 = vperm.xlu2 %3640, %v1887_v59  }
 0x52c   : > { %v1529_v49 = vpop.permute.xlu1 %1528 }
 0x52d   : > { %v2219_v1 = vadd.f32 %v1529_v49, %v4729_v14  ;;  %v1568_v23 = vpop.permute.xlu2 %1567  ;;  %v3657_v45 = vpop.permute.xlu0 %3656 }
 0x52e   : > { %v3659_v15 = vunpack.i.h.bf16 %v3657_v45  ;;  %v3658_v9 = vunpack.i.l.bf16 %v3657_v45  ;;  %v2222_v45 = vadd.f32 %v1548_v39, %v4740_v3 }
 0x52f   : > { %v5103_v60 = vmul.f32 %v4888_v61, %v2219_v1  ;;  %v2228_v1 = vadd.f32 %v4986_v6, %v4740_v3 }
 0x530   : > { %v3083_v51 = vperm.slane %v3659_v15, %v5096_v46  ;;  %v3081_v32 = vperm.slane %v3658_v9, %v5089_v31 }
 0x532   : > { %v5110_v49 = vsel %vm3084_vm3, %v3083_v51, %v3081_v32  ;;  %1898 = vperm.xlu1 %3639, %v1887_v59   ;;  %v5120_v51 = vmul.f32 %v4890_v30, %v2222_v45  ;;  %v5126_v59 = vmul.f32 %v4890_v30, %v2228_v1 }
 0x533   : > { %6080 = vst [vmem:[#allocation55_spill] sm:$0xff] %v5110_v49  ;;  %1905 = vperm.xlu2 %3640, %v6081_v33  }
 0x534   : > { %v1542_v50 = vpop.permute.xlu1 %1541 }
 0x535   : > { %v2221_v15 = vadd.f32 %v1542_v50, %v4729_v14  ;;  %v1581_v56 = vpop.permute.xlu2 %1580  ;;  %v3684_v9 = vpop.permute.xlu0 %3683 }
 0x536   : > { %v2227_v48 = vadd.f32 %v1581_v56, %v4729_v14  ;;  %v3686_v47 = vunpack.i.h.bf16 %v3684_v9  ;;  %v3685_v53 = vunpack.i.l.bf16 %v3684_v9  ;;  %v1913_v9 = vperm.slane %v4601_v18, 6 }
 0x537   : > { %v5123_v39 = vmul.f32 %v4888_v61, %v2221_v15 }
 0x538   : > { %v5129_v6 = vmul.f32 %v4888_v61, %v2227_v48  ;;  %v3099_v50 = vperm.slane %v3686_v47, %v5096_v46  ;;  %v3098_v32 = vperm.slane %v3685_v53, %v5089_v31 }
 0x53a   : > { %v5138_v33 = vsel %vm3084_vm3, %v3099_v50, %v3098_v32  ;;  %3642 = vset.pattern.permute.xlu1 %v4437_v42  ;;  %v2223_v50 = vadd.f32 %v4967_v55, %v4729_v14 }
 0x53b   : > { %6082 = vst [vmem:[#allocation56_spill] sm:$0xff] %v5138_v33  ;;  %3643 = vset.pattern.permute.xlu2 %v4441_v43 }
 0x53d   : > { %v3699_v1 = vpop.permute.xlu0 %3698 }
 0x53e   : > { %v3701_v48 = vunpack.i.h.bf16 %v3699_v1  ;;  %v3700_v15 = vunpack.i.l.bf16 %v3699_v1 }
 0x540   : > { %v3108_v47 = vperm.slane %v3701_v48, %v5096_v46  ;;  %v3107_v53 = vperm.slane %v3700_v15, %v5089_v31  ;;  %v2463_v48 = vmul.f32 %v4888_v61, %v2223_v50 }
 0x542   : > { %v5146_v56 = vsel %vm3084_vm3, %v3108_v47, %v3107_v53  ;;  %1918 = vperm.xlu1 %3642, %v1913_v9   ;;  %v1926_v53 = vperm.slane %v4601_v18, 7 }
 0x543   : > { %6083 = vst [vmem:[#allocation57_spill] sm:$0xff] %v5146_v56  ;;  %1924 = vperm.xlu2 %3643, %v1913_v9   ;;  %v2225_v9 = vadd.f32 %v1568_v23, %v4729_v14 }
 0x544   : > { %v1561_v32 = vpop.permute.xlu1 %1560 }
 0x545   : > { %v2224_v45 = vadd.f32 %v1561_v32, %v4740_v3  ;;  %v3714_v29 = vpop.permute.xlu0 %3713 }
 0x546   : > { %v3716_v33 = vunpack.i.h.bf16 %v3714_v29  ;;  %v3715_v1 = vunpack.i.l.bf16 %v3714_v29 }
 0x547   : > { %v2464_v15 = vmul.f32 %v4890_v30, %v2224_v45 }
 0x548   : > { %v3117_v4 = vperm.slane %v3716_v33, %v5096_v46  ;;  %v3116_v47 = vperm.slane %v3715_v1, %v5089_v31  ;;  %v5162_v33 = vmul.f32 %v4888_v61, %v2225_v9  ;;  %v1600_v9 = vpop.permute.xlu2 %1599 }
 0x549   : > { %v3852_v56 = vpack.i.bf16 %v2464_v15, %v2463_v48  ;;  %v982_v15 = vsub.f32 -inf, %v4423_v28  ;;  %v6087_v28 = vperm.slane %v4658_v27, 0 }
 0x54a   : > { %v5157_v55 = vsel %vm3084_vm3, %v3117_v4, %v3116_v47  ;;  %1931 = vperm.xlu1 %3642, %v1926_v53  }
 0x54b   : > { %6084 = vst [vmem:[#allocation58_spill] sm:$0xff] %v5157_v55  ;;  %1937 = vperm.xlu2 %3643, %v1926_v53   ;;  %3853 = vperm.xlu0 %3654, %v3852_v56   ;;  %v981_v56 = vsub.f32 -inf, %v4416_v21  ;;  %v1952_v21 = vperm.slane %v4658_v27, 1 }
 0x54c   : > { %v1574_v29 = vpop.permute.xlu1 %1573 }
 0x54d   : > { %v2226_v50 = vadd.f32 %v1574_v29, %v4740_v3  ;;  %v3729_v32 = vpop.permute.xlu0 %3728  ;;  %v995_v53 = vmul.f32 1.442695, %v981_v56 }
 0x54e   : > { %v3731_v45 = vunpack.i.h.bf16 %v3729_v32  ;;  %v3730_v49 = vunpack.i.l.bf16 %v3729_v32 }
 0x54f   : > { %v5165_v18 = vmul.f32 %v4890_v30, %v2226_v50  ;;  %4023 = vpow2.f32 %v995_v53 }
 0x550   : > { %v3126_v4 = vperm.slane %v3731_v45, %v5096_v46  ;;  %v3125_v1 = vperm.slane %v3730_v49, %v5089_v31  ;;  %v997_v49 = vmul.f32 1.442695, %v982_v15 }
 0x552   : > { %3645 = vset.pattern.permute.xlu1 %v4441_v43  ;;  %v5174_v48 = vsel %vm3084_vm3, %v3126_v4, %v3125_v1  ;;  %4025 = vpow2.f32 %v997_v49  ;;  %v2230_v1 = vadd.f32 %v1600_v9, %v4740_v3 }
 0x553   : > { %6085 = vst [vmem:[#allocation59_spill] sm:$0xff] %v5174_v48  ;;  %3646 = vset.pattern.permute.xlu2 %v4437_v42 }
 0x555   : > { %v3739_v47 = vpop.permute.xlu0 %3738  ;;  %v4024_v48 = vpop.eup %4023 }
 0x556   : > { %v3741_v29 = vunpack.i.h.bf16 %v3739_v47  ;;  %v3740_v50 = vunpack.i.l.bf16 %v3739_v47 }
 0x558   : > { %v3180_v32 = vperm.slane %v3741_v29, %v5096_v46  ;;  %v3179_v45 = vperm.slane %v3740_v50, %v5089_v31  ;;  %v2470_v50 = vmul.f32 %v4890_v30, %v2230_v1  ;;  %v4026_v49 = vpop.eup %4025  ;;  %v6089_v1 = vperm.slane %v4658_v27, 2 }
 0x55a   : > { %v5182_v4 = vsel %vm3084_vm3, %v3180_v32, %v3179_v45  ;;  %1950 = vperm.xlu1 %3645, %v6087_v28   ;;  %v1613_v32 = vpop.permute.xlu2 %1612 }
 0x55b   : > { %6086 = vst [vmem:[#allocation60_spill] sm:$0xff] %v5182_v4  ;;  %1957 = vperm.xlu2 %3646, %v1952_v21  }
 0x55c   : > { %v1594_v56 = vpop.permute.xlu1 %1593 }
 0x55d   : > { %v2229_v15 = vadd.f32 %v1594_v56, %v4729_v14  ;;  %v3754_v47 = vpop.permute.xlu0 %3753  ;;  %v5195_v56 = vmul.f32 0.0, %v4024_v48 }
 0x55e   : > { %v3756_v29 = vunpack.i.h.bf16 %v3754_v47  ;;  %v3755_v23 = vunpack.i.l.bf16 %v3754_v47  ;;  %v2232_v47 = vadd.f32 %v1613_v32, %v4740_v3 }
 0x55f   : > { %v2469_v53 = vmul.f32 %v4888_v61, %v2229_v15  ;;  %v5200_v15 = vmul.f32 0.0, %v4026_v49 }
 0x560   : > { %v3189_v45 = vperm.slane %v3756_v29, %v5096_v46  ;;  %v3188_v28 = vperm.slane %v3755_v23, %v5089_v31  ;;  %v5204_v23 = vadd.f32 %v4501_v25, %v5195_v56  ;;  %v5212_v32 = vmul.f32 %v4890_v30, %v2232_v47 }
 0x561   : > { %v3867_v4 = vpack.i.bf16 %v2470_v50, %v2469_v53  ;;  %v5209_v48 = vadd.f32 %v4492_v20, %v5200_v15 }
 0x562   : > { %v5193_v9 = vsel %vm3084_vm3, %v3189_v45, %v3188_v28  ;;  %1963 = vperm.xlu1 %3645, %v1952_v21   ;;  %4027 = vrcp.f32 %v5204_v23  ;;  %vm2388_vm5 = vweird.f32 %v5204_v23 }
 0x563   : > { %6088 = vst [vmem:[#allocation61_spill] sm:$0xff] %v5193_v9  ;;  %1970 = vperm.xlu2 %3646, %v6089_v1   ;;  %3868 = vperm.xlu0 %3654, %v3867_v4   ;;  %4029 = vrcp.f32 %v5209_v48  ;;  %vm2402_vm8 = vweird.f32 %v5209_v48 }
 0x564   : > { %v1607_v55 = vpop.permute.xlu1 %1606 }
 0x565   : > { %v2231_v29 = vadd.f32 %v1607_v55, %v4729_v14  ;;  %v3769_v50 = vpop.permute.xlu0 %3768  ;;  %v5235_v55 = vpop.permute.xlu2 %1840 }
 0x566   : > { %v3771_v21 = vunpack.i.h.bf16 %v3769_v50  ;;  %v3770_v53 = vunpack.i.l.bf16 %v3769_v50  ;;  %6091 = vst [vmem:[#allocation63_spill] sm:$0xff] %v5235_v55 }
 0x567   : > { %v5215_v4 = vmul.f32 %v4888_v61, %v2231_v29 }
 0x568   : > { %v3198_v45 = vperm.slane %v3771_v21, %v5096_v46  ;;  %v3197_v25 = vperm.slane %v3770_v53, %v5089_v31  ;;  %v5228_v1 = vpop.eup %4027  ;;  %v1978_v53 = vperm.slane %v4658_v27, 3 }
 0x569   : > { %v5230_v29 = vpop.eup %4029  ;;  %vm2389_vm4 = vweird.f32 %v5228_v1 }
 0x56a   : > { %3648 = vset.pattern.permute.xlu1 %v4437_v42  ;;  %v5225_v20 = vsel %vm3084_vm3, %v3198_v45, %v3197_v25  ;;  %v2384_v25 = vmul.f32 %v5228_v1, %v5204_v23  ;;  %vm2403_vm6 = vweird.f32 %v5230_v29  ;;  %vm5274_vm7 = vmor %vm2388_vm5, %vm2389_vm4  ;;  %vm3287_vm4 = vcmask 1047559  }
 0x56b   : > { %6090 = vst [vmem:[#allocation62_spill] sm:$0xff] %v5225_v20  ;;  %3649 = vset.pattern.permute.xlu2 %v4441_v43  ;;  %v2233_v20 = vadd.f32 %v4996_v44, %v4729_v14  ;;  %v1991_v44 = vperm.slane %v4658_v27, 4  ;;  %vm5281_vm9 = vmor %vm2402_vm8, %vm2403_vm6  ;;  %vm3346_vm5 = vcmask 523264  }
 0x56c   : > { %v2385_v58 = vsub.f32 1.0, %v2384_v25 }
 0x56d   : > { %v3784_v28 = vpop.permute.xlu0 %3783 }
 0x56e   : > { %v3786_v49 = vunpack.i.h.bf16 %v3784_v28  ;;  %v3785_v47 = vunpack.i.l.bf16 %v3784_v28  ;;  %v2398_v28 = vmul.f32 %v5230_v29, %v5209_v48 }
 0x570   : > { %v3135_v50 = vperm.slane %v3786_v49, %v5096_v46  ;;  %v3134_v21 = vperm.slane %v3785_v47, %v5089_v31 }
 0x572   : > { %v5238_v45 = vsel %vm3084_vm3, %v3135_v50, %v3134_v21  ;;  %1983 = vperm.xlu1 %3648, %v1978_v53   ;;  %v2399_v50 = vsub.f32 1.0, %v2398_v28  ;;  %v5248_v21 = vmul.f32 %v4888_v61, %v2233_v20  ;;  %v2386_v20 = vmul.f32 %v5228_v1, %v2385_v58 }
 0x573   : > { %6092 = vst [vmem:[#allocation64_spill] sm:$0xff] %v5238_v45  ;;  %1989 = vperm.xlu2 %3649, %v1978_v53   ;;  %v5256_v53 = vpop.permute.xlu2 %1859  ;;  %v2408_v58 = vand.u32 2147483648, %v5209_v48 }
 0x574   : > { %v1626_v49 = vpop.permute.xlu1 %1625  ;;  %6093 = vst [vmem:[#allocation65_spill] sm:$0xff] %v5248_v21  ;;  %v2400_v25 = vmul.f32 %v5230_v29, %v2399_v50 }
 0x575   : > { %v2234_v47 = vadd.f32 %v1626_v49, %v4740_v3  ;;  %v3799_v9 = vpop.permute.xlu0 %3798 }
 0x576   : > { %v3801_v37 = vunpack.i.h.bf16 %v3799_v9  ;;  %v3800_v55 = vunpack.i.l.bf16 %v3799_v9  ;;  %v2401_v49 = vadd.f32 %v5230_v29, %v2400_v25  ;;  %v2406_v25 = vand.u32 2147483647, %v5209_v48 }
 0x577   : > { %v5251_v45 = vmul.f32 %v4890_v30, %v2234_v47  ;;  %v2387_v47 = vadd.f32 %v5228_v1, %v2386_v20  ;;  %v2392_v20 = vand.u32 2147483647, %v5204_v23  ;;  %v2268_v48 = vadd.f32 %v5014_v17, %v5200_v15 }
 0x578   : > { %v3144_v10 = vperm.slane %v3801_v37, %v5096_v46  ;;  %v3143_v0 = vperm.slane %v3800_v55, %v5089_v31  ;;  %vm2407_vm11 = vcmp.eq.f32.partialorder %v2406_v25, 8.507059e+37 }
 0x579   : > { %6094 = vst [vmem:[#allocation66_spill] sm:$0xff] %v5251_v45  ;;  %vm2393_vm10 = vcmp.eq.f32.partialorder %v2392_v20, 8.507059e+37  ;;  %v6103_v20 = vperm.slane %v4658_v27, 5 }
 0x57a   : > { %v5261_v9 = vsel %vm3084_vm3, %v3144_v10, %v3143_v0  ;;  %1996 = vperm.xlu1 %3648, %v1991_v44   ;;  %v2394_v10 = vand.u32 2147483648, %v5204_v23  ;;  %v2405_v23 = vsel %vm5281_vm9, %v5230_v29, %v2401_v49 }
 0x57b   : > { %6095 = vst [vmem:[#allocation67_spill] sm:$0xff] %v5261_v9  ;;  %2002 = vperm.xlu2 %3649, %v1991_v44   ;;  %v5297_v9 = vpop.permute.xlu2 %1872 }
 0x57c   : > { %6101 = vst [vmem:[#allocation69_spill] sm:$0xff] %v5297_v9  ;;  %v2395_v21 = vor.u32 1.1754944e-38, %v2394_v10 }
 0x57d   : > { %v3814_v28 = vpop.permute.xlu0 %3813 }
 0x57e   : > { %v3816_v37 = vunpack.i.h.bf16 %v3814_v28  ;;  %v3815_v55 = vunpack.i.l.bf16 %v3814_v28  ;;  %v2174_v28 = vadd.f32 %v4517_v34, %v4692_v35 }
 0x580   : > { %v3153_v0 = vperm.slane %v3816_v37, %v5096_v46  ;;  %v3152_v50 = vperm.slane %v3815_v55, %v5089_v31  ;;  %v2391_v55 = vsel %vm5274_vm7, %v5228_v1, %v2387_v47 }
 0x581   : > { %v5301_v1 = vsel %vm2393_vm10, %v2395_v21, %v2391_v55  ;;  %v2017_v21 = vperm.slane %v4658_v27, 6  ;;  %v2176_v55 = vadd.f32 %v4525_v38, %v4692_v35 }
 0x582   : > { %3651 = vset.pattern.permute.xlu1 %v4441_v43  ;;  %v5287_v37 = vsel %vm3084_vm3, %v3153_v0, %v3152_v50  ;;  %v2409_v43 = vor.u32 1.1754944e-38, %v2408_v58 }
 0x583   : > { %6100 = vst [vmem:[#allocation68_spill] sm:$0xff] %v5287_v37  ;;  %3652 = vset.pattern.permute.xlu2 %v4437_v42 }
 0x584   : > { %v1854_v45 = vpop.permute.xlu1 %1853  ;;  %v5303_v47 = vsel %vm2407_vm11, %v2409_v43, %v2405_v23  ;;  %v2173_v23 = vadd.f32 %v4499_v24, %v4689_v52  ;;  %v6106_v43 = vld [vmem:[#allocation9_spill] sm:$0xff] }
 0x585   : > { %v2269_v0 = vadd.f32 %v1854_v45, %v5195_v56  ;;  %v3824_v50 = vpop.permute.xlu0 %3823  ;;  %v5306_v17 = vmul.f32 %v5303_v47, %v2268_v48  ;;  %v5321_v25 = vpop.permute.xlu2 %1892  ;;  %v6105_v48 = vperm.slane %v4658_v27, 7  ;;  %v6109_v27 = vld [vmem:[#allocation12_spill] sm:$0xff] }
 0x586   : > { %v3826_v29 = vunpack.i.h.bf16 %v3824_v50  ;;  %v3825_v49 = vunpack.i.l.bf16 %v3824_v50  ;;  %6104 = vst [vmem:[#allocation71_spill] sm:$0xff] %v5321_v25  ;;  %v2414_v50 = vmul.f32 %v4814_v13, %v2174_v28  ;;  %v2413_v34 = vmul.f32 %v4812_v19, %v2173_v23  ;;  %v6111_v28 = vld [vmem:[#allocation10_spill] sm:$0xff] }
 0x587   : > { %v5309_v44 = vmul.f32 %v5301_v1, %v2269_v0  ;;  %v2175_v0 = vadd.f32 %v6106_v43, %v4689_v52  ;;  %v6110_v43 = vmov 0   ;;  %v2177_v45 = vadd.f32 %v6111_v28, %v4689_v52 }
 0x588   : > { %v3207_v42 = vperm.slane %v3826_v29, %v5096_v46  ;;  %v3206_v10 = vperm.slane %v3825_v49, %v5089_v31  ;;  %v2416_v49 = vmul.f32 %v4814_v13, %v2176_v55  ;;  %v6112_v55 = vld [vmem:[#allocation11_spill] sm:$0xff] }
 0x589   : > { %v2415_v38 = vmul.f32 %v4812_v19, %v2175_v0  ;;  %v2180_v23 = vadd.f32 %v6112_v55, %v4692_v35  ;;  %v2262_v0 = vadd.f32 %v5044_v7, %v4781_v63  ;;  %v6113_v7 = vld [vmem:[#allocation14_spill] sm:$0xff]  ;;  %v6114_v55 = vld [vmem:[#allocation16_spill] sm:$0xff] }
 0x58a   : > { %v5317_v58 = vsel %vm3084_vm3, %v3207_v42, %v3206_v10  ;;  %2015 = vperm.xlu1 %3651, %v6103_v20   ;;  %v3661_v42 = vpack.i.bf16 %v2414_v50, %v2413_v34  ;;  %v6108_v10 = vld [vmem:[#allocation25_spill] sm:$0xff]  ;;  %v2179_v20 = vadd.f32 %v6109_v27, %v4689_v52 }
 0x58b   : > { %6102 = vst [vmem:[#allocation70_spill] sm:$0xff] %v5317_v58  ;;  %2022 = vperm.xlu2 %3652, %v2017_v21   ;;  %v2178_v24 = vadd.f32 %v6108_v10, %v4692_v35  ;;  %v2417_v10 = vmul.f32 %v4812_v19, %v2177_v45  ;;  %v2420_v27 = vmul.f32 %v4814_v13, %v2180_v23  ;;  %v6116_v23 = vld [vmem:[#allocation27_spill] sm:$0xff] }
 0x58c   : > { %v2419_v34 = vmul.f32 %v4812_v19, %v2179_v20  ;;  %v2186_v20 = vadd.f32 %v6114_v55, %v4692_v35  ;;  %v6118_v55 = vld [vmem:[#allocation18_spill] sm:$0xff] }
 0x58d   : > { %v5334_v29 = vpop.permute.xlu2 %1905  ;;  %v2418_v50 = vmul.f32 %v4814_v13, %v2178_v24  ;;  %v2189_v45 = vadd.f32 %v6118_v55, %v4689_v52 }
 0x58e   : > { %6107 = vst [vmem:[#allocation9_spill] sm:$0xff] %v5334_v29  ;;  %v3677_v24 = vpack.i.bf16 %v2420_v27, %v2419_v34  ;;  %v2426_v34 = vmul.f32 %v4814_v13, %v2186_v20  ;;  %v6120_v29 = vld [vmem:[#allocation15_spill] sm:$0xff] }
 0x58f   : > { %v3672_v28 = vpack.i.bf16 %v2418_v50, %v2417_v10 }
 0x592   : > { %2028 = vperm.xlu1 %3651, %v2017_v21   ;;  %v3667_v21 = vpack.i.bf16 %v2416_v49, %v2415_v38 }
 0x593   : > { %2035 = vperm.xlu2 %3652, %v6105_v48   ;;  %v5343_v48 = vpop.permute.xlu1 %1866 }
 0x59a   : > { %3660 = vset.pattern.permute.xlu1 %v6110_v43 }
 0x59b   : > { %3666 = vset.pattern.permute.xlu2 %v6110_v43  ;;  %3662 = vperm.xlu1 %3660, %v3661_v42   ;;  %v5359_v42 = vmul.f32 %v4949_v26, %v2262_v0  ;;  %v2183_v0 = vadd.f32 %v6116_v23, %v4689_v52  ;;  %v6119_v23 = vld [vmem:[#allocation20_spill] sm:$0xff] }
 0x59c   : > { %3668 = vperm.xlu2 %3666, %v3667_v21   ;;  %v2184_v21 = vadd.f32 %v6113_v7, %v4692_v35  ;;  %v5368_v37 = vpop.permute.xlu1 %1885 }
 0x59d   : > { %v1925_v49 = vpop.permute.xlu2 %1924  ;;  %6115 = vst [vmem:[#allocation25_spill] sm:$0xff] %v5368_v37  ;;  %v2423_v10 = vmul.f32 %v4812_v19, %v2183_v0  ;;  %v2429_v0 = vmul.f32 %v4812_v19, %v2189_v45  ;;  %v6125_v45 = vld [vmem:[#allocation32_spill] sm:$0xff] }
 0x59e   : > { %v2280_v38 = vadd.f32 %v1925_v49, %v5200_v15  ;;  %v6117_v49 = vld [vmem:[#allocation13_spill] sm:$0xff]  ;;  %v2424_v50 = vmul.f32 %v4814_v13, %v2184_v21 }
 0x59f   : > { %v6121_v21 = vld [vmem:[#allocation17_spill] sm:$0xff] }
 0x5a0   : > { %v5362_v43 = vmul.f32 %v5303_v47, %v2280_v38  ;;  %v2185_v38 = vadd.f32 %v6117_v49, %v4689_v52  ;;  %v3687_v7 = vpack.i.bf16 %v2424_v50, %v2423_v10  ;;  %v2190_v49 = vadd.f32 %v6120_v29, %v4692_v35 }
 0x5a2   : > { %v2425_v27 = vmul.f32 %v4812_v19, %v2185_v38  ;;  %v2430_v50 = vmul.f32 %v4814_v13, %v2190_v49 }
 0x5a3   : > { %3673 = vperm.xlu1 %3660, %v3672_v28   ;;  %v2191_v28 = vadd.f32 %v6119_v23, %v4689_v52 }
 0x5a4   : > { %3678 = vperm.xlu2 %3666, %v3677_v24   ;;  %v3692_v58 = vpack.i.bf16 %v2426_v34, %v2425_v27  ;;  %v2192_v24 = vadd.f32 %v6121_v21, %v4692_v35  ;;  %v5388_v20 = vpop.permute.xlu1 %1898  ;;  %v3702_v10 = vpack.i.bf16 %v2430_v50, %v2429_v0  ;;  %v6122_v27 = vld [vmem:[#allocation22_spill] sm:$0xff]  ;;  %v6124_v21 = vld [vmem:[#allocation19_spill] sm:$0xff] }
 0x5a5   : > { %v2431_v38 = vmul.f32 %v4812_v19, %v2191_v28  ;;  %v2196_v55 = vadd.f32 %v6122_v27, %v4692_v35  ;;  %v2195_v37 = vadd.f32 %v6124_v21, %v4689_v52  ;;  %v2198_v28 = vadd.f32 %v6125_v45, %v4692_v35  ;;  %v6126_v27 = vld [vmem:[#allocation24_spill] sm:$0xff] }
 0x5a6   : > { %v2432_v34 = vmul.f32 %v4814_v13, %v2192_v24 }
 0x5a7   : > { %v2436_v24 = vmul.f32 %v4814_v13, %v2196_v55  ;;  %v2438_v50 = vmul.f32 %v4814_v13, %v2198_v28 }
 0x5a8   : > { %v3707_v29 = vpack.i.bf16 %v2432_v34, %v2431_v38  ;;  %v2435_v38 = vmul.f32 %v4812_v19, %v2195_v37 }
 0x5aa   : > { %v3717_v34 = vpack.i.bf16 %v2436_v24, %v2435_v38 }
 0x5ab   : > { %3688 = vperm.xlu1 %3660, %v3687_v7   ;;  %v6123_v7 = vld [vmem:[#allocation21_spill] sm:$0xff] }
 0x5ac   : > { %3693 = vperm.xlu2 %3666, %v3692_v58   ;;  %v2197_v23 = vadd.f32 %v6123_v7, %v4689_v52  ;;  %v1938_v58 = vpop.permute.xlu2 %1937  ;;  %v2201_v7 = vadd.f32 %v6126_v27, %v4689_v52  ;;  %v6131_v27 = vld [vmem:[#allocation26_spill] sm:$0xff] }
 0x5ad   : > { %v2282_v9 = vadd.f32 %v1938_v58, %v5200_v15 }
 0x5ae   : > { %v2437_v0 = vmul.f32 %v4812_v19, %v2197_v23  ;;  %v6129_v23 = vld [vmem:[#allocation28_spill] sm:$0xff]  ;;  %v2441_v24 = vmul.f32 %v4812_v19, %v2201_v7 }
 0x5af   : > { %v2240_v37 = vadd.f32 %v6129_v23, %v4781_v63 }
 0x5b0   : > { %v3722_v21 = vpack.i.bf16 %v2438_v50, %v2437_v0  ;;  %v5422_v50 = vmul.f32 %v5303_v47, %v2282_v9 }
 0x5b1   : > { %v2480_v58 = vmul.f32 %v4949_v26, %v2240_v37 }
 0x5b3   : > { %3703 = vperm.xlu1 %3660, %v3702_v10   ;;  %v6127_v10 = vld [vmem:[#allocation29_spill] sm:$0xff] }
 0x5b4   : > { %3708 = vperm.xlu2 %3666, %v3707_v29   ;;  %v5402_v49 = vpop.permute.xlu1 %1918  ;;  %v2239_v25 = vadd.f32 %v6127_v10, %v4807_v16  ;;  %v6128_v29 = vld [vmem:[#allocation23_spill] sm:$0xff] }
 0x5b5   : > { %v2202_v45 = vadd.f32 %v6128_v29, %v4692_v35  ;;  %v1958_v55 = vpop.permute.xlu2 %1957  ;;  %v6134_v29 = vld [vmem:[#allocation30_spill] sm:$0xff] }
 0x5b6   : > { %v2479_v0 = vmul.f32 %v4947_v12, %v2239_v25  ;;  %v6132_v25 = vld [vmem:[#allocation33_spill] sm:$0xff] }
 0x5b7   : > { %v2442_v38 = vmul.f32 %v4814_v13, %v2202_v45  ;;  %v2246_v10 = vadd.f32 %v6132_v25, %v4781_v63  ;;  %v6133_v13 = vld [vmem:[#allocation34_spill] sm:$0xff]  ;;  %v2245_v45 = vadd.f32 %v6134_v29, %v4807_v16 }
 0x5b8   : > { %v3747_v7 = vpack.i.bf16 %v2480_v58, %v2479_v0  ;;  %v2238_v9 = vadd.f32 %v6133_v13, %v4781_v63  ;;  %v6137_v13 = vld [vmem:[#allocation37_spill] sm:$0xff] }
 0x5bb   : > { %3718 = vperm.xlu1 %3660, %v3717_v34   ;;  %v3732_v34 = vpack.i.bf16 %v2442_v38, %v2441_v24  ;;  %v2478_v24 = vmul.f32 %v4949_v26, %v2238_v9  ;;  %v6135_v38 = vld [vmem:[#allocation31_spill] sm:$0xff]  ;;  %v2271_v9 = vadd.f32 %v5343_v48, %v5195_v56 }
 0x5bc   : > { %3723 = vperm.xlu2 %3666, %v3722_v21   ;;  %v1932_v28 = vpop.permute.xlu1 %1931  ;;  %v2237_v21 = vadd.f32 %v6131_v27, %v4807_v16  ;;  %v2244_v58 = vadd.f32 %v6135_v38, %v4781_v63 }
 0x5bd   : > { %v2281_v52 = vadd.f32 %v1932_v28, %v5195_v56  ;;  %v1971_v37 = vpop.permute.xlu2 %1970  ;;  %v2486_v28 = vmul.f32 %v4949_v26, %v2246_v10  ;;  %v6138_v10 = vld [vmem:[#allocation40_spill] sm:$0xff] }
 0x5be   : > { %v2477_v23 = vmul.f32 %v4947_v12, %v2237_v21  ;;  %v2285_v21 = vadd.f32 %v1958_v55, %v5195_v56  ;;  %v2203_v29 = vadd.f32 %v6138_v10, %v4729_v14 }
 0x5bf   : > { %v5425_v35 = vmul.f32 %v5301_v1, %v2281_v52  ;;  %v2485_v52 = vmul.f32 %v4947_v12, %v2245_v45 }
 0x5c0   : > { %v3742_v0 = vpack.i.bf16 %v2478_v24, %v2477_v23  ;;  %v2484_v23 = vmul.f32 %v4949_v26, %v2244_v58  ;;  %v2443_v48 = vmul.f32 %v4888_v61, %v2203_v29 }
 0x5c1   : > { %6130 = vst [vmem:[#allocation12_spill] sm:$0xff] %v5425_v35  ;;  %v3762_v27 = vpack.i.bf16 %v2486_v28, %v2485_v52 }
 0x5c3   : > { %3733 = vperm.xlu1 %3660, %v3732_v34   ;;  %v6136_v34 = vld [vmem:[#allocation38_spill] sm:$0xff] }
 0x5c4   : > { %3748 = vperm.xlu2 %3666, %v3747_v7   ;;  %v2204_v25 = vadd.f32 %v6136_v34, %v4740_v3  ;;  %v2243_v7 = vadd.f32 %v6137_v13, %v4807_v16 }
 0x5c6   : > { %v2444_v52 = vmul.f32 %v4890_v30, %v2204_v25  ;;  %v2483_v55 = vmul.f32 %v4947_v12, %v2243_v7  ;;  %v6139_v25 = vld [vmem:[#allocation36_spill] sm:$0xff] }
 0x5c7   : > { %v2249_v10 = vadd.f32 %v6139_v25, %v4807_v16 }
 0x5c8   : > { %v3757_v13 = vpack.i.bf16 %v2484_v23, %v2483_v55  ;;  %v6142_v23 = vld [vmem:[#allocation41_spill] sm:$0xff] }
 0x5c9   : > { %v2210_v55 = vadd.f32 %v6142_v23, %v4740_v3  ;;  %v2489_v19 = vmul.f32 %v4947_v12, %v2249_v10  ;;  %v6144_v10 = vld [vmem:[#allocation42_spill] sm:$0xff] }
 0x5ca   : > { %v2208_v35 = vadd.f32 %v6144_v10, %v4740_v3 }
 0x5cb   : > { %3743 = vperm.xlu1 %3660, %v3742_v0   ;;  %v5459_v0 = vmul.f32 %v5301_v1, %v2285_v21  ;;  %v3777_v21 = vpack.i.bf16 %v2444_v52, %v2443_v48 }
 0x5cc   : > { %3763 = vperm.xlu2 %3666, %v3762_v27   ;;  %v1951_v45 = vpop.permute.xlu1 %1950  ;;  %v5466_v27 = vmul.f32 %v5301_v1, %v2271_v9  ;;  %v6141_v9 = vld [vmem:[#allocation35_spill] sm:$0xff] }
 0x5cd   : > { %v2284_v28 = vadd.f32 %v1951_v45, %v5200_v15  ;;  %v1990_v24 = vpop.permute.xlu2 %1989  ;;  %v6140_v45 = vld [vmem:[#allocation43_spill] sm:$0xff] }
 0x5ce   : > { %v2290_v38 = vadd.f32 %v1990_v24, %v5200_v15  ;;  %v2250_v24 = vadd.f32 %v6141_v9, %v4781_v63  ;;  %v6143_v9 = vld [vmem:[#allocation39_spill] sm:$0xff] }
 0x5cf   : > { %v5462_v34 = vmul.f32 %v5303_v47, %v2284_v28  ;;  %v2209_v28 = vadd.f32 %v6140_v45, %v4729_v14  ;;  %v2207_v23 = vadd.f32 %v6143_v9, %v4729_v14 }
 0x5d0   : > { %v5469_v58 = vmul.f32 %v5303_v47, %v2290_v38  ;;  %v2287_v38 = vadd.f32 %v1971_v37, %v5195_v56  ;;  %v2490_v45 = vmul.f32 %v4949_v26, %v2250_v24  ;;  %v2450_v37 = vmul.f32 %v4890_v30, %v2210_v55  ;;  %v6145_v55 = vld [vmem:[#allocation45_spill] sm:$0xff] }
 0x5d1   : > { %v2449_v48 = vmul.f32 %v4888_v61, %v2209_v28  ;;  %v2447_v26 = vmul.f32 %v4888_v61, %v2207_v23  ;;  %v2448_v24 = vmul.f32 %v4890_v30, %v2208_v35 }
 0x5d2   : > { %v2527_v29 = vmul.f32 %v5301_v1, %v2287_v38 }
 0x5d3   : > { %3758 = vperm.xlu1 %3660, %v3757_v13   ;;  %v3772_v13 = vpack.i.bf16 %v2490_v45, %v2489_v19  ;;  %v3792_v7 = vpack.i.bf16 %v2450_v37, %v2449_v48  ;;  %v3787_v38 = vpack.i.bf16 %v2448_v24, %v2447_v26  ;;  %v2214_v19 = vadd.f32 %v6145_v55, %v4740_v3 }
 0x5d4   : > { %3778 = vperm.xlu2 %3666, %v3777_v21   ;;  %v1964_v25 = vpop.permute.xlu1 %1963  ;;  %v6147_v48 = vpack.i.bf16 %v4897_v57, %v4894_v22  ;;  %v2273_v22 = vadd.f32 %v5024_v62, %v5195_v56  ;;  %v2276_v26 = vadd.f32 %v5388_v20, %v5200_v15  ;;  %v6149_v62 = vpack.i.bf16 %v5005_v54, %v5002_v41 }
 0x5d5   : > { %v2286_v52 = vadd.f32 %v1964_v25, %v5200_v15  ;;  %v2003_v28 = vpop.permute.xlu2 %2002  ;;  %v6146_v25 = vld [vmem:[#allocation44_spill] sm:$0xff]  ;;  %v2454_v45 = vmul.f32 %v4890_v30, %v2214_v19  ;;  %v6148_v30 = vpack.i.bf16 %v4953_v11, %v4956_v8  ;;  %v6150_v11 = vpack.i.bf16 %v4973_v2, %v4976_v5 }
 0x5d6   : > { %v2513_v23 = vmul.f32 %v5301_v1, %v2273_v22  ;;  %v2279_v20 = vadd.f32 %v5402_v49, %v5195_v56  ;;  %v6151_v5 = vpack.i.bf16 %v5100_v36, %v5103_v60 }
 0x5d7   : > { %v2526_v63 = vmul.f32 %v5303_v47, %v2286_v52  ;;  %v2213_v52 = vadd.f32 %v6146_v25, %v4729_v14 }
 0x5d9   : > { %v3902_v21 = vpack.i.bf16 %v2527_v29, %v2526_v63  ;;  %v2270_v29 = vadd.f32 %v5256_v53, %v5200_v15  ;;  %v2453_v37 = vmul.f32 %v4888_v61, %v2213_v52  ;;  %v2292_v53 = vadd.f32 %v2003_v28, %v5200_v15 }
 0x5da   : > { %v2298_v52 = vadd.f32 %v5086_v40, %v5200_v15 }
 0x5db   : > { %3773 = vperm.xlu1 %3660, %v3772_v13   ;;  %3903 = vperm.xlu0 %3654, %v3902_v21   ;;  %v2510_v3 = vmul.f32 %v5303_v47, %v2270_v29  ;;  %v3802_v13 = vpack.i.bf16 %v2454_v45, %v2453_v37  ;;  %v2532_v57 = vmul.f32 %v5303_v47, %v2292_v53 }
 0x5dc   : > { %3793 = vperm.xlu2 %3666, %v3792_v7   ;;  %v6152_v29 = vpack.i.bf16 %v5120_v51, %v5123_v39  ;;  %v2538_v45 = vmul.f32 %v5303_v47, %v2298_v52  ;;  %v6153_v51 = vpack.i.bf16 %v5165_v18, %v5162_v33  ;;  %v6154_v39 = vpack.i.bf16 %v5126_v59, %v5129_v6  ;;  %v6156_v33 = vld [vmem:[#allocation51_spill] sm:$0xff]  ;;  %v6157_v18 = vld [vmem:[#allocation50_spill] sm:$0xff] }
 0x5dd   : > { %v3927_v21 = vpack.i.bf16 %v2513_v23, %v2532_v57  ;;  %v6158_v57 = vpack.i.bf16 %v6156_v33, %v6157_v18  ;;  %v6159_v6 = vld [vmem:[#allocation66_spill] sm:$0xff]  ;;  %v6160_v23 = vld [vmem:[#allocation65_spill] sm:$0xff]  ;;  %v6164_v52 = vld [vmem:[#allocation55_spill] sm:$0xff] }
 0x5de   : > { %v6169_v18 = vld [vmem:[#allocation69_spill] sm:$0xff] }
 0x5e3   : > { %3788 = vperm.xlu1 %3660, %v3787_v38   ;;  %v2516_v38 = vmul.f32 %v5303_v47, %v2276_v26 }
 0x5e4   : > { %3808 = vperm.xlu2 %3666, %v6147_v48   ;;  %v1984_v7 = vpop.permute.xlu1 %1983  ;;  %v2519_v48 = vmul.f32 %v5301_v1, %v2279_v20 }
 0x5e5   : > { %v2289_v35 = vadd.f32 %v1984_v7, %v5195_v56  ;;  %v2023_v63 = vpop.permute.xlu2 %2022 }
 0x5e6   : > { %v2295_v10 = vadd.f32 %v2023_v63, %v5195_v56  ;;  %v3957_v63 = vpack.i.bf16 %v2519_v48, %v2538_v45 }
 0x5e7   : > { %v2529_v14 = vmul.f32 %v5301_v1, %v2289_v35 }
 0x5e8   : > { %v2535_v8 = vmul.f32 %v5301_v1, %v2295_v10 }
 0x5e9   : > { %v3912_v9 = vpack.i.bf16 %v2529_v14, %v2510_v3 }
 0x5ea   : > { %v3942_v25 = vpack.i.bf16 %v2535_v8, %v2516_v38 }
 0x5eb   : > { %3803 = vperm.xlu1 %3660, %v3802_v13   ;;  %3913 = vperm.xlu0 %3654, %v3912_v9  }
 0x5ec   : > { %3818 = vperm.xlu2 %3666, %v6148_v30   ;;  %v5527_v28 = vpop.permute.xlu1 %1996  ;;  %v6155_v30 = vpack.i.bf16 %v5212_v32, %v5215_v4  ;;  %v6162_v32 = vld [vmem:[#allocation48_spill] sm:$0xff] }
 0x5ed   : > { %v5518_v61 = vpop.permute.xlu2 %2035  ;;  %v2261_v4 = vadd.f32 %v6162_v32, %v4807_v16 }
 0x5ef   : > { %v2501_v48 = vmul.f32 %v4947_v12, %v2261_v4 }
 0x5f3   : > { %3828 = vperm.xlu1 %3660, %v6149_v62   ;;  %3928 = vperm.xlu0 %3654, %v3927_v21   ;;  %v6161_v21 = vpack.i.bf16 %v6159_v6, %v6160_v23  ;;  %v6170_v6 = vpack.i.bf16 %v5459_v0, %v5462_v34 }
 0x5f4   : > { %3833 = vperm.xlu2 %3666, %v6150_v11  }
 0x5f6   : > { %v3669_v24 = vpop.permute.xlu2 %3668 }
 0x5f7   : > { %v3671_v55 = vunpack.i.h.bf16 %v3669_v24  ;;  %v3670_v19 = vunpack.i.l.bf16 %v3669_v24 }
 0x5f9   : > { %v3090_v41 = vperm.slane %v3671_v55, %v5096_v46  ;;  %v3089_v54 = vperm.slane %v3670_v19, %v5089_v31 }
 0x5fb   : > { %v3091_v2 = vsel %vm3084_vm3, %v3090_v41, %v3089_v54  ;;  %3843 = vperm.xlu1 %3660, %v6151_v5   ;;  %3943 = vperm.xlu0 %3654, %v3942_v25   ;;  %v6163_v25 = vld [vmem:[#allocation47_spill] sm:$0xff] }
 0x5fc   : > { %3848 = vperm.xlu2 %3666, %v6152_v29   ;;  %v5547_v49 = vpop.permute.xlu1 %2015  ;;  %v2283_v41 = vadd.f32 %v6163_v25, %v5195_v56  ;;  %v6165_v29 = vpack.i.bf16 %v5359_v42, %v5362_v43  ;;  %v6167_v43 = vld [vmem:[#allocation63_spill] sm:$0xff] }
 0x5fe   : > { %v3679_v7 = vpop.permute.xlu2 %3678 }
 0x5ff   : > { %v3681_v35 = vunpack.i.h.bf16 %v3679_v7  ;;  %v3680_v40 = vunpack.i.l.bf16 %v3679_v7  ;;  %v6166_v7 = vpack.i.bf16 %v5309_v44, %v5306_v17  ;;  %v2267_v17 = vadd.f32 %v6167_v43, %v5195_v56 }
 0x601   : > { %v3096_v37 = vperm.slane %v3681_v35, %v5096_v46  ;;  %v3095_v60 = vperm.slane %v3680_v40, %v5089_v31  ;;  %v2523_v40 = vmul.f32 %v5301_v1, %v2283_v41  ;;  %v2507_v23 = vmul.f32 %v5301_v1, %v2267_v17 }
 0x602   : > { %v2294_v41 = vadd.f32 %v5547_v49, %v5200_v15  ;;  %v2297_v17 = vadd.f32 %v5518_v61, %v5195_v56 }
 0x603   : > { %v3097_v36 = vsel %vm3084_vm3, %v3096_v37, %v3095_v60  ;;  %3858 = vperm.xlu1 %3660, %v6153_v51   ;;  %3958 = vperm.xlu0 %3654, %v3957_v63  }
 0x604   : > { %3863 = vperm.xlu2 %3666, %v6154_v39   ;;  %v5560_v3 = vpop.permute.xlu1 %2028 }
 0x606   : > { %v3694_v14 = vpop.permute.xlu2 %3693 }
 0x607   : > { %v3696_v13 = vunpack.i.h.bf16 %v3694_v14  ;;  %v3695_v53 = vunpack.i.l.bf16 %v3694_v14  ;;  %v3892_v14 = vpack.i.bf16 %v2523_v40, %v2501_v48 }
 0x609   : > { %v3105_v9 = vperm.slane %v3696_v13, %v5096_v46  ;;  %v3104_v22 = vperm.slane %v3695_v53, %v5089_v31  ;;  %v2291_v13 = vadd.f32 %v5527_v28, %v5195_v56 }
 0x60b   : > { %3873 = vperm.xlu1 %3660, %v6155_v30   ;;  %3968 = vperm.xlu0 %3654, %v6158_v57   ;;  %v5571_v59 = vsel %vm3084_vm3, %v3105_v9, %v3104_v22  ;;  %v6168_v9 = vld [vmem:[#allocation49_spill] sm:$0xff]  ;;  %v2272_v57 = vadd.f32 %v6169_v18, %v5200_v15  ;;  %v6176_v18 = vpack.i.bf16 %v5466_v27, %v5469_v58 }
 0x60c   : > { %3878 = vperm.xlu2 %3666, %v6161_v21   ;;  %v2288_v22 = vadd.f32 %v6168_v9, %v5200_v15  ;;  %v6175_v9 = vld [vmem:[#allocation57_spill] sm:$0xff] }
 0x60d   : > { %v3663_v10 = vpop.permute.xlu1 %3662  ;;  %v2512_v0 = vmul.f32 %v5303_v47, %v2272_v57  ;;  %v6177_v57 = vld [vmem:[#allocation46_spill] sm:$0xff] }
 0x60e   : > { %v3665_v26 = vunpack.i.h.bf16 %v3663_v10  ;;  %v3664_v62 = vunpack.i.l.bf16 %v3663_v10  ;;  %v3709_v11 = vpop.permute.xlu2 %3708  ;;  %v6171_v10 = vld [vmem:[#allocation56_spill] sm:$0xff]  ;;  %v2528_v32 = vmul.f32 %v5303_v47, %v2288_v22 }
 0x60f   : > { %v3711_v8 = vunpack.i.h.bf16 %v3709_v11  ;;  %v3710_v24 = vunpack.i.l.bf16 %v3709_v11 }
 0x610   : > { %v3087_v38 = vperm.slane %v3665_v26, %v5096_v46  ;;  %v3086_v55 = vperm.slane %v3664_v62, %v5089_v31  ;;  %v2531_v62 = vmul.f32 %v5301_v1, %v2291_v13  ;;  %v6174_v13 = vld [vmem:[#allocation52_spill] sm:$0xff] }
 0x611   : > { %v3114_v19 = vperm.slane %v3711_v8, %v5096_v46  ;;  %v3113_v20 = vperm.slane %v3710_v24, %v5089_v31 }
 0x612   : > { %v3088_v54 = vsel %vm3084_vm3, %v3087_v38, %v3086_v55  ;;  %v3907_v55 = vpack.i.bf16 %v2507_v23, %v2528_v32  ;;  %v3922_v25 = vpack.i.bf16 %v2531_v62, %v2512_v0  ;;  %v2296_v0 = vadd.f32 %v5560_v3, %v5200_v15 }
 0x613   : > { %v3276_v5 = vsel %vm3275_vm12, %v3088_v54, %v6164_v52  ;;  %v5588_v16 = vsel %vm3084_vm3, %v3114_v19, %v3113_v20  ;;  %3888 = vperm.xlu1 %3660, %v6165_v29   ;;  %v6172_v29 = vld [vmem:[#allocation71_spill] sm:$0xff] }
 0x614   : > { %3883 = vperm.xlu2 %3666, %v6166_v7   ;;  %v3278_v45 = vsel %vm3277_vm13, %v3091_v2, %v3276_v5  ;;  %v2275_v48 = vadd.f32 %v6172_v29, %v5195_v56  ;;  %v2536_v3 = vmul.f32 %v5303_v47, %v2296_v0 }
 0x615   : > { %v3674_v35 = vpop.permute.xlu1 %3673 }
 0x616   : > { %v3676_v63 = vunpack.i.h.bf16 %v3674_v35  ;;  %v3675_v37 = vunpack.i.l.bf16 %v3674_v35  ;;  %v3724_v60 = vpop.permute.xlu2 %3723  ;;  %v2534_v35 = vmul.f32 %v5303_v47, %v2294_v41 }
 0x617   : > { %v3726_v51 = vunpack.i.h.bf16 %v3724_v60  ;;  %v3725_v39 = vunpack.i.l.bf16 %v3724_v60 }
 0x618   : > { %v3093_v42 = vperm.slane %v3676_v63, %v5096_v46  ;;  %v3092_v12 = vperm.slane %v3675_v37, %v5089_v31 }
 0x619   : > { %v3123_v44 = vperm.slane %v3726_v51, %v5096_v46  ;;  %v3122_v2 = vperm.slane %v3725_v39, %v5089_v31  ;;  %v2515_v51 = vmul.f32 %v5301_v1, %v2275_v48 }
 0x61a   : > { %v3094_v53 = vsel %vm3084_vm3, %v3093_v42, %v3092_v12  ;;  %v6173_v42 = vld [vmem:[#allocation25_spill] sm:$0xff] }
 0x61b   : > { %v3280_v30 = vsel %vm3279_vm14, %v3094_v53, %v3278_v45  ;;  %v5612_v33 = vsel %vm3084_vm3, %v3123_v44, %v3122_v2  ;;  %3893 = vperm.xlu1 %3660, %v3892_v14   ;;  %v2274_v12 = vadd.f32 %v6173_v42, %v5200_v15  ;;  %v3937_v44 = vpack.i.bf16 %v2515_v51, %v2534_v35 }
 0x61c   : > { %3898 = vperm.xlu2 %3666, %v6170_v6   ;;  %v3282_v28 = vsel %vm3281_vm15, %v3097_v36, %v3280_v30  ;;  %v2293_v53 = vadd.f32 %v6174_v13, %v5195_v56  ;;  %v2278_v6 = vadd.f32 %v6177_v57, %v5200_v15 }
 0x61d   : > { %v3689_v21 = vpop.permute.xlu1 %3688  ;;  %v3284_v26 = vsel %vm3283_vm1, %v6171_v10, %v3282_v28  ;;  %v2514_v28 = vmul.f32 %v5303_v47, %v2274_v12 }
 0x61e   : > { %v3691_v11 = vunpack.i.h.bf16 %v3689_v21  ;;  %v3690_v8 = vunpack.i.l.bf16 %v3689_v21  ;;  %v3749_v24 = vpop.permute.xlu2 %3748  ;;  %v6178_v21 = vld [vmem:[#allocation58_spill] sm:$0xff]  ;;  %v2533_v27 = vmul.f32 %v5301_v1, %v2293_v53  ;;  %v2518_v32 = vmul.f32 %v5303_v47, %v2278_v6 }
 0x61f   : > { %v3751_v4 = vunpack.i.h.bf16 %v3749_v24  ;;  %v3750_v38 = vunpack.i.l.bf16 %v3749_v24 }
 0x620   : > { %v3102_v34 = vperm.slane %v3691_v11, %v5096_v46  ;;  %v3101_v36 = vperm.slane %v3690_v8, %v5089_v31 }
 0x621   : > { %v3186_v19 = vperm.slane %v3751_v4, %v5096_v46  ;;  %v3185_v20 = vperm.slane %v3750_v38, %v5089_v31  ;;  %v3932_v38 = vpack.i.bf16 %v2533_v27, %v2514_v28  ;;  %v6188_v27 = vld [vmem:[#allocation61_spill] sm:$0xff] }
 0x622   : > { %v3103_v54 = vsel %vm3084_vm3, %v3102_v34, %v3101_v36 }
 0x623   : > { %v5634_v52 = vsel %vm3084_vm3, %v3186_v19, %v3185_v20  ;;  %3908 = vperm.xlu1 %3660, %v3907_v55   ;;  %v3286_v5 = vsel %vm3285_vm2, %v3103_v54, %v3284_v26  ;;  %v2537_v26 = vmul.f32 %v5301_v1, %v2297_v17  ;;  %v6179_v20 = vld [vmem:[#allocation9_spill] sm:$0xff] }
 0x624   : > { %3923 = vperm.xlu2 %3666, %v3922_v25   ;;  %v5641_v7 = vsel %vm3287_vm4, %v5571_v59, %v3286_v5  ;;  %v2277_v25 = vadd.f32 %v6179_v20, %v5195_v56  ;;  %v6180_v5 = vld [vmem:[#allocation64_spill] sm:$0xff] }
 0x625   : > { %v3704_v45 = vpop.permute.xlu1 %3703  ;;  %v3952_v55 = vpack.i.bf16 %v2537_v26, %v2518_v32 }
 0x626   : > { %v3706_v49 = vunpack.i.h.bf16 %v3704_v45  ;;  %v3705_v40 = vunpack.i.l.bf16 %v3704_v45  ;;  %v3764_v63 = vpop.permute.xlu2 %3763  ;;  %v6181_v45 = vld [vmem:[#allocation59_spill] sm:$0xff] }
 0x627   : > { %v3766_v37 = vunpack.i.h.bf16 %v3764_v63  ;;  %v3765_v60 = vunpack.i.l.bf16 %v3764_v63  ;;  %v2517_v63 = vmul.f32 %v5301_v1, %v2277_v25  ;;  %v6182_v1 = vld [vmem:[#allocation12_spill] sm:$0xff] }
 0x628   : > { %v3111_v39 = vperm.slane %v3706_v49, %v5096_v46  ;;  %v3110_v14 = vperm.slane %v3705_v40, %v5089_v31 }
 0x629   : > { %v3195_v59 = vperm.slane %v3766_v37, %v5096_v46  ;;  %v3194_v43 = vperm.slane %v3765_v60, %v5089_v31 }
 0x62a   : > { %v3112_v2 = vsel %vm3084_vm3, %v3111_v39, %v3110_v14  ;;  %v3947_v14 = vpack.i.bf16 %v2517_v63, %v2536_v3  ;;  %v6190_v3 = vld [vmem:[#allocation62_spill] sm:$0xff] }
 0x62b   : > { %v3289_v22 = vsel %vm3275_vm12, %v3112_v2, %v6175_v9  ;;  %v5659_v30 = vsel %vm3084_vm3, %v3195_v59, %v3194_v43  ;;  %3918 = vperm.xlu1 %3660, %v6176_v18   ;;  %v6183_v43 = vpack.i.bf16 %v5422_v50, %v6182_v1  ;;  %v6184_v50 = vld [vmem:[#allocation60_spill] sm:$0xff] }
 0x62c   : > { %v3290_v61 = vsel %vm3277_vm13, %v5588_v16, %v3289_v22  ;;  %3938 = vperm.xlu2 %3666, %v3937_v44   ;;  %v5709_v22 = vpop.permute.xlu0 %3838 }
 0x62d   : > { %v3719_v23 = vpop.permute.xlu1 %3718  ;;  %v3291_v10 = vsel %vm3279_vm14, %v6178_v21, %v3290_v61  ;;  %v6185_v21 = vld [vmem:[#allocation54_spill] sm:$0xff] }
 0x62e   : > { %v3721_v62 = vunpack.i.h.bf16 %v3719_v23  ;;  %v3720_v11 = vunpack.i.l.bf16 %v3719_v23  ;;  %v3779_v8 = vpop.permute.xlu2 %3778 }
 0x62f   : > { %v3781_v58 = vunpack.i.h.bf16 %v3779_v8  ;;  %v3780_v24 = vunpack.i.l.bf16 %v3779_v8 }
 0x630   : > { %v3120_v16 = vperm.slane %v3721_v62, %v5096_v46  ;;  %v3119_v4 = vperm.slane %v3720_v11, %v5089_v31 }
 0x631   : > { %v3132_v34 = vperm.slane %v3781_v58, %v5096_v46  ;;  %v3131_v36 = vperm.slane %v3780_v24, %v5089_v31 }
 0x632   : > { %v3121_v19 = vsel %vm3084_vm3, %v3120_v16, %v3119_v4 }
 0x633   : > { %v3133_v41 = vsel %vm3084_vm3, %v3132_v34, %v3131_v36  ;;  %3933 = vperm.xlu1 %3660, %v3932_v38   ;;  %v3292_v54 = vsel %vm3281_vm15, %v3121_v19, %v3291_v10  ;;  %v6186_v10 = vld [vmem:[#allocation53_spill] sm:$0xff] }
 0x634   : > { %v5687_v29 = vsel %vm3275_vm12, %v6180_v5, %v3133_v41  ;;  %3953 = vperm.xlu2 %3666, %v3952_v55   ;;  %v3293_v15 = vsel %vm3283_vm1, %v5612_v33, %v3292_v54  ;;  %v6187_v26 = vpack.i.bf16 %v6185_v21, %v6186_v10  ;;  %v5726_v0 = vpop.permute.xlu0 %3853  ;;  %v6189_v41 = vld [vmem:[#allocation70_spill] sm:$0xff] }
 0x635   : > { %v3734_v48 = vpop.permute.xlu1 %3733  ;;  %v3294_v35 = vsel %vm3285_vm2, %v6181_v45, %v3293_v15 }
 0x636   : > { %v3736_v56 = vunpack.i.h.bf16 %v3734_v48  ;;  %v3735_v49 = vunpack.i.l.bf16 %v3734_v48  ;;  %v3794_v40 = vpop.permute.xlu2 %3793 }
 0x637   : > { %v3796_v37 = vunpack.i.h.bf16 %v3794_v40  ;;  %v3795_v60 = vunpack.i.l.bf16 %v3794_v40 }
 0x638   : > { %v3129_v51 = vperm.slane %v3736_v56, %v5096_v46  ;;  %v3128_v39 = vperm.slane %v3735_v49, %v5089_v31 }
 0x639   : > { %v3141_v33 = vperm.slane %v3796_v37, %v5096_v46  ;;  %v3140_v47 = vperm.slane %v3795_v60, %v5089_v31 }
 0x63a   : > { %v3130_v42 = vsel %vm3084_vm3, %v3129_v51, %v3128_v39 }
 0x63b   : > { %v5701_v12 = vsel %vm3084_vm3, %v3141_v33, %v3140_v47  ;;  %3948 = vperm.xlu1 %3660, %v3947_v14   ;;  %v5704_v59 = vsel %vm3287_vm4, %v3130_v42, %v3294_v35 }
 0x63c   : > { %3963 = vperm.xlu2 %3666, %v6183_v43   ;;  %v5741_v63 = vpop.permute.xlu0 %3868 }
 0x63d   : > { %v3744_v17 = vpop.permute.xlu1 %3743 }
 0x63e   : > { %v3746_v44 = vunpack.i.h.bf16 %v3744_v17  ;;  %v3745_v2 = vunpack.i.l.bf16 %v3744_v17  ;;  %v3809_v13 = vpop.permute.xlu2 %3808 }
 0x63f   : > { %v3811_v53 = vunpack.i.h.bf16 %v3809_v13  ;;  %v3810_v9 = vunpack.i.l.bf16 %v3809_v13 }
 0x640   : > { %v3183_v18 = vperm.slane %v3746_v44, %v5096_v46  ;;  %v3182_v57 = vperm.slane %v3745_v2, %v5089_v31 }
 0x641   : > { %v3150_v6 = vperm.slane %v3811_v53, %v5096_v46  ;;  %v3149_v61 = vperm.slane %v3810_v9, %v5089_v31 }
 0x642   : > { %v3184_v28 = vsel %vm3084_vm3, %v3183_v18, %v3182_v57 }
 0x643   : > { %v3310_v23 = vsel %vm3275_vm12, %v3184_v28, %v6184_v50  ;;  %3973 = vperm.xlu1 %3660, %v6187_v26   ;;  %v3151_v62 = vsel %vm3084_vm3, %v3150_v6, %v3149_v61 }
 0x644   : > { %v3311_v11 = vsel %vm3277_vm13, %v5634_v52, %v3310_v23  ;;  %v6191_v23 = vld [vmem:[#allocation67_spill] sm:$0xff] }
 0x645   : > { %v3759_v8 = vpop.permute.xlu1 %3758  ;;  %v3312_v58 = vsel %vm3279_vm14, %v6188_v27, %v3311_v11 }
 0x646   : > { %v3761_v24 = vunpack.i.h.bf16 %v3759_v8  ;;  %v3760_v32 = vunpack.i.l.bf16 %v3759_v8  ;;  %v3819_v16 = vpop.permute.xlu2 %3818 }
 0x647   : > { %v3821_v4 = vunpack.i.h.bf16 %v3819_v16  ;;  %v3820_v38 = vunpack.i.l.bf16 %v3819_v16 }
 0x648   : > { %v3192_v34 = vperm.slane %v3761_v24, %v5096_v46  ;;  %v3191_v36 = vperm.slane %v3760_v32, %v5089_v31  ;;  %v3841_v32 = vunpack.i.h.bf16 %v5709_v22 }
 0x649   : > { %v3204_v55 = vperm.slane %v3821_v4, %v5096_v46  ;;  %v3203_v19 = vperm.slane %v3820_v38, %v5089_v31  ;;  %v6192_v38 = vld [vmem:[#allocation68_spill] sm:$0xff] }
 0x64a   : > { %v3193_v52 = vsel %vm3084_vm3, %v3192_v34, %v3191_v36 }
 0x64b   : > { %v3205_v20 = vsel %vm3084_vm3, %v3204_v55, %v3203_v19  ;;  %v3313_v25 = vsel %vm3281_vm15, %v3193_v52, %v3312_v58  ;;  %v3216_v19 = vperm.slane %v3841_v32, %v5096_v46 }
 0x64c   : > { %v3317_v54 = vsel %vm3275_vm12, %v6189_v41, %v3205_v20  ;;  %v3314_v5 = vsel %vm3283_vm1, %v5659_v30, %v3313_v25 }
 0x64d   : > { %v3774_v15 = vpop.permute.xlu1 %3773  ;;  %v3315_v48 = vsel %vm3285_vm2, %v6190_v3, %v3314_v5  ;;  %v5752_v2 = vpop.permute.xlu0 %3903  ;;  %v3855_v5 = vunpack.i.l.bf16 %v5726_v0 }
 0x64e   : > { %v3776_v45 = vunpack.i.h.bf16 %v3774_v15  ;;  %v3775_v35 = vunpack.i.l.bf16 %v3774_v15  ;;  %v3834_v56 = vpop.permute.xlu2 %3833 }
 0x64f   : > { %v3836_v49 = vunpack.i.h.bf16 %v3834_v56  ;;  %v3835_v40 = vunpack.i.l.bf16 %v3834_v56 }
 0x650   : > { %v3201_v37 = vperm.slane %v3776_v45, %v5096_v46  ;;  %v3200_v60 = vperm.slane %v3775_v35, %v5089_v31 }
 0x651   : > { %v3213_v51 = vperm.slane %v3836_v49, %v5096_v46  ;;  %v3212_v39 = vperm.slane %v3835_v40, %v5089_v31 }
 0x652   : > { %v3202_v30 = vsel %vm3084_vm3, %v3201_v37, %v3200_v60  ;;  %v3161_v60 = vperm.slane %v3855_v5, %v5089_v31 }
 0x653   : > { %v3214_v14 = vsel %vm3084_vm3, %v3213_v51, %v3212_v39  ;;  %v5750_v33 = vsel %vm3287_vm4, %v3202_v30, %v3315_v48 }
 0x655   : > { %v3789_v47 = vpop.permute.xlu1 %3788 }
 0x656   : > { %v3791_v42 = vunpack.i.h.bf16 %v3789_v47  ;;  %v3790_v1 = vunpack.i.l.bf16 %v3789_v47  ;;  %v3849_v43 = vpop.permute.xlu2 %3848 }
 0x657   : > { %v3851_v17 = vunpack.i.h.bf16 %v3849_v43  ;;  %v3850_v44 = vunpack.i.l.bf16 %v3849_v43 }
 0x658   : > { %v3138_v13 = vperm.slane %v3791_v42, %v5096_v46  ;;  %v3137_v53 = vperm.slane %v3790_v1, %v5089_v31  ;;  %v3871_v42 = vunpack.i.h.bf16 %v5741_v63  ;;  %v3870_v1 = vunpack.i.l.bf16 %v5741_v63 }
 0x659   : > { %v3159_v9 = vperm.slane %v3851_v17, %v5096_v46  ;;  %v3158_v18 = vperm.slane %v3850_v44, %v5089_v31 }
 0x65a   : > { %v3139_v57 = vsel %vm3084_vm3, %v3138_v13, %v3137_v53 }
 0x65b   : > { %v3297_v6 = vsel %vm3277_vm13, %v3139_v57, %v5687_v29  ;;  %v3160_v61 = vsel %vm3084_vm3, %v3159_v9, %v3158_v18 }
 0x65c   : > { %v3298_v28 = vsel %vm3279_vm14, %v5701_v12, %v3297_v6  ;;  %v3840_v12 = vunpack.i.l.bf16 %v5709_v22  ;;  %v3171_v6 = vperm.slane %v3871_v42, %v5096_v46  ;;  %v3905_v42 = vunpack.i.l.bf16 %v5752_v2 }
 0x65d   : > { %v3804_v50 = vpop.permute.xlu1 %3803  ;;  %v3299_v21 = vsel %vm3281_vm15, %v6191_v23, %v3298_v28  ;;  %v5768_v27 = vpop.permute.xlu0 %3913 }
 0x65e   : > { %v3806_v10 = vunpack.i.h.bf16 %v3804_v50  ;;  %v3805_v26 = vunpack.i.l.bf16 %v3804_v50  ;;  %v3864_v29 = vpop.permute.xlu2 %3863  ;;  %v3215_v52 = vperm.slane %v3840_v12, %v5089_v31 }
 0x65f   : > { %v3866_v30 = vunpack.i.h.bf16 %v3864_v29 }
 0x660   : > { %v3147_v11 = vperm.slane %v3806_v10, %v5096_v46  ;;  %v3146_v8 = vperm.slane %v3805_v26, %v5089_v31  ;;  %v3217_v3 = vsel %vm3084_vm3, %v3216_v19, %v3215_v52 }
 0x661   : > { %v3168_v9 = vperm.slane %v3866_v30, %v5096_v46 }
 0x662   : > { %v3148_v58 = vsel %vm3084_vm3, %v3147_v11, %v3146_v8 }
 0x663   : > { %v3300_v24 = vsel %vm3283_vm1, %v3148_v58, %v3299_v21 }
 0x664   : > { %v3301_v16 = vsel %vm3285_vm2, %v3151_v62, %v3300_v24  ;;  %v3856_v62 = vunpack.i.h.bf16 %v5726_v0 }
 0x665   : > { %v3829_v4 = vpop.permute.xlu1 %3828  ;;  %v5777_v34 = vsel %vm3287_vm4, %v6192_v38, %v3301_v16  ;;  %v5784_v22 = vpop.permute.xlu0 %3928 }
 0x666   : > { %v3831_v36 = vunpack.i.h.bf16 %v3829_v4  ;;  %v3830_v55 = vunpack.i.l.bf16 %v3829_v4  ;;  %v3879_v45 = vpop.permute.xlu2 %3878  ;;  %v3162_v37 = vperm.slane %v3856_v62, %v5096_v46 }
 0x667   : > { %v3881_v21 = vunpack.i.h.bf16 %v3879_v45  ;;  %v3880_v10 = vunpack.i.l.bf16 %v3879_v45 }
 0x668   : > { %v3210_v20 = vperm.slane %v3831_v36, %v5096_v46  ;;  %v3209_v25 = vperm.slane %v3830_v55, %v5089_v31  ;;  %v3163_v39 = vsel %vm3084_vm3, %v3162_v37, %v3161_v60 }
 0x669   : > { %v3177_v16 = vperm.slane %v3881_v21, %v5096_v46  ;;  %v3176_v4 = vperm.slane %v3880_v10, %v5089_v31 }
 0x66a   : > { %v3211_v41 = vsel %vm3084_vm3, %v3210_v20, %v3209_v25 }
 0x66b   : > { %v3318_v15 = vsel %vm3277_vm13, %v3211_v41, %v3317_v54  ;;  %v3178_v52 = vsel %vm3084_vm3, %v3177_v16, %v3176_v4 }
 0x66c   : > { %v3319_v48 = vsel %vm3279_vm14, %v3214_v14, %v3318_v15  ;;  %v3865_v14 = vunpack.i.l.bf16 %v3864_v29 }
 0x66d   : > { %v3844_v35 = vpop.permute.xlu1 %3843  ;;  %v3320_v56 = vsel %vm3281_vm15, %v3217_v3, %v3319_v48  ;;  %v5801_v43 = vpop.permute.xlu0 %3943 }
 0x66e   : > { %v3846_v49 = vunpack.i.h.bf16 %v3844_v35  ;;  %v3845_v40 = vunpack.i.l.bf16 %v3844_v35  ;;  %v3167_v18 = vperm.slane %v3865_v14, %v5089_v31  ;;  %v5806_v57 = vpop.permute.xlu2 %3883 }
 0x670   : > { %v3156_v51 = vperm.slane %v3846_v49, %v5096_v46  ;;  %v3155_v0 = vperm.slane %v3845_v40, %v5089_v31  ;;  %v3169_v23 = vsel %vm3084_vm3, %v3168_v9, %v3167_v18  ;;  %v3255_v18 = vperm.slane %v3905_v42, %v5096_v46 }
 0x672   : > { %v3157_v54 = vsel %vm3084_vm3, %v3156_v51, %v3155_v0 }
 0x673   : > { %v3303_v47 = vsel %vm3275_vm12, %v3160_v61, %v3157_v54  ;;  %v3170_v61 = vperm.slane %v3870_v1, %v5089_v31  ;;  %v3916_v1 = vunpack.i.h.bf16 %v5768_v27 }
 0x674   : > { %v3304_v17 = vsel %vm3277_vm13, %v3163_v39, %v3303_v47  ;;  %v3906_v47 = vunpack.i.h.bf16 %v5752_v2 }
 0x675   : > { %v3859_v44 = vpop.permute.xlu1 %3858  ;;  %v3172_v11 = vsel %vm3084_vm3, %v3171_v6, %v3170_v61  ;;  %v5818_v24 = vpop.permute.xlu0 %3958  ;;  %v3946_v6 = vunpack.i.h.bf16 %v5801_v43  ;;  %v3260_v2 = vperm.slane %v3916_v1, %v5089_v31 }
 0x676   : > { %v3861_v13 = vunpack.i.h.bf16 %v3859_v44  ;;  %v3860_v53 = vunpack.i.l.bf16 %v3859_v44  ;;  %v5824_v55 = vpop.permute.xlu2 %3898  ;;  %v3886_v44 = vunpack.i.h.bf16 %v5806_v57  ;;  %v3257_v9 = vperm.slane %v3906_v47, %v5089_v31 }
 0x678   : > { %v3165_v28 = vperm.slane %v3861_v13, %v5096_v46  ;;  %v3164_v63 = vperm.slane %v3860_v53, %v5089_v31  ;;  %v3931_v53 = vunpack.i.h.bf16 %v5784_v22 }
 0x67a   : > { %v3166_v50 = vsel %vm3084_vm3, %v3165_v28, %v3164_v63  ;;  %v3885_v28 = vunpack.i.l.bf16 %v5806_v57  ;;  %v3901_v63 = vunpack.i.h.bf16 %v5824_v55  ;;  %v3236_v10 = vperm.slane %v3931_v53, %v5089_v31 }
 0x67b   : > { %v3305_v26 = vsel %vm3279_vm14, %v3166_v50, %v3304_v17  ;;  %v3915_v17 = vunpack.i.l.bf16 %v5768_v27  ;;  %v3945_v27 = vunpack.i.l.bf16 %v5801_v43  ;;  %v3900_v43 = vunpack.i.l.bf16 %v5824_v55 }
 0x67c   : > { %v3306_v8 = vsel %vm3281_vm15, %v3169_v23, %v3305_v26  ;;  %v3254_v16 = vperm.slane %v3901_v63, %v5089_v31 }
 0x67d   : > { %v3874_v58 = vpop.permute.xlu1 %3873  ;;  %v3307_v29 = vsel %vm3283_vm1, %v3172_v11, %v3306_v8  ;;  %v3969_v62 = vpop.permute.xlu0 %3968  ;;  %v3231_v50 = vperm.slane %v3915_v17, %v5096_v46 }
 0x67e   : > { %v3876_v32 = vunpack.i.h.bf16 %v3874_v58  ;;  %v3875_v12 = vunpack.i.l.bf16 %v3874_v58  ;;  %v5834_v5 = vpop.permute.xlu2 %3923  ;;  %v3971_v15 = vunpack.i.h.bf16 %v3969_v62  ;;  %v3970_v3 = vunpack.i.l.bf16 %v3969_v62 }
 0x67f   : > { %v3926_v23 = vunpack.i.h.bf16 %v5834_v5  ;;  %v5871_v58 = vperm.slane %v3946_v6, %v5089_v31  ;;  %v3925_v4 = vunpack.i.l.bf16 %v5834_v5 }
 0x680   : > { %v3174_v38 = vperm.slane %v3876_v32, %v5096_v46  ;;  %v3173_v36 = vperm.slane %v3875_v12, %v5089_v31  ;;  %v3222_v49 = vperm.slane %v3971_v15, %v5096_v46  ;;  %v3221_v40 = vperm.slane %v3970_v3, %v5089_v31 }
 0x681   : > { %v3228_v32 = vperm.slane %v3885_v28, %v5096_v46  ;;  %v3240_v12 = vperm.slane %v3945_v27, %v5096_v46 }
 0x682   : > { %v3175_v19 = vsel %vm3084_vm3, %v3174_v38, %v3173_v36  ;;  %v3223_v0 = vsel %vm3084_vm3, %v3222_v49, %v3221_v40  ;;  %v3961_v36 = vunpack.i.h.bf16 %v5818_v24  ;;  %v3256_v49 = vsel %vm3084_vm3, %v3255_v18, %v3254_v16 }
 0x683   : > { %v3308_v20 = vsel %vm3285_vm2, %v3175_v19, %v3307_v29  ;;  %v3263_v19 = vperm.slane %v3926_v23, %v5089_v31  ;;  %v3960_v40 = vunpack.i.l.bf16 %v5818_v24 }
 0x684   : > { %v5830_v25 = vsel %vm3287_vm4, %v3178_v52, %v3308_v20 }
 0x685   : > { %v5832_v41 = vpop.permute.xlu1 %3888  ;;  %v3273_v16 = vperm.slane %v3960_v40, %v5096_v46 }
 0x686   : > { %v3891_v48 = vunpack.i.h.bf16 %v5832_v41  ;;  %v5847_v30 = vpop.permute.xlu2 %3938  ;;  %v3890_v55 = vunpack.i.l.bf16 %v5832_v41 }
 0x688   : > { %v3219_v37 = vperm.slane %v3891_v48, %v5096_v46  ;;  %v3252_v48 = vperm.slane %v3900_v43, %v5096_v46  ;;  %v3246_v47 = vperm.slane %v3890_v55, %v5096_v46 }
 0x68d   : > { %v3894_v45 = vpop.permute.xlu1 %3893 }
 0x68e   : > { %v3895_v35 = vunpack.i.l.bf16 %v3894_v45  ;;  %v5859_v61 = vpop.permute.xlu2 %3953  ;;  %v3896_v21 = vunpack.i.h.bf16 %v3894_v45 }
 0x68f   : > { %v3956_v42 = vunpack.i.h.bf16 %v5859_v61  ;;  %v3955_v17 = vunpack.i.l.bf16 %v5859_v61 }
 0x690   : > { %v3218_v60 = vperm.slane %v3895_v35, %v5089_v31  ;;  %v3251_v52 = vperm.slane %v3896_v21, %v5089_v31 }
 0x691   : > { %v3272_v21 = vperm.slane %v3956_v42, %v5089_v31 }
 0x692   : > { %v3220_v51 = vsel %vm3084_vm3, %v3219_v37, %v3218_v60  ;;  %v3234_v37 = vperm.slane %v3925_v4, %v5096_v46 }
 0x693   : > { %v3321_v54 = vsel %vm3283_vm1, %v3220_v51, %v3320_v56  ;;  %v3930_v56 = vunpack.i.l.bf16 %v5784_v22  ;;  %v3230_v22 = vperm.slane %v3886_v44, %v5089_v31  ;;  %v3941_v51 = vunpack.i.h.bf16 %v5847_v30 }
 0x694   : > { %v5845_v39 = vsel %vm3285_vm2, %v3223_v0, %v3321_v54  ;;  %v3940_v0 = vunpack.i.l.bf16 %v5847_v30  ;;  %v3253_v54 = vsel %vm3084_vm3, %v3252_v48, %v3251_v52 }
 0x695   : > { %v3909_v14 = vpop.permute.xlu1 %3908  ;;  %v3264_v26 = vperm.slane %v3930_v56, %v5096_v46  ;;  %v3232_v38 = vsel %vm3084_vm3, %v3231_v50, %v3230_v22  ;;  %v3331_v30 = vsel %vm3275_vm12, %v3256_v49, %v3253_v54  ;;  %v3239_v28 = vperm.slane %v3941_v51, %v5089_v31  ;;  %v6194_v51 = vld [vmem:[#allocation6_spill] sm:$0xff] }
 0x696   : > { %v3911_v11 = vunpack.i.h.bf16 %v3909_v14  ;;  %v3910_v8 = vunpack.i.l.bf16 %v3909_v14  ;;  %v3964_v14 = vpop.permute.xlu2 %3963  ;;  %v3267_v27 = vperm.slane %v3940_v0, %v5096_v46 }
 0x697   : > { %v3265_v60 = vsel %vm3084_vm3, %v3264_v26, %v3263_v19  ;;  %v3966_v56 = vunpack.i.h.bf16 %v3964_v14  ;;  %v3965_v18 = vunpack.i.l.bf16 %v3964_v14  ;;  %v3243_v26 = vperm.slane %v3955_v17, %v5096_v46  ;;  %v6195_v14 = vld [vmem:[#allocation7_spill] sm:$0xff] }
 0x698   : > { %v3227_v62 = vperm.slane %v3911_v11, %v5089_v31  ;;  %v3258_v15 = vperm.slane %v3910_v8, %v5096_v46  ;;  %v3241_v4 = vsel %vm3084_vm3, %v3240_v12, %v3239_v28 }
 0x699   : > { %v3249_v8 = vperm.slane %v3966_v56, %v5096_v46  ;;  %v3248_v43 = vperm.slane %v3965_v18, %v5089_v31 }
 0x69a   : > { %v3229_v1 = vsel %vm3084_vm3, %v3228_v32, %v3227_v62  ;;  %v3259_v24 = vsel %vm3084_vm3, %v3258_v15, %v3257_v9  ;;  %v3245_v32 = vperm.slane %v3961_v36, %v5089_v31  ;;  %v3274_v62 = vsel %vm3084_vm3, %v3273_v16, %v3272_v21 }
 0x69b   : > { %v3324_v9 = vsel %vm3275_vm12, %v3232_v38, %v3229_v1  ;;  %v3332_v61 = vsel %vm3277_vm13, %v3259_v24, %v3331_v30  ;;  %v3250_v48 = vsel %vm3084_vm3, %v3249_v8, %v3248_v43  ;;  %v6196_v1 = vld [vmem:[#allocation8_spill] sm:$0xff] }
 0x69c   : > { %v3247_v36 = vsel %vm3084_vm3, %v3246_v47, %v3245_v32 }
 0x69d   : > { %v3919_v13 = vpop.permute.xlu1 %3918 }
 0x69e   : > { %v3921_v57 = vunpack.i.h.bf16 %v3919_v13  ;;  %v3920_v29 = vunpack.i.l.bf16 %v3919_v13 }
 0x6a0   : > { %v3233_v5 = vperm.slane %v3921_v57, %v5089_v31  ;;  %v3261_v45 = vperm.slane %v3920_v29, %v5096_v46 }
 0x6a2   : > { %v3235_v44 = vsel %vm3084_vm3, %v3234_v37, %v3233_v5  ;;  %v3262_v13 = vsel %vm3084_vm3, %v3261_v45, %v3260_v2 }
 0x6a3   : > { %v3325_v50 = vsel %vm3277_vm13, %v3235_v44, %v3324_v9  ;;  %v3333_v2 = vsel %vm3279_vm14, %v3262_v13, %v3332_v61 }
 0x6a4   : > { %v3334_v38 = vsel %vm3281_vm15, %v3265_v60, %v3333_v2 }
 0x6a5   : > { %v3934_v20 = vpop.permute.xlu1 %3933 }
 0x6a6   : > { %v3935_v3 = vunpack.i.l.bf16 %v3934_v20  ;;  %v3936_v35 = vunpack.i.h.bf16 %v3934_v20 }
 0x6a8   : > { %v3237_v41 = vperm.slane %v3935_v3, %v5096_v46  ;;  %v3266_v53 = vperm.slane %v3936_v35, %v5089_v31 }
 0x6aa   : > { %v3238_v6 = vsel %vm3084_vm3, %v3237_v41, %v3236_v10  ;;  %v3268_v10 = vsel %vm3084_vm3, %v3267_v27, %v3266_v53 }
 0x6ab   : > { %v3326_v11 = vsel %vm3279_vm14, %v3238_v6, %v3325_v50  ;;  %v3335_v20 = vsel %vm3283_vm1, %v3268_v10, %v3334_v38 }
 0x6ac   : > { %v3327_v55 = vsel %vm3281_vm15, %v3241_v4, %v3326_v11 }
 0x6ad   : > { %v3949_v63 = vpop.permute.xlu1 %3948 }
 0x6ae   : > { %v3951_v22 = vunpack.i.h.bf16 %v3949_v63  ;;  %v3950_v23 = vunpack.i.l.bf16 %v3949_v63 }
 0x6b0   : > { %v3242_v57 = vperm.slane %v3951_v22, %v5089_v31  ;;  %v3270_v29 = vperm.slane %v3950_v23, %v5096_v46 }
 0x6b2   : > { %v3244_v19 = vsel %vm3084_vm3, %v3243_v26, %v3242_v57  ;;  %v3271_v52 = vsel %vm3084_vm3, %v3270_v29, %v5871_v58 }
 0x6b3   : > { %v3336_v15 = vsel %vm3285_vm2, %v3271_v52, %v3335_v20  ;;  %v3328_v3 = vsel %vm3283_vm1, %v3244_v19, %v3327_v55 }
 0x6b4   : > { %v3337_v12 = vsel %vm3287_vm4, %v3274_v62, %v3336_v15  ;;  %v3329_v5 = vsel %vm3285_vm2, %v3247_v36, %v3328_v3 }
 0x6b5   : > { %v3974_v45 = vpop.permute.xlu1 %3973  ;;  %3367 = vmatpush.msrb.mxu3 %v3337_v12  ;;  %v3330_v58 = vsel %vm3287_vm4, %v3250_v48, %v3329_v5 }
 0x6b6   : > { %v3976_v35 = vunpack.i.h.bf16 %v3974_v45  ;;  %v3975_v49 = vunpack.i.l.bf16 %v3974_v45 }
 0x6b7   : > { %3368 = vmatpush.msrb.mxu3 %v3330_v58 }
 0x6b8   : > { %v3225_v40 = vperm.slane %v3976_v35, %v5096_v46  ;;  %v3224_v37 = vperm.slane %v3975_v49, %v5089_v31  ;;  %v2539_v46 = vld [vmem:[%s5984_s3] sm:$0xff]  ;;  %v2540_v31 = vld [vmem:[%s5984_s3 + $0x8] sm:$0xff] }
 0x6ba   : > { %v3226_v41 = vsel %vm3084_vm3, %v3225_v40, %v3224_v37 }
 0x6bb   : > { %v3323_v60 = vsel %vm3287_vm4, %v3226_v41, %v5845_v39 }
 0x6bc   : > { %3369 = vmatpush.msrb.mxu3 %v3323_v60 }
 0x6be   : > { %3370 = vmatpush.msrb.mxu3 %v5750_v33  ;;  %v2541_v33 = vld [vmem:[%s5984_s3 + $0x10] sm:$0xff] }
 0x6c0   : > { %3371 = vmatpush.msrb.mxu3 %v5830_v25 }
 0x6c2   : > { %3372 = vmatpush.msrb.mxu3 %v5777_v34  ;;  %v6193_v34 = vld [vmem:[#allocation5_spill] sm:$0xff] }
 0x6c4   : > { %3373 = vmatpush.msrb.mxu3 %v5704_v59  ;;  %v2542_v59 = vld [vmem:[%s5984_s3 + $0x18] sm:$0xff] }
 0x6c6   : > { %3374 = vmatpush.msrb.mxu3 %v5641_v7 }
 0x6c7   : > { %3526 = vmatmul.msk.f32.vlgmr.msrb.gmra.mxu3 %vm3346_vm5, %v2539_v46 }
 0x6cf   : > { %3527 = vmatmul.msk.f32.gmra.mxu3 %vm3346_vm5, %v2540_v31 }
 0x6d7   : > { %3528 = vmatmul.msk.f32.gmra.mxu3 %vm3346_vm5, %v2541_v33 }
 0x6df   : > { %3529 = vmatmul.msk.f32.gmra.mxu3 %vm3346_vm5, %v2542_v59 }
 0x74a   : > { %v3376_v7 = vpop.f32.mrf.mxu3 }
 0x74b   : > { %v3377_v25 = vadd.f32 %v3376_v7, %v6193_v34 }
 0x74d   : > { %3388 = vst.msk [vmem:[%s244_s15] sm:$0xff] %vm253_vm0, %v3377_v25 }
 0x752   : > { %v3379_v39 = vpop.f32.mrf.mxu3 }
 0x753   : > { %v3380_v0 = vadd.f32 %v3379_v39, %v6194_v51 }
 0x755   : > { %3389 = vst.msk [vmem:[%s244_s15 + $0x8] sm:$0xff] %vm253_vm0, %v3380_v0 }
 0x75a   : > { %v3382_v54 = vpop.f32.mrf.mxu3 }
 0x75b   : > { %v3383_v47 = vadd.f32 %v3382_v54, %v6195_v14 }
 0x75d   : > { %3390 = vst.msk [vmem:[%s244_s15 + $0x10] sm:$0xff] %vm253_vm0, %v3383_v47 }
 0x762   : > { %v3385_v42 = vpop.f32.mrf.mxu3 }
 0x763   : > { %v3386_v24 = vadd.f32 %v3385_v42, %v6196_v1 }
 0x765   : > { %3391 = vst.msk [vmem:[%s244_s15 + $0x18] sm:$0xff] %vm253_vm0, %v3386_v24 }
 0x766 PF: > { %s15_s20 = sadd.s32 1, %s4053_s20   ;;  %s6197_s18 = smov %s4049_s19 }
 0x767   : > { %p12_p5 = scmp.ge.s32.totalorder %s15_s20, 4   ;;  %s6198_s19 = smov %s6200_s21 }
 0x769   :  { %14 = sbr.rel (!%p12_p5) target bundleno = 2 (0x2), region = 74 }

</bundles_post_ra>
